<compile_context>
chip_gen: v6e
topology: v6e:2x2x1
jax: 0.10.0
libtpu: 0.0.40
codegen_flags: <defaults>
</compile_context>

<pallas_src>
import functools

import jax
import jax.numpy as jnp
import numpy as np
from jax.experimental import pallas as pl
from jax.experimental.pallas import tpu as pltpu

EPS = 1e-6


def _gelu_erf(x):
    """Exact (erf-based) GELU matching torch.nn.GELU() defaults.

    erf via Abramowitz–Stegun 7.1.26 (|err| < 1.5e-7): only exp/mul/add needed,
    so it lowers to VPU + EUP ops inside the kernel."""
    z = x * 0.7071067811865476                       # x / sqrt(2)
    a = jnp.abs(z)
    t = 1.0 / (1.0 + 0.3275911 * a)
    poly = t * (0.254829592 + t * (-0.284496736 + t * (1.421413741
               + t * (-1.453152027 + t * 1.061405429))))
    erf_a = 1.0 - poly * jnp.exp(-a * a)
    erf_z = jnp.where(z >= 0.0, erf_a, -erf_a)
    return 0.5 * x * (1.0 + erf_z)


def _conv1x1_ln_act_kernel(*refs, has_mul, apply_ln, apply_gelu):
    """Fused (x [* skip]) -> 1x1 conv -> channels_first LN -> GELU.

    refs (has_mul=True):  x, m, w, b, gamma, beta, out
         (has_mul=False): x,    w, b, gamma, beta, out
      x, m           : (1, Cin, TP)   channels on sublanes, pixels on lanes
      w              : (Cout, Cin)
      b, gamma, beta : (Cout, 1)
      out            : (1, Cout, TP)
    """
    if has_mul:
        x_ref, m_ref, w_ref, b_ref, g_ref, bt_ref, o_ref = refs
    else:
        x_ref, w_ref, b_ref, g_ref, bt_ref, o_ref = refs
        m_ref = None

    x = x_ref[0].astype(jnp.float32)                          # (Cin, TP)
    if has_mul:
        x = x * m_ref[0].astype(jnp.float32)                  # fused skip mul

    # 1x1 conv == matmul over channels (MXU)
    z = jnp.dot(w_ref[...], x, preferred_element_type=jnp.float32)   # (Cout, TP)
    z = z + b_ref[...]

    if apply_ln:
        # channels_first LayerNorm == per-pixel LN over the channel (sublane) axis
        u = jnp.mean(z, axis=0, keepdims=True)                # (1, TP)
        d = z - u
        var = jnp.mean(d * d, axis=0, keepdims=True)
        z = d * jax.lax.rsqrt(var + EPS)
        z = g_ref[...] * z + bt_ref[...]

    if apply_gelu:
        z = _gelu_erf(z)

    o_ref[0] = z.astype(o_ref.dtype)


def _pick_pixel_tile(P, rows, target_bytes=4 << 20):
    """Largest lane tile (multiple of 128, or == P when small) within a VMEM
    budget, preferring exact divisors of P to avoid a ragged tail."""
    if P <= 128:
        return P
    cap = max(128, (target_bytes // (4 * rows) // 128) * 128)
    tp = min((P // 128) * 128, cap)
    t = tp
    while t >= 128:
        if P % t == 0:
            return t
        t -= 128
    return tp                     # ragged tail: boundary blocks are clipped


def conv1x1_ln_act(x, w, b, gamma=None, beta=None, *, mul=None,
                   apply_ln=True, apply_gelu=False):
    """y = [GELU]([LN_cf](W @ (x [* mul]) + b)) on NCHW tensors.

    x, mul : (B, Cin, H, W);  w : (Cout, Cin);  b/gamma/beta : (Cout,)
    Returns (B, Cout, H, W)."""
    B, Cin, H, W = x.shape
    Cout = w.shape[0]
    P = H * W
    has_mul = mul is not None

    rows = Cin * (2 if has_mul else 1) + Cout
    TP = _pick_pixel_tile(P, rows)
    grid = (B, pl.cdiv(P, TP))

    if gamma is None:
        gamma = jnp.ones((Cout,), jnp.float32)
    if beta is None:
        beta = jnp.zeros((Cout,), jnp.float32)

    xmap = lambda bb, pp: (bb, 0, pp)
    cmap = lambda bb, pp: (0, 0)

    inputs = [x.reshape(B, Cin, P)]
    in_specs = [pl.BlockSpec((1, Cin, TP), xmap)]
    if has_mul:
        inputs.append(mul.reshape(B, Cin, P))
        in_specs.append(pl.BlockSpec((1, Cin, TP), xmap))
    inputs += [w.astype(jnp.float32),
               b.reshape(Cout, 1).astype(jnp.float32),
               gamma.reshape(Cout, 1).astype(jnp.float32),
               beta.reshape(Cout, 1).astype(jnp.float32)]
    in_specs += [pl.BlockSpec((Cout, Cin), cmap),
                 pl.BlockSpec((Cout, 1), cmap),
                 pl.BlockSpec((Cout, 1), cmap),
                 pl.BlockSpec((Cout, 1), cmap)]

    out = pl.pallas_call(
        functools.partial(_conv1x1_ln_act_kernel, has_mul=has_mul,
                          apply_ln=apply_ln, apply_gelu=apply_gelu),
        out_shape=jax.ShapeDtypeStruct((B, Cout, P), x.dtype),
        grid_spec=pltpu.PrefetchScalarGridSpec(
            num_scalar_prefetch=0,
            grid=grid,
            in_specs=in_specs,
            out_specs=pl.BlockSpec((1, Cout, TP), xmap),
        ),
        compiler_params=pltpu.CompilerParams(
            dimension_semantics=("parallel", "parallel")),
    )(*inputs)
    return out.reshape(B, Cout, H, W)


def _up2_matrix(n_in):
    """(2*n_in, n_in) bilinear align_corners=True interpolation matrix."""
    n_out = 2 * n_in
    m = np.zeros((n_out, n_in), np.float32)
    if n_in == 1:
        m[:, 0] = 1.0
        return jnp.asarray(m)
    src = np.arange(n_out, dtype=np.float64) * (n_in - 1) / (n_out - 1)
    lo = np.clip(np.floor(src).astype(np.int64), 0, n_in - 2)
    frac = (src - lo).astype(np.float32)
    rows = np.arange(n_out)
    m[rows, lo] += 1.0 - frac
    m[rows, lo + 1] += frac
    return jnp.asarray(m)


def bilinear_up2(x):
    """nn.Upsample(scale_factor=2, mode='bilinear', align_corners=True).
    Pure interpolation / layout — left to XLA as two small matmuls."""
    # TODO(synk): fold this interpolation into the following Pallas conv kernel
    # if the standalone pass ever shows up as an HBM-bound step in profiles.
    B, C, H, W = x.shape
    hi = jax.lax.Precision.HIGHEST
    y = jnp.einsum('uh,bchw->bcuw', _up2_matrix(H), x, precision=hi)
    y = jnp.einsum('vw,bcuw->bcuv', _up2_matrix(W), y, precision=hi)
    return y


def pixel_shuffle(x, r):
    B, C, H, W = x.shape
    c = C // (r * r)
    y = x.reshape(B, c, r, r, H, W)
    y = jnp.transpose(y, (0, 1, 4, 2, 5, 3))
    return y.reshape(B, c, H * r, W * r)


def decoder_forward(params, c3, c2, c1, c0):
    """Decoder.forward.
    # TODO(synk): self.normal_layers needs block_type, which is None in the
    # spec (module not constructible with it); those blocks act as identity.
    """
    def branch(proj_p, pb_w, pb_b, gelu):
        x = conv1x1_ln_act(c3, *proj_p[0], apply_gelu=gelu)
        x = bilinear_up2(x)
        x = conv1x1_ln_act(x, *proj_p[1], mul=c2, apply_gelu=gelu)   # fuses *c2
        x = bilinear_up2(x)
        x = conv1x1_ln_act(x, *proj_p[2], mul=c1, apply_gelu=gelu)   # fuses *c1
        x = bilinear_up2(x)
        y = conv1x1_ln_act(x, pb_w, pb_b, mul=c0,                    # fuses *c0
                           apply_ln=False, apply_gelu=False)
        return pixel_shuffle(y, 2)

    y_clean = branch(params['proj'][0:3], *params['projback'][0], gelu=True)
    y_ref = branch(params['proj'][3:6], *params['projback'][1], gelu=False)
    return jnp.concatenate([y_clean, y_ref], axis=1)


def decoder_reference(params, c3, c2, c1, c0):
    """Pure-JAX reference mirroring the PyTorch module semantics."""
    hi = jax.lax.Precision.HIGHEST

    def conv1x1(x, w, b):
        return (jnp.einsum('oc,bchw->bohw', w, x, precision=hi)
                + b[None, :, None, None])

    def ln_cf(x, g, b):
        u = jnp.mean(x, axis=1, keepdims=True)
        s = jnp.mean((x - u) ** 2, axis=1, keepdims=True)
        xn = (x - u) / jnp.sqrt(s + EPS)
        return g[None, :, None, None] * xn + b[None, :, None, None]

    def stage(x, p, gelu):
        w, b, g, bt = p
        y = ln_cf(conv1x1(x, w, b), g, bt)
        if gelu:
            y = jax.nn.gelu(y, approximate=False)   # torch nn.GELU() (erf)
        return bilinear_up2(y)

    def branch(proj_p, pb, gelu):
        x = stage(c3, proj_p[0], gelu) * c2
        x = stage(x, proj_p[1], gelu) * c1
        x = stage(x, proj_p[2], gelu) * c0
        return pixel_shuffle(conv1x1(x, pb[0], pb[1]), 2)

    y_clean = branch(params['proj'][0:3], params['projback'][0], True)
    y_ref = branch(params['proj'][3:6], params['projback'][1], False)
    return jnp.concatenate([y_clean, y_ref], axis=1)


if __name__ == "__main__":
    key = jax.random.PRNGKey(0)
    B = 2
    dims = [112, 72, 40, 24]          # Decoder defaults
    H3 = W3 = 4                       # c3 spatial; c2/c1/c0 at 2x/4x/8x

    keys = iter(jax.random.split(key, 40))
    nk = lambda: next(keys)

    c3 = jax.random.normal(nk(), (B, dims[0], H3, W3), jnp.float32)
    c2 = jax.random.normal(nk(), (B, dims[1], 2 * H3, 2 * W3), jnp.float32)
    c1 = jax.random.normal(nk(), (B, dims[2], 4 * H3, 4 * W3), jnp.float32)
    c0 = jax.random.normal(nk(), (B, dims[3], 8 * H3, 8 * W3), jnp.float32)

    def make_proj(cin, cout):
        w = 0.05 * jax.random.normal(nk(), (cout, cin), jnp.float32)
        b = 0.01 * jax.random.normal(nk(), (cout,), jnp.float32)
        g = 1.0 + 0.1 * jax.random.normal(nk(), (cout,), jnp.float32)
        bt = 0.05 * jax.random.normal(nk(), (cout,), jnp.float32)
        return (w, b, g, bt)

    def make_projback():
        w = 0.05 * jax.random.normal(nk(), (12, dims[-1]), jnp.float32)
        b = 0.01 * jax.random.normal(nk(), (12,), jnp.float32)
        return (w, b)

    proj = [make_proj(dims[i], dims[i + 1]) for i in range(3)]      # clean
    proj += [make_proj(dims[i], dims[i + 1]) for i in range(3)]     # ref
    params = {'proj': proj, 'projback': [make_projback(), make_projback()]}

    fwd = jax.jit(decoder_forward)
    out = jax.block_until_ready(fwd(params, c3, c2, c1, c0))
    ref = jax.block_until_ready(decoder_reference(params, c3, c2, c1, c0))

    assert out.shape == (B, 6, 16 * H3, 16 * W3), out.shape
    assert bool(jnp.allclose(out, ref, atol=1e-3, rtol=1e-3)), (
        "mismatch vs reference: max abs err = %g"
        % float(jnp.max(jnp.abs(out - ref))))

    print("KERNEL_OK")
</pallas_src>

<mosaic_0001>
module attributes {stable_mosaic.version = 11 : i64} {
  func.func @_conv1x1_ln_act_kernel(%arg0: i32, %arg1: i32, %arg2: memref<1x112x16xf32, #tpu.memory_space<vmem>>, %arg3: memref<72x112xf32, #tpu.memory_space<vmem>>, %arg4: memref<72x1xf32, #tpu.memory_space<vmem>>, %arg5: memref<72x1xf32, #tpu.memory_space<vmem>>, %arg6: memref<72x1xf32, #tpu.memory_space<vmem>>, %arg7: memref<1x72x16xf32, #tpu.memory_space<vmem>>) attributes {dimension_semantics = [#tpu.dimension_semantics<parallel>, #tpu.dimension_semantics<parallel>], iteration_bounds = array<i64: 2, 1>, scalar_prefetch = 0 : i64, scratch_operands = 0 : i64, tpu.core_type = #tpu.core_type<tc>, window_params = [{transform_indices = @transform_0, window_bounds = array<i64: 1, 112, 16>}, {pipeline_mode = #tpu.pipeline_mode<synchronous>, transform_indices = @transform_1, window_bounds = array<i64: 72, 112>}, {pipeline_mode = #tpu.pipeline_mode<synchronous>, transform_indices = @transform_2, window_bounds = array<i64: 72, 1>}, {pipeline_mode = #tpu.pipeline_mode<synchronous>, transform_indices = @transform_3, window_bounds = array<i64: 72, 1>}, {pipeline_mode = #tpu.pipeline_mode<synchronous>, transform_indices = @transform_4, window_bounds = array<i64: 72, 1>}, {transform_indices = @transform_5, window_bounds = array<i64: 1, 72, 16>}]} {
    %c0 = arith.constant 0 : index
    %c0_0 = arith.constant 0 : index
    %c0_1 = arith.constant 0 : index
    %0 = vector.load %arg2[%c0, %c0_0, %c0_1] : memref<1x112x16xf32, #tpu.memory_space<vmem>>, vector<1x112x16xf32>
    %1 = vector.shape_cast %0 : vector<1x112x16xf32> to vector<112x16xf32>
    %c0_2 = arith.constant 0 : index
    %c0_3 = arith.constant 0 : index
    %2 = vector.load %arg3[%c0_2, %c0_3] : memref<72x112xf32, #tpu.memory_space<vmem>>, vector<72x112xf32>
    %cst = arith.constant dense<0.000000e+00> : vector<72x16xf32>
    %3 = tpu.matmul %2, %1, %cst {dimension_numbers = #tpu.dot_dimension_numbers<[1], [0], [0], [1], [0, 0, 1, 1], [], []>} : vector<72x112xf32>, vector<112x16xf32>, vector<72x16xf32> -> vector<72x16xf32>
    %c0_4 = arith.constant 0 : index
    %c0_5 = arith.constant 0 : index
    %4 = vector.load %arg4[%c0_4, %c0_5] : memref<72x1xf32, #tpu.memory_space<vmem>>, vector<72x1xf32>
    %5 = vector.broadcast %4 : vector<72x1xf32> to vector<72x16xf32>
    %6 = arith.addf %3, %5 : vector<72x16xf32>
    %cst_6 = arith.constant dense<0.000000e+00> : vector<16xf32>
    %7 = vector.multi_reduction <add>, %6, %cst_6 [0] : vector<72x16xf32> to vector<16xf32>
    %8 = vector.shape_cast %7 : vector<16xf32> to vector<1x16xf32>
    %cst_7 = arith.constant 7.200000e+01 : f32
    %9 = vector.broadcast %cst_7 : f32 to vector<1x16xf32>
    %10 = arith.divf %8, %9 : vector<1x16xf32>
    %11 = vector.broadcast %10 : vector<1x16xf32> to vector<72x16xf32>
    %12 = arith.subf %6, %11 : vector<72x16xf32>
    %13 = arith.mulf %12, %12 : vector<72x16xf32>
    %cst_8 = arith.constant dense<0.000000e+00> : vector<16xf32>
    %14 = vector.multi_reduction <add>, %13, %cst_8 [0] : vector<72x16xf32> to vector<16xf32>
    %15 = vector.shape_cast %14 : vector<16xf32> to vector<1x16xf32>
    %cst_9 = arith.constant 7.200000e+01 : f32
    %16 = vector.broadcast %cst_9 : f32 to vector<1x16xf32>
    %17 = arith.divf %15, %16 : vector<1x16xf32>
    %cst_10 = arith.constant 9.99999997E-7 : f32
    %18 = vector.broadcast %cst_10 : f32 to vector<1x16xf32>
    %19 = arith.addf %17, %18 : vector<1x16xf32>
    %20 = math.rsqrt %19 : vector<1x16xf32>
    %21 = vector.broadcast %20 : vector<1x16xf32> to vector<72x16xf32>
    %22 = arith.mulf %12, %21 : vector<72x16xf32>
    %c0_11 = arith.constant 0 : index
    %c0_12 = arith.constant 0 : index
    %23 = vector.load %arg5[%c0_11, %c0_12] : memref<72x1xf32, #tpu.memory_space<vmem>>, vector<72x1xf32>
    %24 = vector.broadcast %23 : vector<72x1xf32> to vector<72x16xf32>
    %25 = arith.mulf %24, %22 : vector<72x16xf32>
    %c0_13 = arith.constant 0 : index
    %c0_14 = arith.constant 0 : index
    %26 = vector.load %arg6[%c0_13, %c0_14] : memref<72x1xf32, #tpu.memory_space<vmem>>, vector<72x1xf32>
    %27 = vector.broadcast %26 : vector<72x1xf32> to vector<72x16xf32>
    %28 = arith.addf %25, %27 : vector<72x16xf32>
    %cst_15 = arith.constant 0.707106769 : f32
    %29 = vector.broadcast %cst_15 : f32 to vector<72x16xf32>
    %30 = arith.mulf %28, %29 : vector<72x16xf32>
    %31 = math.absf %30 : vector<72x16xf32>
    %cst_16 = arith.constant 0.327591091 : f32
    %32 = vector.broadcast %cst_16 : f32 to vector<72x16xf32>
    %33 = arith.mulf %32, %31 : vector<72x16xf32>
    %cst_17 = arith.constant 1.000000e+00 : f32
    %34 = vector.broadcast %cst_17 : f32 to vector<72x16xf32>
    %35 = arith.addf %34, %33 : vector<72x16xf32>
    %cst_18 = arith.constant 1.000000e+00 : f32
    %36 = vector.broadcast %cst_18 : f32 to vector<72x16xf32>
    %37 = arith.divf %36, %35 : vector<72x16xf32>
    %cst_19 = arith.constant 1.06140542 : f32
    %38 = vector.broadcast %cst_19 : f32 to vector<72x16xf32>
    %39 = arith.mulf %37, %38 : vector<72x16xf32>
    %cst_20 = arith.constant -1.45315206 : f32
    %40 = vector.broadcast %cst_20 : f32 to vector<72x16xf32>
    %41 = arith.addf %40, %39 : vector<72x16xf32>
    %42 = arith.mulf %37, %41 : vector<72x16xf32>
    %cst_21 = arith.constant 1.42141378 : f32
    %43 = vector.broadcast %cst_21 : f32 to vector<72x16xf32>
    %44 = arith.addf %43, %42 : vector<72x16xf32>
    %45 = arith.mulf %37, %44 : vector<72x16xf32>
    %cst_22 = arith.constant -0.284496725 : f32
    %46 = vector.broadcast %cst_22 : f32 to vector<72x16xf32>
    %47 = arith.addf %46, %45 : vector<72x16xf32>
    %48 = arith.mulf %37, %47 : vector<72x16xf32>
    %cst_23 = arith.constant 0.254829586 : f32
    %49 = vector.broadcast %cst_23 : f32 to vector<72x16xf32>
    %50 = arith.addf %49, %48 : vector<72x16xf32>
    %51 = arith.mulf %37, %50 : vector<72x16xf32>
    %cst_24 = arith.constant 0.000000e+00 : f32
    %52 = vector.broadcast %cst_24 : f32 to vector<72x16xf32>
    %53 = arith.subf %52, %31 : vector<72x16xf32>
    %54 = arith.mulf %53, %31 : vector<72x16xf32>
    %55 = math.exp %54 : vector<72x16xf32>
    %56 = arith.mulf %51, %55 : vector<72x16xf32>
    %cst_25 = arith.constant 1.000000e+00 : f32
    %57 = vector.broadcast %cst_25 : f32 to vector<72x16xf32>
    %58 = arith.subf %57, %56 : vector<72x16xf32>
    %cst_26 = arith.constant 0.000000e+00 : f32
    %59 = vector.broadcast %cst_26 : f32 to vector<72x16xf32>
    %60 = arith.cmpf oge, %30, %59 : vector<72x16xf32>
    %cst_27 = arith.constant 0.000000e+00 : f32
    %61 = vector.broadcast %cst_27 : f32 to vector<72x16xf32>
    %62 = arith.subf %61, %58 : vector<72x16xf32>
    %63 = arith.select %60, %58, %62 : vector<72x16xi1>, vector<72x16xf32>
    %cst_28 = arith.constant 5.000000e-01 : f32
    %64 = vector.broadcast %cst_28 : f32 to vector<72x16xf32>
    %65 = arith.mulf %64, %28 : vector<72x16xf32>
    %cst_29 = arith.constant 1.000000e+00 : f32
    %66 = vector.broadcast %cst_29 : f32 to vector<72x16xf32>
    %67 = arith.addf %66, %63 : vector<72x16xf32>
    %68 = arith.mulf %65, %67 : vector<72x16xf32>
    %c0_30 = arith.constant 0 : index
    %c0_31 = arith.constant 0 : index
    %c0_32 = arith.constant 0 : index
    %69 = vector.load %arg7[%c0_30, %c0_31, %c0_32] : memref<1x72x16xf32, #tpu.memory_space<vmem>>, vector<1x72x16xf32>
    %70 = vector.shape_cast %69 : vector<1x72x16xf32> to vector<72x16xf32>
    %71 = vector.shape_cast %68 : vector<72x16xf32> to vector<1x72x16xf32>
    tpu.vector_store %arg7[%c0_30, %c0_31, %c0_32], %71 {strides = array<i32>} : memref<1x72x16xf32, #tpu.memory_space<vmem>>, vector<1x72x16xf32>,
    return
  }
  func.func @transform_0(%arg0: i32, %arg1: i32) -> (i32, i32, i32) {
    %c0_i32 = arith.constant 0 : i32
    %c0_i32_0 = arith.constant 0 : i32
    return %arg0, %c0_i32, %arg1 : i32, i32, i32
  }
  func.func @transform_1(%arg0: i32, %arg1: i32) -> (i32, i32) {
    %c0_i32 = arith.constant 0 : i32
    %c0_i32_0 = arith.constant 0 : i32
    %c0_i32_1 = arith.constant 0 : i32
    return %c0_i32, %c0_i32_0 : i32, i32
  }
  func.func @transform_2(%arg0: i32, %arg1: i32) -> (i32, i32) {
    %c0_i32 = arith.constant 0 : i32
    %c0_i32_0 = arith.constant 0 : i32
    %c0_i32_1 = arith.constant 0 : i32
    return %c0_i32, %c0_i32_0 : i32, i32
  }
  func.func @transform_3(%arg0: i32, %arg1: i32) -> (i32, i32) {
    %c0_i32 = arith.constant 0 : i32
    %c0_i32_0 = arith.constant 0 : i32
    %c0_i32_1 = arith.constant 0 : i32
    return %c0_i32, %c0_i32_0 : i32, i32
  }
  func.func @transform_4(%arg0: i32, %arg1: i32) -> (i32, i32) {
    %c0_i32 = arith.constant 0 : i32
    %c0_i32_0 = arith.constant 0 : i32
    %c0_i32_1 = arith.constant 0 : i32
    return %c0_i32, %c0_i32_0 : i32, i32
  }
  func.func @transform_5(%arg0: i32, %arg1: i32) -> (i32, i32, i32) {
    %c0_i32 = arith.constant 0 : i32
    %c0_i32_0 = arith.constant 0 : i32
    return %arg0, %c0_i32, %arg1 : i32, i32, i32
  }
}

module attributes {stable_mosaic.version = 11 : i64} {
  func.func @_conv1x1_ln_act_kernel(%arg0: i32, %arg1: i32, %arg2: memref<1x112x16xf32, #tpu.memory_space<vmem>>, %arg3: memref<72x112xf32, #tpu.memory_space<vmem>>, %arg4: memref<72x1xf32, #tpu.memory_space<vmem>>, %arg5: memref<72x1xf32, #tpu.memory_space<vmem>>, %arg6: memref<72x1xf32, #tpu.memory_space<vmem>>, %arg7: memref<1x72x16xf32, #tpu.memory_space<vmem>>) attributes {dimension_semantics = [#tpu.dimension_semantics<parallel>, #tpu.dimension_semantics<parallel>], iteration_bounds = array<i64: 2, 1>, scalar_prefetch = 0 : i64, scratch_operands = 0 : i64, tpu.core_type = #tpu.core_type<tc>, window_params = [{transform_indices = @transform_0, window_bounds = array<i64: 1, 112, 16>}, {pipeline_mode = #tpu.pipeline_mode<synchronous>, transform_indices = @transform_1, window_bounds = array<i64: 72, 112>}, {pipeline_mode = #tpu.pipeline_mode<synchronous>, transform_indices = @transform_2, window_bounds = array<i64: 72, 1>}, {pipeline_mode = #tpu.pipeline_mode<synchronous>, transform_indices = @transform_3, window_bounds = array<i64: 72, 1>}, {pipeline_mode = #tpu.pipeline_mode<synchronous>, transform_indices = @transform_4, window_bounds = array<i64: 72, 1>}, {transform_indices = @transform_5, window_bounds = array<i64: 1, 72, 16>}]} {
    %c0 = arith.constant 0 : index
    %c0_0 = arith.constant 0 : index
    %c0_1 = arith.constant 0 : index
    %0 = vector.load %arg2[%c0, %c0_0, %c0_1] : memref<1x112x16xf32, #tpu.memory_space<vmem>>, vector<1x112x16xf32>
    %1 = vector.shape_cast %0 : vector<1x112x16xf32> to vector<112x16xf32>
    %c0_2 = arith.constant 0 : index
    %c0_3 = arith.constant 0 : index
    %2 = vector.load %arg3[%c0_2, %c0_3] : memref<72x112xf32, #tpu.memory_space<vmem>>, vector<72x112xf32>
    %cst = arith.constant dense<0.000000e+00> : vector<72x16xf32>
    %3 = tpu.matmul %2, %1, %cst {dimension_numbers = #tpu.dot_dimension_numbers<[1], [0], [0], [1], [0, 0, 1, 1], [], []>} : vector<72x112xf32>, vector<112x16xf32>, vector<72x16xf32> -> vector<72x16xf32>
    %c0_4 = arith.constant 0 : index
    %c0_5 = arith.constant 0 : index
    %4 = vector.load %arg4[%c0_4, %c0_5] : memref<72x1xf32, #tpu.memory_space<vmem>>, vector<72x1xf32>
    %5 = vector.broadcast %4 : vector<72x1xf32> to vector<72x16xf32>
    %6 = arith.addf %3, %5 : vector<72x16xf32>
    %cst_6 = arith.constant dense<0.000000e+00> : vector<16xf32>
    %7 = vector.multi_reduction <add>, %6, %cst_6 [0] : vector<72x16xf32> to vector<16xf32>
    %8 = vector.shape_cast %7 : vector<16xf32> to vector<1x16xf32>
    %cst_7 = arith.constant 7.200000e+01 : f32
    %9 = vector.broadcast %cst_7 : f32 to vector<1x16xf32>
    %10 = arith.divf %8, %9 : vector<1x16xf32>
    %11 = vector.broadcast %10 : vector<1x16xf32> to vector<72x16xf32>
    %12 = arith.subf %6, %11 : vector<72x16xf32>
    %13 = arith.mulf %12, %12 : vector<72x16xf32>
    %cst_8 = arith.constant dense<0.000000e+00> : vector<16xf32>
    %14 = vector.multi_reduction <add>, %13, %cst_8 [0] : vector<72x16xf32> to vector<16xf32>
    %15 = vector.shape_cast %14 : vector<16xf32> to vector<1x16xf32>
    %cst_9 = arith.constant 7.200000e+01 : f32
    %16 = vector.broadcast %cst_9 : f32 to vector<1x16xf32>
    %17 = arith.divf %15, %16 : vector<1x16xf32>
    %cst_10 = arith.constant 9.99999997E-7 : f32
    %18 = vector.broadcast %cst_10 : f32 to vector<1x16xf32>
    %19 = arith.addf %17, %18 : vector<1x16xf32>
    %20 = math.rsqrt %19 : vector<1x16xf32>
    %21 = vector.broadcast %20 : vector<1x16xf32> to vector<72x16xf32>
    %22 = arith.mulf %12, %21 : vector<72x16xf32>
    %c0_11 = arith.constant 0 : index
    %c0_12 = arith.constant 0 : index
    %23 = vector.load %arg5[%c0_11, %c0_12] : memref<72x1xf32, #tpu.memory_space<vmem>>, vector<72x1xf32>
    %24 = vector.broadcast %23 : vector<72x1xf32> to vector<72x16xf32>
    %25 = arith.mulf %24, %22 : vector<72x16xf32>
    %c0_13 = arith.constant 0 : index
    %c0_14 = arith.constant 0 : index
    %26 = vector.load %arg6[%c0_13, %c0_14] : memref<72x1xf32, #tpu.memory_space<vmem>>, vector<72x1xf32>
    %27 = vector.broadcast %26 : vector<72x1xf32> to vector<72x16xf32>
    %28 = arith.addf %25, %27 : vector<72x16xf32>
    %c0_15 = arith.constant 0 : index
    %c0_16 = arith.constant 0 : index
    %c0_17 = arith.constant 0 : index
    %29 = vector.load %arg7[%c0_15, %c0_16, %c0_17] : memref<1x72x16xf32, #tpu.memory_space<vmem>>, vector<1x72x16xf32>
    %30 = vector.shape_cast %29 : vector<1x72x16xf32> to vector<72x16xf32>
    %31 = vector.shape_cast %28 : vector<72x16xf32> to vector<1x72x16xf32>
    tpu.vector_store %arg7[%c0_15, %c0_16, %c0_17], %31 {strides = array<i32>} : memref<1x72x16xf32, #tpu.memory_space<vmem>>, vector<1x72x16xf32>,
    return
  }
  func.func @transform_0(%arg0: i32, %arg1: i32) -> (i32, i32, i32) {
    %c0_i32 = arith.constant 0 : i32
    %c0_i32_0 = arith.constant 0 : i32
    return %arg0, %c0_i32, %arg1 : i32, i32, i32
  }
  func.func @transform_1(%arg0: i32, %arg1: i32) -> (i32, i32) {
    %c0_i32 = arith.constant 0 : i32
    %c0_i32_0 = arith.constant 0 : i32
    %c0_i32_1 = arith.constant 0 : i32
    return %c0_i32, %c0_i32_0 : i32, i32
  }
  func.func @transform_2(%arg0: i32, %arg1: i32) -> (i32, i32) {
    %c0_i32 = arith.constant 0 : i32
    %c0_i32_0 = arith.constant 0 : i32
    %c0_i32_1 = arith.constant 0 : i32
    return %c0_i32, %c0_i32_0 : i32, i32
  }
  func.func @transform_3(%arg0: i32, %arg1: i32) -> (i32, i32) {
    %c0_i32 = arith.constant 0 : i32
    %c0_i32_0 = arith.constant 0 : i32
    %c0_i32_1 = arith.constant 0 : i32
    return %c0_i32, %c0_i32_0 : i32, i32
  }
  func.func @transform_4(%arg0: i32, %arg1: i32) -> (i32, i32) {
    %c0_i32 = arith.constant 0 : i32
    %c0_i32_0 = arith.constant 0 : i32
    %c0_i32_1 = arith.constant 0 : i32
    return %c0_i32, %c0_i32_0 : i32, i32
  }
  func.func @transform_5(%arg0: i32, %arg1: i32) -> (i32, i32, i32) {
    %c0_i32 = arith.constant 0 : i32
    %c0_i32_0 = arith.constant 0 : i32
    return %arg0, %c0_i32, %arg1 : i32, i32, i32
  }
}

module attributes {stable_mosaic.version = 11 : i64} {
  func.func @_conv1x1_ln_act_kernel(%arg0: i32, %arg1: i32, %arg2: memref<1x72x64xf32, #tpu.memory_space<vmem>>, %arg3: memref<1x72x64xf32, #tpu.memory_space<vmem>>, %arg4: memref<40x72xf32, #tpu.memory_space<vmem>>, %arg5: memref<40x1xf32, #tpu.memory_space<vmem>>, %arg6: memref<40x1xf32, #tpu.memory_space<vmem>>, %arg7: memref<40x1xf32, #tpu.memory_space<vmem>>, %arg8: memref<1x40x64xf32, #tpu.memory_space<vmem>>) attributes {dimension_semantics = [#tpu.dimension_semantics<parallel>, #tpu.dimension_semantics<parallel>], iteration_bounds = array<i64: 2, 1>, scalar_prefetch = 0 : i64, scratch_operands = 0 : i64, tpu.core_type = #tpu.core_type<tc>, window_params = [{transform_indices = @transform_0, window_bounds = array<i64: 1, 72, 64>}, {transform_indices = @transform_1, window_bounds = array<i64: 1, 72, 64>}, {pipeline_mode = #tpu.pipeline_mode<synchronous>, transform_indices = @transform_2, window_bounds = array<i64: 40, 72>}, {pipeline_mode = #tpu.pipeline_mode<synchronous>, transform_indices = @transform_3, window_bounds = array<i64: 40, 1>}, {pipeline_mode = #tpu.pipeline_mode<synchronous>, transform_indices = @transform_4, window_bounds = array<i64: 40, 1>}, {pipeline_mode = #tpu.pipeline_mode<synchronous>, transform_indices = @transform_5, window_bounds = array<i64: 40, 1>}, {transform_indices = @transform_6, window_bounds = array<i64: 1, 40, 64>}]} {
    %c0 = arith.constant 0 : index
    %c0_0 = arith.constant 0 : index
    %c0_1 = arith.constant 0 : index
    %0 = vector.load %arg2[%c0, %c0_0, %c0_1] : memref<1x72x64xf32, #tpu.memory_space<vmem>>, vector<1x72x64xf32>
    %1 = vector.shape_cast %0 : vector<1x72x64xf32> to vector<72x64xf32>
    %c0_2 = arith.constant 0 : index
    %c0_3 = arith.constant 0 : index
    %c0_4 = arith.constant 0 : index
    %2 = vector.load %arg3[%c0_2, %c0_3, %c0_4] : memref<1x72x64xf32, #tpu.memory_space<vmem>>, vector<1x72x64xf32>
    %3 = vector.shape_cast %2 : vector<1x72x64xf32> to vector<72x64xf32>
    %4 = arith.mulf %1, %3 : vector<72x64xf32>
    %c0_5 = arith.constant 0 : index
    %c0_6 = arith.constant 0 : index
    %5 = vector.load %arg4[%c0_5, %c0_6] : memref<40x72xf32, #tpu.memory_space<vmem>>, vector<40x72xf32>
    %cst = arith.constant dense<0.000000e+00> : vector<40x64xf32>
    %6 = tpu.matmul %5, %4, %cst {dimension_numbers = #tpu.dot_dimension_numbers<[1], [0], [0], [1], [0, 0, 1, 1], [], []>} : vector<40x72xf32>, vector<72x64xf32>, vector<40x64xf32> -> vector<40x64xf32>
    %c0_7 = arith.constant 0 : index
    %c0_8 = arith.constant 0 : index
    %7 = vector.load %arg5[%c0_7, %c0_8] : memref<40x1xf32, #tpu.memory_space<vmem>>, vector<40x1xf32>
    %8 = vector.broadcast %7 : vector<40x1xf32> to vector<40x64xf32>
    %9 = arith.addf %6, %8 : vector<40x64xf32>
    %cst_9 = arith.constant dense<0.000000e+00> : vector<64xf32>
    %10 = vector.multi_reduction <add>, %9, %cst_9 [0] : vector<40x64xf32> to vector<64xf32>
    %11 = vector.shape_cast %10 : vector<64xf32> to vector<1x64xf32>
    %cst_10 = arith.constant 4.000000e+01 : f32
    %12 = vector.broadcast %cst_10 : f32 to vector<1x64xf32>
    %13 = arith.divf %11, %12 : vector<1x64xf32>
    %14 = vector.broadcast %13 : vector<1x64xf32> to vector<40x64xf32>
    %15 = arith.subf %9, %14 : vector<40x64xf32>
    %16 = arith.mulf %15, %15 : vector<40x64xf32>
    %cst_11 = arith.constant dense<0.000000e+00> : vector<64xf32>
    %17 = vector.multi_reduction <add>, %16, %cst_11 [0] : vector<40x64xf32> to vector<64xf32>
    %18 = vector.shape_cast %17 : vector<64xf32> to vector<1x64xf32>
    %cst_12 = arith.constant 4.000000e+01 : f32
    %19 = vector.broadcast %cst_12 : f32 to vector<1x64xf32>
    %20 = arith.divf %18, %19 : vector<1x64xf32>
    %cst_13 = arith.constant 9.99999997E-7 : f32
    %21 = vector.broadcast %cst_13 : f32 to vector<1x64xf32>
    %22 = arith.addf %20, %21 : vector<1x64xf32>
    %23 = math.rsqrt %22 : vector<1x64xf32>
    %24 = vector.broadcast %23 : vector<1x64xf32> to vector<40x64xf32>
    %25 = arith.mulf %15, %24 : vector<40x64xf32>
    %c0_14 = arith.constant 0 : index
    %c0_15 = arith.constant 0 : index
    %26 = vector.load %arg6[%c0_14, %c0_15] : memref<40x1xf32, #tpu.memory_space<vmem>>, vector<40x1xf32>
    %27 = vector.broadcast %26 : vector<40x1xf32> to vector<40x64xf32>
    %28 = arith.mulf %27, %25 : vector<40x64xf32>
    %c0_16 = arith.constant 0 : index
    %c0_17 = arith.constant 0 : index
    %29 = vector.load %arg7[%c0_16, %c0_17] : memref<40x1xf32, #tpu.memory_space<vmem>>, vector<40x1xf32>
    %30 = vector.broadcast %29 : vector<40x1xf32> to vector<40x64xf32>
    %31 = arith.addf %28, %30 : vector<40x64xf32>
    %c0_18 = arith.constant 0 : index
    %c0_19 = arith.constant 0 : index
    %c0_20 = arith.constant 0 : index
    %32 = vector.load %arg8[%c0_18, %c0_19, %c0_20] : memref<1x40x64xf32, #tpu.memory_space<vmem>>, vector<1x40x64xf32>
    %33 = vector.shape_cast %32 : vector<1x40x64xf32> to vector<40x64xf32>
    %34 = vector.shape_cast %31 : vector<40x64xf32> to vector<1x40x64xf32>
    tpu.vector_store %arg8[%c0_18, %c0_19, %c0_20], %34 {strides = array<i32>} : memref<1x40x64xf32, #tpu.memory_space<vmem>>, vector<1x40x64xf32>,
    return
  }
  func.func @transform_0(%arg0: i32, %arg1: i32) -> (i32, i32, i32) {
    %c0_i32 = arith.constant 0 : i32
    %c0_i32_0 = arith.constant 0 : i32
    return %arg0, %c0_i32, %arg1 : i32, i32, i32
  }
  func.func @transform_1(%arg0: i32, %arg1: i32) -> (i32, i32, i32) {
    %c0_i32 = arith.constant 0 : i32
    %c0_i32_0 = arith.constant 0 : i32
    return %arg0, %c0_i32, %arg1 : i32, i32, i32
  }
  func.func @transform_2(%arg0: i32, %arg1: i32) -> (i32, i32) {
    %c0_i32 = arith.constant 0 : i32
    %c0_i32_0 = arith.constant 0 : i32
    %c0_i32_1 = arith.constant 0 : i32
    return %c0_i32, %c0_i32_0 : i32, i32
  }
  func.func @transform_3(%arg0: i32, %arg1: i32) -> (i32, i32) {
    %c0_i32 = arith.constant 0 : i32
    %c0_i32_0 = arith.constant 0 : i32
    %c0_i32_1 = arith.constant 0 : i32
    return %c0_i32, %c0_i32_0 : i32, i32
  }
  func.func @transform_4(%arg0: i32, %arg1: i32) -> (i32, i32) {
    %c0_i32 = arith.constant 0 : i32
    %c0_i32_0 = arith.constant 0 : i32
    %c0_i32_1 = arith.constant 0 : i32
    return %c0_i32, %c0_i32_0 : i32, i32
  }
  func.func @transform_5(%arg0: i32, %arg1: i32) -> (i32, i32) {
    %c0_i32 = arith.constant 0 : i32
    %c0_i32_0 = arith.constant 0 : i32
    %c0_i32_1 = arith.constant 0 : i32
    return %c0_i32, %c0_i32_0 : i32, i32
  }
  func.func @transform_6(%arg0: i32, %arg1: i32) -> (i32, i32, i32) {
    %c0_i32 = arith.constant 0 : i32
    %c0_i32_0 = arith.constant 0 : i32
    return %arg0, %c0_i32, %arg1 : i32, i32, i32
  }
}

module attributes {stable_mosaic.version = 11 : i64} {
  func.func @_conv1x1_ln_act_kernel(%arg0: i32, %arg1: i32, %arg2: memref<1x72x64xf32, #tpu.memory_space<vmem>>, %arg3: memref<1x72x64xf32, #tpu.memory_space<vmem>>, %arg4: memref<40x72xf32, #tpu.memory_space<vmem>>, %arg5: memref<40x1xf32, #tpu.memory_space<vmem>>, %arg6: memref<40x1xf32, #tpu.memory_space<vmem>>, %arg7: memref<40x1xf32, #tpu.memory_space<vmem>>, %arg8: memref<1x40x64xf32, #tpu.memory_space<vmem>>) attributes {dimension_semantics = [#tpu.dimension_semantics<parallel>, #tpu.dimension_semantics<parallel>], iteration_bounds = array<i64: 2, 1>, scalar_prefetch = 0 : i64, scratch_operands = 0 : i64, tpu.core_type = #tpu.core_type<tc>, window_params = [{transform_indices = @transform_0, window_bounds = array<i64: 1, 72, 64>}, {transform_indices = @transform_1, window_bounds = array<i64: 1, 72, 64>}, {pipeline_mode = #tpu.pipeline_mode<synchronous>, transform_indices = @transform_2, window_bounds = array<i64: 40, 72>}, {pipeline_mode = #tpu.pipeline_mode<synchronous>, transform_indices = @transform_3, window_bounds = array<i64: 40, 1>}, {pipeline_mode = #tpu.pipeline_mode<synchronous>, transform_indices = @transform_4, window_bounds = array<i64: 40, 1>}, {pipeline_mode = #tpu.pipeline_mode<synchronous>, transform_indices = @transform_5, window_bounds = array<i64: 40, 1>}, {transform_indices = @transform_6, window_bounds = array<i64: 1, 40, 64>}]} {
    %c0 = arith.constant 0 : index
    %c0_0 = arith.constant 0 : index
    %c0_1 = arith.constant 0 : index
    %0 = vector.load %arg2[%c0, %c0_0, %c0_1] : memref<1x72x64xf32, #tpu.memory_space<vmem>>, vector<1x72x64xf32>
    %1 = vector.shape_cast %0 : vector<1x72x64xf32> to vector<72x64xf32>
    %c0_2 = arith.constant 0 : index
    %c0_3 = arith.constant 0 : index
    %c0_4 = arith.constant 0 : index
    %2 = vector.load %arg3[%c0_2, %c0_3, %c0_4] : memref<1x72x64xf32, #tpu.memory_space<vmem>>, vector<1x72x64xf32>
    %3 = vector.shape_cast %2 : vector<1x72x64xf32> to vector<72x64xf32>
    %4 = arith.mulf %1, %3 : vector<72x64xf32>
    %c0_5 = arith.constant 0 : index
    %c0_6 = arith.constant 0 : index
    %5 = vector.load %arg4[%c0_5, %c0_6] : memref<40x72xf32, #tpu.memory_space<vmem>>, vector<40x72xf32>
    %cst = arith.constant dense<0.000000e+00> : vector<40x64xf32>
    %6 = tpu.matmul %5, %4, %cst {dimension_numbers = #tpu.dot_dimension_numbers<[1], [0], [0], [1], [0, 0, 1, 1], [], []>} : vector<40x72xf32>, vector<72x64xf32>, vector<40x64xf32> -> vector<40x64xf32>
    %c0_7 = arith.constant 0 : index
    %c0_8 = arith.constant 0 : index
    %7 = vector.load %arg5[%c0_7, %c0_8] : memref<40x1xf32, #tpu.memory_space<vmem>>, vector<40x1xf32>
    %8 = vector.broadcast %7 : vector<40x1xf32> to vector<40x64xf32>
    %9 = arith.addf %6, %8 : vector<40x64xf32>
    %cst_9 = arith.constant dense<0.000000e+00> : vector<64xf32>
    %10 = vector.multi_reduction <add>, %9, %cst_9 [0] : vector<40x64xf32> to vector<64xf32>
    %11 = vector.shape_cast %10 : vector<64xf32> to vector<1x64xf32>
    %cst_10 = arith.constant 4.000000e+01 : f32
    %12 = vector.broadcast %cst_10 : f32 to vector<1x64xf32>
    %13 = arith.divf %11, %12 : vector<1x64xf32>
    %14 = vector.broadcast %13 : vector<1x64xf32> to vector<40x64xf32>
    %15 = arith.subf %9, %14 : vector<40x64xf32>
    %16 = arith.mulf %15, %15 : vector<40x64xf32>
    %cst_11 = arith.constant dense<0.000000e+00> : vector<64xf32>
    %17 = vector.multi_reduction <add>, %16, %cst_11 [0] : vector<40x64xf32> to vector<64xf32>
    %18 = vector.shape_cast %17 : vector<64xf32> to vector<1x64xf32>
    %cst_12 = arith.constant 4.000000e+01 : f32
    %19 = vector.broadcast %cst_12 : f32 to vector<1x64xf32>
    %20 = arith.divf %18, %19 : vector<1x64xf32>
    %cst_13 = arith.constant 9.99999997E-7 : f32
    %21 = vector.broadcast %cst_13 : f32 to vector<1x64xf32>
    %22 = arith.addf %20, %21 : vector<1x64xf32>
    %23 = math.rsqrt %22 : vector<1x64xf32>
    %24 = vector.broadcast %23 : vector<1x64xf32> to vector<40x64xf32>
    %25 = arith.mulf %15, %24 : vector<40x64xf32>
    %c0_14 = arith.constant 0 : index
    %c0_15 = arith.constant 0 : index
    %26 = vector.load %arg6[%c0_14, %c0_15] : memref<40x1xf32, #tpu.memory_space<vmem>>, vector<40x1xf32>
    %27 = vector.broadcast %26 : vector<40x1xf32> to vector<40x64xf32>
    %28 = arith.mulf %27, %25 : vector<40x64xf32>
    %c0_16 = arith.constant 0 : index
    %c0_17 = arith.constant 0 : index
    %29 = vector.load %arg7[%c0_16, %c0_17] : memref<40x1xf32, #tpu.memory_space<vmem>>, vector<40x1xf32>
    %30 = vector.broadcast %29 : vector<40x1xf32> to vector<40x64xf32>
    %31 = arith.addf %28, %30 : vector<40x64xf32>
    %cst_18 = arith.constant 0.707106769 : f32
    %32 = vector.broadcast %cst_18 : f32 to vector<40x64xf32>
    %33 = arith.mulf %31, %32 : vector<40x64xf32>
    %34 = math.absf %33 : vector<40x64xf32>
    %cst_19 = arith.constant 0.327591091 : f32
    %35 = vector.broadcast %cst_19 : f32 to vector<40x64xf32>
    %36 = arith.mulf %35, %34 : vector<40x64xf32>
    %cst_20 = arith.constant 1.000000e+00 : f32
    %37 = vector.broadcast %cst_20 : f32 to vector<40x64xf32>
    %38 = arith.addf %37, %36 : vector<40x64xf32>
    %cst_21 = arith.constant 1.000000e+00 : f32
    %39 = vector.broadcast %cst_21 : f32 to vector<40x64xf32>
    %40 = arith.divf %39, %38 : vector<40x64xf32>
    %cst_22 = arith.constant 1.06140542 : f32
    %41 = vector.broadcast %cst_22 : f32 to vector<40x64xf32>
    %42 = arith.mulf %40, %41 : vector<40x64xf32>
    %cst_23 = arith.constant -1.45315206 : f32
    %43 = vector.broadcast %cst_23 : f32 to vector<40x64xf32>
    %44 = arith.addf %43, %42 : vector<40x64xf32>
    %45 = arith.mulf %40, %44 : vector<40x64xf32>
    %cst_24 = arith.constant 1.42141378 : f32
    %46 = vector.broadcast %cst_24 : f32 to vector<40x64xf32>
    %47 = arith.addf %46, %45 : vector<40x64xf32>
    %48 = arith.mulf %40, %47 : vector<40x64xf32>
    %cst_25 = arith.constant -0.284496725 : f32
    %49 = vector.broadcast %cst_25 : f32 to vector<40x64xf32>
    %50 = arith.addf %49, %48 : vector<40x64xf32>
    %51 = arith.mulf %40, %50 : vector<40x64xf32>
    %cst_26 = arith.constant 0.254829586 : f32
    %52 = vector.broadcast %cst_26 : f32 to vector<40x64xf32>
    %53 = arith.addf %52, %51 : vector<40x64xf32>
    %54 = arith.mulf %40, %53 : vector<40x64xf32>
    %cst_27 = arith.constant 0.000000e+00 : f32
    %55 = vector.broadcast %cst_27 : f32 to vector<40x64xf32>
    %56 = arith.subf %55, %34 : vector<40x64xf32>
    %57 = arith.mulf %56, %34 : vector<40x64xf32>
    %58 = math.exp %57 : vector<40x64xf32>
    %59 = arith.mulf %54, %58 : vector<40x64xf32>
    %cst_28 = arith.constant 1.000000e+00 : f32
    %60 = vector.broadcast %cst_28 : f32 to vector<40x64xf32>
    %61 = arith.subf %60, %59 : vector<40x64xf32>
    %cst_29 = arith.constant 0.000000e+00 : f32
    %62 = vector.broadcast %cst_29 : f32 to vector<40x64xf32>
    %63 = arith.cmpf oge, %33, %62 : vector<40x64xf32>
    %cst_30 = arith.constant 0.000000e+00 : f32
    %64 = vector.broadcast %cst_30 : f32 to vector<40x64xf32>
    %65 = arith.subf %64, %61 : vector<40x64xf32>
    %66 = arith.select %63, %61, %65 : vector<40x64xi1>, vector<40x64xf32>
    %cst_31 = arith.constant 5.000000e-01 : f32
    %67 = vector.broadcast %cst_31 : f32 to vector<40x64xf32>
    %68 = arith.mulf %67, %31 : vector<40x64xf32>
    %cst_32 = arith.constant 1.000000e+00 : f32
    %69 = vector.broadcast %cst_32 : f32 to vector<40x64xf32>
    %70 = arith.addf %69, %66 : vector<40x64xf32>
    %71 = arith.mulf %68, %70 : vector<40x64xf32>
    %c0_33 = arith.constant 0 : index
    %c0_34 = arith.constant 0 : index
    %c0_35 = arith.constant 0 : index
    %72 = vector.load %arg8[%c0_33, %c0_34, %c0_35] : memref<1x40x64xf32, #tpu.memory_space<vmem>>, vector<1x40x64xf32>
    %73 = vector.shape_cast %72 : vector<1x40x64xf32> to vector<40x64xf32>
    %74 = vector.shape_cast %71 : vector<40x64xf32> to vector<1x40x64xf32>
    tpu.vector_store %arg8[%c0_33, %c0_34, %c0_35], %74 {strides = array<i32>} : memref<1x40x64xf32, #tpu.memory_space<vmem>>, vector<1x40x64xf32>,
    return
  }
  func.func @transform_0(%arg0: i32, %arg1: i32) -> (i32, i32, i32) {
    %c0_i32 = arith.constant 0 : i32
    %c0_i32_0 = arith.constant 0 : i32
    return %arg0, %c0_i32, %arg1 : i32, i32, i32
  }
  func.func @transform_1(%arg0: i32, %arg1: i32) -> (i32, i32, i32) {
    %c0_i32 = arith.constant 0 : i32
    %c0_i32_0 = arith.constant 0 : i32
    return %arg0, %c0_i32, %arg1 : i32, i32, i32
  }
  func.func @transform_2(%arg0: i32, %arg1: i32) -> (i32, i32) {
    %c0_i32 = arith.constant 0 : i32
    %c0_i32_0 = arith.constant 0 : i32
    %c0_i32_1 = arith.constant 0 : i32
    return %c0_i32, %c0_i32_0 : i32, i32
  }
  func.func @transform_3(%arg0: i32, %arg1: i32) -> (i32, i32) {
    %c0_i32 = arith.constant 0 : i32
    %c0_i32_0 = arith.constant 0 : i32
    %c0_i32_1 = arith.constant 0 : i32
    return %c0_i32, %c0_i32_0 : i32, i32
  }
  func.func @transform_4(%arg0: i32, %arg1: i32) -> (i32, i32) {
    %c0_i32 = arith.constant 0 : i32
    %c0_i32_0 = arith.constant 0 : i32
    %c0_i32_1 = arith.constant 0 : i32
    return %c0_i32, %c0_i32_0 : i32, i32
  }
  func.func @transform_5(%arg0: i32, %arg1: i32) -> (i32, i32) {
    %c0_i32 = arith.constant 0 : i32
    %c0_i32_0 = arith.constant 0 : i32
    %c0_i32_1 = arith.constant 0 : i32
    return %c0_i32, %c0_i32_0 : i32, i32
  }
  func.func @transform_6(%arg0: i32, %arg1: i32) -> (i32, i32, i32) {
    %c0_i32 = arith.constant 0 : i32
    %c0_i32_0 = arith.constant 0 : i32
    return %arg0, %c0_i32, %arg1 : i32, i32, i32
  }
}

module attributes {stable_mosaic.version = 11 : i64} {
  func.func @_conv1x1_ln_act_kernel(%arg0: i32, %arg1: i32, %arg2: memref<1x40x256xf32, #tpu.memory_space<vmem>>, %arg3: memref<1x40x256xf32, #tpu.memory_space<vmem>>, %arg4: memref<24x40xf32, #tpu.memory_space<vmem>>, %arg5: memref<24x1xf32, #tpu.memory_space<vmem>>, %arg6: memref<24x1xf32, #tpu.memory_space<vmem>>, %arg7: memref<24x1xf32, #tpu.memory_space<vmem>>, %arg8: memref<1x24x256xf32, #tpu.memory_space<vmem>>) attributes {dimension_semantics = [#tpu.dimension_semantics<parallel>, #tpu.dimension_semantics<parallel>], iteration_bounds = array<i64: 2, 1>, scalar_prefetch = 0 : i64, scratch_operands = 0 : i64, tpu.core_type = #tpu.core_type<tc>, window_params = [{transform_indices = @transform_0, window_bounds = array<i64: 1, 40, 256>}, {transform_indices = @transform_1, window_bounds = array<i64: 1, 40, 256>}, {pipeline_mode = #tpu.pipeline_mode<synchronous>, transform_indices = @transform_2, window_bounds = array<i64: 24, 40>}, {pipeline_mode = #tpu.pipeline_mode<synchronous>, transform_indices = @transform_3, window_bounds = array<i64: 24, 1>}, {pipeline_mode = #tpu.pipeline_mode<synchronous>, transform_indices = @transform_4, window_bounds = array<i64: 24, 1>}, {pipeline_mode = #tpu.pipeline_mode<synchronous>, transform_indices = @transform_5, window_bounds = array<i64: 24, 1>}, {transform_indices = @transform_6, window_bounds = array<i64: 1, 24, 256>}]} {
    %c0 = arith.constant 0 : index
    %c0_0 = arith.constant 0 : index
    %c0_1 = arith.constant 0 : index
    %0 = vector.load %arg2[%c0, %c0_0, %c0_1] : memref<1x40x256xf32, #tpu.memory_space<vmem>>, vector<1x40x256xf32>
    %1 = vector.shape_cast %0 : vector<1x40x256xf32> to vector<40x256xf32>
    %c0_2 = arith.constant 0 : index
    %c0_3 = arith.constant 0 : index
    %c0_4 = arith.constant 0 : index
    %2 = vector.load %arg3[%c0_2, %c0_3, %c0_4] : memref<1x40x256xf32, #tpu.memory_space<vmem>>, vector<1x40x256xf32>
    %3 = vector.shape_cast %2 : vector<1x40x256xf32> to vector<40x256xf32>
    %4 = arith.mulf %1, %3 : vector<40x256xf32>
    %c0_5 = arith.constant 0 : index
    %c0_6 = arith.constant 0 : index
    %5 = vector.load %arg4[%c0_5, %c0_6] : memref<24x40xf32, #tpu.memory_space<vmem>>, vector<24x40xf32>
    %cst = arith.constant dense<0.000000e+00> : vector<24x256xf32>
    %6 = tpu.matmul %5, %4, %cst {dimension_numbers = #tpu.dot_dimension_numbers<[1], [0], [0], [1], [0, 0, 1, 1], [], []>} : vector<24x40xf32>, vector<40x256xf32>, vector<24x256xf32> -> vector<24x256xf32>
    %c0_7 = arith.constant 0 : index
    %c0_8 = arith.constant 0 : index
    %7 = vector.load %arg5[%c0_7, %c0_8] : memref<24x1xf32, #tpu.memory_space<vmem>>, vector<24x1xf32>
    %8 = vector.broadcast %7 : vector<24x1xf32> to vector<24x256xf32>
    %9 = arith.addf %6, %8 : vector<24x256xf32>
    %cst_9 = arith.constant dense<0.000000e+00> : vector<256xf32>
    %10 = vector.multi_reduction <add>, %9, %cst_9 [0] : vector<24x256xf32> to vector<256xf32>
    %11 = vector.shape_cast %10 : vector<256xf32> to vector<1x256xf32>
    %cst_10 = arith.constant 2.400000e+01 : f32
    %12 = vector.broadcast %cst_10 : f32 to vector<1x256xf32>
    %13 = arith.divf %11, %12 : vector<1x256xf32>
    %14 = vector.broadcast %13 : vector<1x256xf32> to vector<24x256xf32>
    %15 = arith.subf %9, %14 : vector<24x256xf32>
    %16 = arith.mulf %15, %15 : vector<24x256xf32>
    %cst_11 = arith.constant dense<0.000000e+00> : vector<256xf32>
    %17 = vector.multi_reduction <add>, %16, %cst_11 [0] : vector<24x256xf32> to vector<256xf32>
    %18 = vector.shape_cast %17 : vector<256xf32> to vector<1x256xf32>
    %cst_12 = arith.constant 2.400000e+01 : f32
    %19 = vector.broadcast %cst_12 : f32 to vector<1x256xf32>
    %20 = arith.divf %18, %19 : vector<1x256xf32>
    %cst_13 = arith.constant 9.99999997E-7 : f32
    %21 = vector.broadcast %cst_13 : f32 to vector<1x256xf32>
    %22 = arith.addf %20, %21 : vector<1x256xf32>
    %23 = math.rsqrt %22 : vector<1x256xf32>
    %24 = vector.broadcast %23 : vector<1x256xf32> to vector<24x256xf32>
    %25 = arith.mulf %15, %24 : vector<24x256xf32>
    %c0_14 = arith.constant 0 : index
    %c0_15 = arith.constant 0 : index
    %26 = vector.load %arg6[%c0_14, %c0_15] : memref<24x1xf32, #tpu.memory_space<vmem>>, vector<24x1xf32>
    %27 = vector.broadcast %26 : vector<24x1xf32> to vector<24x256xf32>
    %28 = arith.mulf %27, %25 : vector<24x256xf32>
    %c0_16 = arith.constant 0 : index
    %c0_17 = arith.constant 0 : index
    %29 = vector.load %arg7[%c0_16, %c0_17] : memref<24x1xf32, #tpu.memory_space<vmem>>, vector<24x1xf32>
    %30 = vector.broadcast %29 : vector<24x1xf32> to vector<24x256xf32>
    %31 = arith.addf %28, %30 : vector<24x256xf32>
    %c0_18 = arith.constant 0 : index
    %c0_19 = arith.constant 0 : index
    %c0_20 = arith.constant 0 : index
    %32 = vector.load %arg8[%c0_18, %c0_19, %c0_20] : memref<1x24x256xf32, #tpu.memory_space<vmem>>, vector<1x24x256xf32>
    %33 = vector.shape_cast %32 : vector<1x24x256xf32> to vector<24x256xf32>
    %34 = vector.shape_cast %31 : vector<24x256xf32> to vector<1x24x256xf32>
    tpu.vector_store %arg8[%c0_18, %c0_19, %c0_20], %34 {strides = array<i32>} : memref<1x24x256xf32, #tpu.memory_space<vmem>>, vector<1x24x256xf32>,
    return
  }
  func.func @transform_0(%arg0: i32, %arg1: i32) -> (i32, i32, i32) {
    %c0_i32 = arith.constant 0 : i32
    %c0_i32_0 = arith.constant 0 : i32
    return %arg0, %c0_i32, %arg1 : i32, i32, i32
  }
  func.func @transform_1(%arg0: i32, %arg1: i32) -> (i32, i32, i32) {
    %c0_i32 = arith.constant 0 : i32
    %c0_i32_0 = arith.constant 0 : i32
    return %arg0, %c0_i32, %arg1 : i32, i32, i32
  }
  func.func @transform_2(%arg0: i32, %arg1: i32) -> (i32, i32) {
    %c0_i32 = arith.constant 0 : i32
    %c0_i32_0 = arith.constant 0 : i32
    %c0_i32_1 = arith.constant 0 : i32
    return %c0_i32, %c0_i32_0 : i32, i32
  }
  func.func @transform_3(%arg0: i32, %arg1: i32) -> (i32, i32) {
    %c0_i32 = arith.constant 0 : i32
    %c0_i32_0 = arith.constant 0 : i32
    %c0_i32_1 = arith.constant 0 : i32
    return %c0_i32, %c0_i32_0 : i32, i32
  }
  func.func @transform_4(%arg0: i32, %arg1: i32) -> (i32, i32) {
    %c0_i32 = arith.constant 0 : i32
    %c0_i32_0 = arith.constant 0 : i32
    %c0_i32_1 = arith.constant 0 : i32
    return %c0_i32, %c0_i32_0 : i32, i32
  }
  func.func @transform_5(%arg0: i32, %arg1: i32) -> (i32, i32) {
    %c0_i32 = arith.constant 0 : i32
    %c0_i32_0 = arith.constant 0 : i32
    %c0_i32_1 = arith.constant 0 : i32
    return %c0_i32, %c0_i32_0 : i32, i32
  }
  func.func @transform_6(%arg0: i32, %arg1: i32) -> (i32, i32, i32) {
    %c0_i32 = arith.constant 0 : i32
    %c0_i32_0 = arith.constant 0 : i32
    return %arg0, %c0_i32, %arg1 : i32, i32, i32
  }
}

module attributes {stable_mosaic.version = 11 : i64} {
  func.func @_conv1x1_ln_act_kernel(%arg0: i32, %arg1: i32, %arg2: memref<1x40x256xf32, #tpu.memory_space<vmem>>, %arg3: memref<1x40x256xf32, #tpu.memory_space<vmem>>, %arg4: memref<24x40xf32, #tpu.memory_space<vmem>>, %arg5: memref<24x1xf32, #tpu.memory_space<vmem>>, %arg6: memref<24x1xf32, #tpu.memory_space<vmem>>, %arg7: memref<24x1xf32, #tpu.memory_space<vmem>>, %arg8: memref<1x24x256xf32, #tpu.memory_space<vmem>>) attributes {dimension_semantics = [#tpu.dimension_semantics<parallel>, #tpu.dimension_semantics<parallel>], iteration_bounds = array<i64: 2, 1>, scalar_prefetch = 0 : i64, scratch_operands = 0 : i64, tpu.core_type = #tpu.core_type<tc>, window_params = [{transform_indices = @transform_0, window_bounds = array<i64: 1, 40, 256>}, {transform_indices = @transform_1, window_bounds = array<i64: 1, 40, 256>}, {pipeline_mode = #tpu.pipeline_mode<synchronous>, transform_indices = @transform_2, window_bounds = array<i64: 24, 40>}, {pipeline_mode = #tpu.pipeline_mode<synchronous>, transform_indices = @transform_3, window_bounds = array<i64: 24, 1>}, {pipeline_mode = #tpu.pipeline_mode<synchronous>, transform_indices = @transform_4, window_bounds = array<i64: 24, 1>}, {pipeline_mode = #tpu.pipeline_mode<synchronous>, transform_indices = @transform_5, window_bounds = array<i64: 24, 1>}, {transform_indices = @transform_6, window_bounds = array<i64: 1, 24, 256>}]} {
    %c0 = arith.constant 0 : index
    %c0_0 = arith.constant 0 : index
    %c0_1 = arith.constant 0 : index
    %0 = vector.load %arg2[%c0, %c0_0, %c0_1] : memref<1x40x256xf32, #tpu.memory_space<vmem>>, vector<1x40x256xf32>
    %1 = vector.shape_cast %0 : vector<1x40x256xf32> to vector<40x256xf32>
    %c0_2 = arith.constant 0 : index
    %c0_3 = arith.constant 0 : index
    %c0_4 = arith.constant 0 : index
    %2 = vector.load %arg3[%c0_2, %c0_3, %c0_4] : memref<1x40x256xf32, #tpu.memory_space<vmem>>, vector<1x40x256xf32>
    %3 = vector.shape_cast %2 : vector<1x40x256xf32> to vector<40x256xf32>
    %4 = arith.mulf %1, %3 : vector<40x256xf32>
    %c0_5 = arith.constant 0 : index
    %c0_6 = arith.constant 0 : index
    %5 = vector.load %arg4[%c0_5, %c0_6] : memref<24x40xf32, #tpu.memory_space<vmem>>, vector<24x40xf32>
    %cst = arith.constant dense<0.000000e+00> : vector<24x256xf32>
    %6 = tpu.matmul %5, %4, %cst {dimension_numbers = #tpu.dot_dimension_numbers<[1], [0], [0], [1], [0, 0, 1, 1], [], []>} : vector<24x40xf32>, vector<40x256xf32>, vector<24x256xf32> -> vector<24x256xf32>
    %c0_7 = arith.constant 0 : index
    %c0_8 = arith.constant 0 : index
    %7 = vector.load %arg5[%c0_7, %c0_8] : memref<24x1xf32, #tpu.memory_space<vmem>>, vector<24x1xf32>
    %8 = vector.broadcast %7 : vector<24x1xf32> to vector<24x256xf32>
    %9 = arith.addf %6, %8 : vector<24x256xf32>
    %cst_9 = arith.constant dense<0.000000e+00> : vector<256xf32>
    %10 = vector.multi_reduction <add>, %9, %cst_9 [0] : vector<24x256xf32> to vector<256xf32>
    %11 = vector.shape_cast %10 : vector<256xf32> to vector<1x256xf32>
    %cst_10 = arith.constant 2.400000e+01 : f32
    %12 = vector.broadcast %cst_10 : f32 to vector<1x256xf32>
    %13 = arith.divf %11, %12 : vector<1x256xf32>
    %14 = vector.broadcast %13 : vector<1x256xf32> to vector<24x256xf32>
    %15 = arith.subf %9, %14 : vector<24x256xf32>
    %16 = arith.mulf %15, %15 : vector<24x256xf32>
    %cst_11 = arith.constant dense<0.000000e+00> : vector<256xf32>
    %17 = vector.multi_reduction <add>, %16, %cst_11 [0] : vector<24x256xf32> to vector<256xf32>
    %18 = vector.shape_cast %17 : vector<256xf32> to vector<1x256xf32>
    %cst_12 = arith.constant 2.400000e+01 : f32
    %19 = vector.broadcast %cst_12 : f32 to vector<1x256xf32>
    %20 = arith.divf %18, %19 : vector<1x256xf32>
    %cst_13 = arith.constant 9.99999997E-7 : f32
    %21 = vector.broadcast %cst_13 : f32 to vector<1x256xf32>
    %22 = arith.addf %20, %21 : vector<1x256xf32>
    %23 = math.rsqrt %22 : vector<1x256xf32>
    %24 = vector.broadcast %23 : vector<1x256xf32> to vector<24x256xf32>
    %25 = arith.mulf %15, %24 : vector<24x256xf32>
    %c0_14 = arith.constant 0 : index
    %c0_15 = arith.constant 0 : index
    %26 = vector.load %arg6[%c0_14, %c0_15] : memref<24x1xf32, #tpu.memory_space<vmem>>, vector<24x1xf32>
    %27 = vector.broadcast %26 : vector<24x1xf32> to vector<24x256xf32>
    %28 = arith.mulf %27, %25 : vector<24x256xf32>
    %c0_16 = arith.constant 0 : index
    %c0_17 = arith.constant 0 : index
    %29 = vector.load %arg7[%c0_16, %c0_17] : memref<24x1xf32, #tpu.memory_space<vmem>>, vector<24x1xf32>
    %30 = vector.broadcast %29 : vector<24x1xf32> to vector<24x256xf32>
    %31 = arith.addf %28, %30 : vector<24x256xf32>
    %cst_18 = arith.constant 0.707106769 : f32
    %32 = vector.broadcast %cst_18 : f32 to vector<24x256xf32>
    %33 = arith.mulf %31, %32 : vector<24x256xf32>
    %34 = math.absf %33 : vector<24x256xf32>
    %cst_19 = arith.constant 0.327591091 : f32
    %35 = vector.broadcast %cst_19 : f32 to vector<24x256xf32>
    %36 = arith.mulf %35, %34 : vector<24x256xf32>
    %cst_20 = arith.constant 1.000000e+00 : f32
    %37 = vector.broadcast %cst_20 : f32 to vector<24x256xf32>
    %38 = arith.addf %37, %36 : vector<24x256xf32>
    %cst_21 = arith.constant 1.000000e+00 : f32
    %39 = vector.broadcast %cst_21 : f32 to vector<24x256xf32>
    %40 = arith.divf %39, %38 : vector<24x256xf32>
    %cst_22 = arith.constant 1.06140542 : f32
    %41 = vector.broadcast %cst_22 : f32 to vector<24x256xf32>
    %42 = arith.mulf %40, %41 : vector<24x256xf32>
    %cst_23 = arith.constant -1.45315206 : f32
    %43 = vector.broadcast %cst_23 : f32 to vector<24x256xf32>
    %44 = arith.addf %43, %42 : vector<24x256xf32>
    %45 = arith.mulf %40, %44 : vector<24x256xf32>
    %cst_24 = arith.constant 1.42141378 : f32
    %46 = vector.broadcast %cst_24 : f32 to vector<24x256xf32>
    %47 = arith.addf %46, %45 : vector<24x256xf32>
    %48 = arith.mulf %40, %47 : vector<24x256xf32>
    %cst_25 = arith.constant -0.284496725 : f32
    %49 = vector.broadcast %cst_25 : f32 to vector<24x256xf32>
    %50 = arith.addf %49, %48 : vector<24x256xf32>
    %51 = arith.mulf %40, %50 : vector<24x256xf32>
    %cst_26 = arith.constant 0.254829586 : f32
    %52 = vector.broadcast %cst_26 : f32 to vector<24x256xf32>
    %53 = arith.addf %52, %51 : vector<24x256xf32>
    %54 = arith.mulf %40, %53 : vector<24x256xf32>
    %cst_27 = arith.constant 0.000000e+00 : f32
    %55 = vector.broadcast %cst_27 : f32 to vector<24x256xf32>
    %56 = arith.subf %55, %34 : vector<24x256xf32>
    %57 = arith.mulf %56, %34 : vector<24x256xf32>
    %58 = math.exp %57 : vector<24x256xf32>
    %59 = arith.mulf %54, %58 : vector<24x256xf32>
    %cst_28 = arith.constant 1.000000e+00 : f32
    %60 = vector.broadcast %cst_28 : f32 to vector<24x256xf32>
    %61 = arith.subf %60, %59 : vector<24x256xf32>
    %cst_29 = arith.constant 0.000000e+00 : f32
    %62 = vector.broadcast %cst_29 : f32 to vector<24x256xf32>
    %63 = arith.cmpf oge, %33, %62 : vector<24x256xf32>
    %cst_30 = arith.constant 0.000000e+00 : f32
    %64 = vector.broadcast %cst_30 : f32 to vector<24x256xf32>
    %65 = arith.subf %64, %61 : vector<24x256xf32>
    %66 = arith.select %63, %61, %65 : vector<24x256xi1>, vector<24x256xf32>
    %cst_31 = arith.constant 5.000000e-01 : f32
    %67 = vector.broadcast %cst_31 : f32 to vector<24x256xf32>
    %68 = arith.mulf %67, %31 : vector<24x256xf32>
    %cst_32 = arith.constant 1.000000e+00 : f32
    %69 = vector.broadcast %cst_32 : f32 to vector<24x256xf32>
    %70 = arith.addf %69, %66 : vector<24x256xf32>
    %71 = arith.mulf %68, %70 : vector<24x256xf32>
    %c0_33 = arith.constant 0 : index
    %c0_34 = arith.constant 0 : index
    %c0_35 = arith.constant 0 : index
    %72 = vector.load %arg8[%c0_33, %c0_34, %c0_35] : memref<1x24x256xf32, #tpu.memory_space<vmem>>, vector<1x24x256xf32>
    %73 = vector.shape_cast %72 : vector<1x24x256xf32> to vector<24x256xf32>
    %74 = vector.shape_cast %71 : vector<24x256xf32> to vector<1x24x256xf32>
    tpu.vector_store %arg8[%c0_33, %c0_34, %c0_35], %74 {strides = array<i32>} : memref<1x24x256xf32, #tpu.memory_space<vmem>>, vector<1x24x256xf32>,
    return
  }
  func.func @transform_0(%arg0: i32, %arg1: i32) -> (i32, i32, i32) {
    %c0_i32 = arith.constant 0 : i32
    %c0_i32_0 = arith.constant 0 : i32
    return %arg0, %c0_i32, %arg1 : i32, i32, i32
  }
  func.func @transform_1(%arg0: i32, %arg1: i32) -> (i32, i32, i32) {
    %c0_i32 = arith.constant 0 : i32
    %c0_i32_0 = arith.constant 0 : i32
    return %arg0, %c0_i32, %arg1 : i32, i32, i32
  }
  func.func @transform_2(%arg0: i32, %arg1: i32) -> (i32, i32) {
    %c0_i32 = arith.constant 0 : i32
    %c0_i32_0 = arith.constant 0 : i32
    %c0_i32_1 = arith.constant 0 : i32
    return %c0_i32, %c0_i32_0 : i32, i32
  }
  func.func @transform_3(%arg0: i32, %arg1: i32) -> (i32, i32) {
    %c0_i32 = arith.constant 0 : i32
    %c0_i32_0 = arith.constant 0 : i32
    %c0_i32_1 = arith.constant 0 : i32
    return %c0_i32, %c0_i32_0 : i32, i32
  }
  func.func @transform_4(%arg0: i32, %arg1: i32) -> (i32, i32) {
    %c0_i32 = arith.constant 0 : i32
    %c0_i32_0 = arith.constant 0 : i32
    %c0_i32_1 = arith.constant 0 : i32
    return %c0_i32, %c0_i32_0 : i32, i32
  }
  func.func @transform_5(%arg0: i32, %arg1: i32) -> (i32, i32) {
    %c0_i32 = arith.constant 0 : i32
    %c0_i32_0 = arith.constant 0 : i32
    %c0_i32_1 = arith.constant 0 : i32
    return %c0_i32, %c0_i32_0 : i32, i32
  }
  func.func @transform_6(%arg0: i32, %arg1: i32) -> (i32, i32, i32) {
    %c0_i32 = arith.constant 0 : i32
    %c0_i32_0 = arith.constant 0 : i32
    return %arg0, %c0_i32, %arg1 : i32, i32, i32
  }
}

module attributes {stable_mosaic.version = 11 : i64} {
  func.func @_conv1x1_ln_act_kernel(%arg0: i32, %arg1: i32, %arg2: memref<1x24x1024xf32, #tpu.memory_space<vmem>>, %arg3: memref<1x24x1024xf32, #tpu.memory_space<vmem>>, %arg4: memref<12x24xf32, #tpu.memory_space<vmem>>, %arg5: memref<12x1xf32, #tpu.memory_space<vmem>>, %arg6: memref<12x1xf32, #tpu.memory_space<vmem>>, %arg7: memref<12x1xf32, #tpu.memory_space<vmem>>, %arg8: memref<1x12x1024xf32, #tpu.memory_space<vmem>>) attributes {dimension_semantics = [#tpu.dimension_semantics<parallel>, #tpu.dimension_semantics<parallel>], iteration_bounds = array<i64: 2, 1>, scalar_prefetch = 0 : i64, scratch_operands = 0 : i64, tpu.core_type = #tpu.core_type<tc>, window_params = [{transform_indices = @transform_0, window_bounds = array<i64: 1, 24, 1024>}, {transform_indices = @transform_1, window_bounds = array<i64: 1, 24, 1024>}, {pipeline_mode = #tpu.pipeline_mode<synchronous>, transform_indices = @transform_2, window_bounds = array<i64: 12, 24>}, {pipeline_mode = #tpu.pipeline_mode<synchronous>, transform_indices = @transform_3, window_bounds = array<i64: 12, 1>}, {pipeline_mode = #tpu.pipeline_mode<synchronous>, transform_indices = @transform_4, window_bounds = array<i64: 12, 1>}, {pipeline_mode = #tpu.pipeline_mode<synchronous>, transform_indices = @transform_5, window_bounds = array<i64: 12, 1>}, {transform_indices = @transform_6, window_bounds = array<i64: 1, 12, 1024>}]} {
    %c0 = arith.constant 0 : index
    %c0_0 = arith.constant 0 : index
    %c0_1 = arith.constant 0 : index
    %0 = vector.load %arg2[%c0, %c0_0, %c0_1] : memref<1x24x1024xf32, #tpu.memory_space<vmem>>, vector<1x24x1024xf32>
    %1 = vector.shape_cast %0 : vector<1x24x1024xf32> to vector<24x1024xf32>
    %c0_2 = arith.constant 0 : index
    %c0_3 = arith.constant 0 : index
    %c0_4 = arith.constant 0 : index
    %2 = vector.load %arg3[%c0_2, %c0_3, %c0_4] : memref<1x24x1024xf32, #tpu.memory_space<vmem>>, vector<1x24x1024xf32>
    %3 = vector.shape_cast %2 : vector<1x24x1024xf32> to vector<24x1024xf32>
    %4 = arith.mulf %1, %3 : vector<24x1024xf32>
    %c0_5 = arith.constant 0 : index
    %c0_6 = arith.constant 0 : index
    %5 = vector.load %arg4[%c0_5, %c0_6] : memref<12x24xf32, #tpu.memory_space<vmem>>, vector<12x24xf32>
    %cst = arith.constant dense<0.000000e+00> : vector<12x1024xf32>
    %6 = tpu.matmul %5, %4, %cst {dimension_numbers = #tpu.dot_dimension_numbers<[1], [0], [0], [1], [0, 0, 1, 1], [], []>} : vector<12x24xf32>, vector<24x1024xf32>, vector<12x1024xf32> -> vector<12x1024xf32>
    %c0_7 = arith.constant 0 : index
    %c0_8 = arith.constant 0 : index
    %7 = vector.load %arg5[%c0_7, %c0_8] : memref<12x1xf32, #tpu.memory_space<vmem>>, vector<12x1xf32>
    %8 = vector.broadcast %7 : vector<12x1xf32> to vector<12x1024xf32>
    %9 = arith.addf %6, %8 : vector<12x1024xf32>
    %c0_9 = arith.constant 0 : index
    %c0_10 = arith.constant 0 : index
    %c0_11 = arith.constant 0 : index
    %10 = vector.load %arg8[%c0_9, %c0_10, %c0_11] : memref<1x12x1024xf32, #tpu.memory_space<vmem>>, vector<1x12x1024xf32>
    %11 = vector.shape_cast %10 : vector<1x12x1024xf32> to vector<12x1024xf32>
    %12 = vector.shape_cast %9 : vector<12x1024xf32> to vector<1x12x1024xf32>
    tpu.vector_store %arg8[%c0_9, %c0_10, %c0_11], %12 {strides = array<i32>} : memref<1x12x1024xf32, #tpu.memory_space<vmem>>, vector<1x12x1024xf32>,
    return
  }
  func.func @transform_0(%arg0: i32, %arg1: i32) -> (i32, i32, i32) {
    %c0_i32 = arith.constant 0 : i32
    %c0_i32_0 = arith.constant 0 : i32
    return %arg0, %c0_i32, %arg1 : i32, i32, i32
  }
  func.func @transform_1(%arg0: i32, %arg1: i32) -> (i32, i32, i32) {
    %c0_i32 = arith.constant 0 : i32
    %c0_i32_0 = arith.constant 0 : i32
    return %arg0, %c0_i32, %arg1 : i32, i32, i32
  }
  func.func @transform_2(%arg0: i32, %arg1: i32) -> (i32, i32) {
    %c0_i32 = arith.constant 0 : i32
    %c0_i32_0 = arith.constant 0 : i32
    %c0_i32_1 = arith.constant 0 : i32
    return %c0_i32, %c0_i32_0 : i32, i32
  }
  func.func @transform_3(%arg0: i32, %arg1: i32) -> (i32, i32) {
    %c0_i32 = arith.constant 0 : i32
    %c0_i32_0 = arith.constant 0 : i32
    %c0_i32_1 = arith.constant 0 : i32
    return %c0_i32, %c0_i32_0 : i32, i32
  }
  func.func @transform_4(%arg0: i32, %arg1: i32) -> (i32, i32) {
    %c0_i32 = arith.constant 0 : i32
    %c0_i32_0 = arith.constant 0 : i32
    %c0_i32_1 = arith.constant 0 : i32
    return %c0_i32, %c0_i32_0 : i32, i32
  }
  func.func @transform_5(%arg0: i32, %arg1: i32) -> (i32, i32) {
    %c0_i32 = arith.constant 0 : i32
    %c0_i32_0 = arith.constant 0 : i32
    %c0_i32_1 = arith.constant 0 : i32
    return %c0_i32, %c0_i32_0 : i32, i32
  }
  func.func @transform_6(%arg0: i32, %arg1: i32) -> (i32, i32, i32) {
    %c0_i32 = arith.constant 0 : i32
    %c0_i32_0 = arith.constant 0 : i32
    return %arg0, %c0_i32, %arg1 : i32, i32, i32
  }
}

</mosaic_0001>

<bundles_post_ra>
// kernel: decoder_forward.12
= control target key start
LH: loop header
LB: loop body
LE: loop exit
PB: predicated region body
PF: predicated region fallthrough
CT: control target
= control target key end

     0   :  { %10 = vsyncpa [#allocation3], 0  ;;  %s1058_s18 = smov 0   ;;  %s1060_s19 = smov 0   ;;  %s1300_s0 = inlined_call_operand.vmem [shape: f32[2,112,16], index: 0, kind: input, shape index: {}]   ;;  %s1301_s1 = inlined_call_operand.hbm [shape: f32[72,112], index: 1, kind: input, shape index: {}]   ;;  %s1302_s2 = inlined_call_operand.vmem [shape: f32[72,1], index: 2, kind: input, shape index: {}]   ;;  %s1303_s3 = inlined_call_operand.vmem [shape: f32[72,1], index: 3, kind: input, shape index: {}]   ;;  %s1304_s4 = inlined_call_operand.vmem [shape: f32[72,1], index: 4, kind: input, shape index: {}]   ;;  %s1305_s5 = inlined_call_operand.vmem [shape: f32[2,72,16], index: 5, kind: output, shape index: {}]  }
   0x1   :  { %s1062_s20 = smov 0  }
   0x2 LB: > { %s796_s21 = sadd.s32 4294967295, %s1020_s20   ;;  %s28_s22 = sadd.s32 1, %s1016_s19  ;;  %s1020_s20 = sphi %s1062_s20, %s16_s20   ;;  %s1016_s19 = sphi %s1060_s19, %s1309_s19   ;;  %s1012_s18 = sphi %s1058_s18, %s1308_s18  }
   0x3   : > { %p30_p0 = scmp.ge.s32.totalorder %s28_s22, 2  ;;  %p798_p1 = scmp.ge.s32.totalorder %s1020_s20, 1 }
   0x4   : > { %p173_p2 = scmp.lt.s32.totalorder %s1020_s20, 3  ;;  %p1083_p4 = scmp.eq.s32.totalorder %s796_s21, 0 }
   0x5   : > { %s1311_s22 = smov (%p30_p0, %s28_s22), 0  ;;  %s1022_s25 = smov [#allocation2]  }
   0x6   : > { %p1079_p3 = pnand %p798_p1, %p173_p2  ;;  %s185_s26 = sshll.u32 %s1022_s25, 4  ;;  %s186_s26 = int_to_ptr.vmem [resolvable:$true] %s185_s26 }
   0x7   : > { %s979_s27 = scalar_lea.vmem %s186_s26, 1152  ;;  %p987_p11 = scmp.lt.s32.totalorder %s186_s26, %s186_s26 }
   0x8   : > { %p928_p5 = pneg %p1079_p3  ;;  %p980_p8 = scmp.ne.s32.totalorder %s186_s26, %s979_s27 }
   0x9   : > { %p988_p12 = scmp.lt.s32.totalorder %s979_s27, %s979_s27 }
   0xa   : > { %p929_p6 = pnand %p1083_p4, %p928_p5 }
   0xb   : > { %p989_p13 = por %p988_p12, %p987_p11 }
   0xc   : > { %p970_p7 = pneg %p929_p6 }
   0xe   : > { %p982_p9 = pnand %p980_p8, %p970_p7 }
  0x10   : > { %p983_p10 = pneg %p982_p9 }
  0x12   : > { %p990_p0 = pnand %p989_p13, %p983_p10 }
  0x14   : > { %993 = shalt.err (!%p990_p0)
}
  0x15   : > { %s1023_s28 = smov 128   ;;  %s1024_s29 = smov 8  }
  0x16   : > { %931 = dma.hbm_to_vmem [thread:$0]  (!%p929_p6), %s1301_s1, 1152, %s186_s26, [#allocation3], %s1023_s28, %s1023_s28, %s1024_s29  }
  0x17   : > { %221 = sbr.rel (%p1079_p3) target bundleno = 361 (0x169), region = 40 }
  0x1c   : > { %1007 = dma.done.wait (%p1083_p4), [#allocation3], 1152  }
  0x1d   : > { %1009 = vsyncadd (%p1083_p4), [#allocation3], 4294966144  ;;  %p255_p1 = scmp.lt.s32.totalorder %s1012_s18, 1  ;;  %v1025_v0 = vmov 0.0   ;;  %vm1026_vm0 = vmmov 0   ;;  %v1027_v1 = vmov 0  }
  0x1e   : > { %839 = vmatprep.subr.mxu0 %v1025_v0  ;;  %894 = vmatprep.subr.mxu1 %v1025_v0  ;;  %v285_v16 = vld [vmem:[#allocation2] sm:$0xff]  ;;  %vm348_vm1 = vcmask 916480   ;;  %v290_v17 = vld [vmem:[#allocation2 + $0x28] sm:$0xff]  ;;  %v296_v19 = vld [vmem:[%s1302_s2 + $0x10] sm:$0xff]  ;;  %vm486_vm2 = vcmask 130048  }
  0x1f   : > { %s1313_s18 = smov (!%p255_p1, %s1012_s18), 1  ;;  %867 = vmatprep.mubr.msk.f32.mxu0 %vm1026_vm0, %v1025_v0  ;;  %882 = vmatprep.mubr.msk.f32.mxu1 %vm1026_vm0, %v1025_v0  ;;  %v294_v18 = vld [vmem:[%s1302_s2] sm:$0xff]  ;;  %v286_v20 = vld [vmem:[#allocation2 + $0x8] sm:$0xff]  ;;  %v291_v21 = vld [vmem:[#allocation2 + $0x30] sm:$0xff] }
  0x20   : > { %964 = vset.pattern.permute.xlu0 %v1027_v1  ;;  %965 = vset.pattern.permute.xlu1 %v1027_v1  ;;  %s922_s7 = smul.u32 112, %s1313_s18  ;;  %v295_v22 = vld [vmem:[%s1302_s2 + $0x8] sm:$0xff]  ;;  %v297_v23 = vld [vmem:[%s1302_s2 + $0x18] sm:$0xff]  ;;  %v287_v24 = vld [vmem:[#allocation2 + $0x10] sm:$0xff] }
  0x21   : > { %305 = vperm.xlu0 %964, %v294_v18   ;;  %315 = vperm.xlu1 %965, %v296_v19   ;;  %v292_v25 = vld [vmem:[#allocation2 + $0x38] sm:$0xff]  ;;  %v298_v26 = vld [vmem:[%s1302_s2 + $0x20] sm:$0xff]  ;;  %v299_v27 = vld [vmem:[%s1302_s2 + $0x28] sm:$0xff]  ;;  %s923_s27 = smul.u32 72, %s1313_s18 }
  0x22   : > { %s1114_s10 = scalar_lea.vmem %s1300_s0, %s922_s7  ;;  %v288_v28 = vld [vmem:[#allocation2 + $0x18] sm:$0xff]  ;;  %v293_v29 = vld [vmem:[#allocation2 + $0x40] sm:$0xff]  ;;  %v300_v30 = vld [vmem:[%s1302_s2 + $0x30] sm:$0xff] }
  0x23   : > { %v284_v2 = vld [vmem:[%s1114_s10 + $0x68] sm:$0xff]  ;;  %v283_v3 = vld [vmem:[%s1114_s10 + $0x60] sm:$0xff]  ;;  %v282_v4 = vld [vmem:[%s1114_s10 + $0x58] sm:$0xff]  ;;  %s270_s30 = scalar_lea.vmem %s1305_s5, %s923_s27 }
  0x24   : > { %840 = vmatpush3.msra.mxu0 %v284_v2  ;;  %908 = vmatpush3.msra.mxu1 %v284_v2  ;;  %v281_v5 = vld [vmem:[%s1114_s10 + $0x50] sm:$0xff]  ;;  %v280_v6 = vld [vmem:[%s1114_s10 + $0x48] sm:$0xff]  ;;  %v279_v7 = vld [vmem:[%s1114_s10 + $0x40] sm:$0xff] }
  0x25   : > { %841 = vmatprep.subr.mxu0 %v1025_v0  ;;  %895 = vmatprep.subr.mxu1 %v1025_v0  ;;  %v278_v8 = vld [vmem:[%s1114_s10 + $0x38] sm:$0xff]  ;;  %v277_v9 = vld [vmem:[%s1114_s10 + $0x30] sm:$0xff]  ;;  %v276_v10 = vld [vmem:[%s1114_s10 + $0x28] sm:$0xff] }
  0x26   : > { %842 = vmatpush3.msra.mxu0 %v283_v3  ;;  %909 = vmatpush3.msra.mxu1 %v283_v3  ;;  %v275_v11 = vld [vmem:[%s1114_s10 + $0x20] sm:$0xff]  ;;  %v274_v12 = vld [vmem:[%s1114_s10 + $0x18] sm:$0xff]  ;;  %v273_v13 = vld [vmem:[%s1114_s10 + $0x10] sm:$0xff] }
  0x27   : > { %843 = vmatprep.subr.mxu0 %v1025_v0  ;;  %896 = vmatprep.subr.mxu1 %v1025_v0  ;;  %v272_v14 = vld [vmem:[%s1114_s10 + $0x8] sm:$0xff]  ;;  %v271_v15 = vld [vmem:[%s1114_s10] sm:$0xff]  ;;  %v301_v31 = vld [vmem:[%s1302_s2 + $0x38] sm:$0xff] }
  0x28   : > { %844 = vmatpush3.msra.mxu0 %v282_v4  ;;  %910 = vmatpush3.msra.mxu1 %v282_v4  ;;  %v289_v32 = vld [vmem:[#allocation2 + $0x20] sm:$0xff]  ;;  %v566_v35 = vld [vmem:[%s1303_s3 + $0x8] sm:$0xff]  ;;  %v567_v36 = vld [vmem:[%s1303_s3 + $0x10] sm:$0xff] }
  0x29   : > { %845 = vmatprep.subr.mxu0 %v1025_v0  ;;  %897 = vmatprep.subr.mxu1 %v1025_v0  ;;  %v302_v33 = vld [vmem:[%s1302_s2 + $0x40] sm:$0xff]  ;;  %v568_v37 = vld [vmem:[%s1303_s3 + $0x18] sm:$0xff]  ;;  %v570_v39 = vld [vmem:[%s1303_s3 + $0x28] sm:$0xff] }
  0x2a   : > { %846 = vmatpush3.msra.mxu0 %v281_v5  ;;  %911 = vmatpush3.msra.mxu1 %v281_v5  ;;  %v565_v34 = vld [vmem:[%s1303_s3] sm:$0xff]  ;;  %v571_v40 = vld [vmem:[%s1303_s3 + $0x30] sm:$0xff]  ;;  %v572_v41 = vld [vmem:[%s1303_s3 + $0x38] sm:$0xff] }
  0x2b   : > { %847 = vmatprep.subr.mxu0 %v1025_v0  ;;  %898 = vmatprep.subr.mxu1 %v1025_v0  ;;  %v569_v38 = vld [vmem:[%s1303_s3 + $0x20] sm:$0xff]  ;;  %v629_v44 = vld [vmem:[%s1304_s4 + $0x8] sm:$0xff]  ;;  %v630_v45 = vld [vmem:[%s1304_s4 + $0x10] sm:$0xff] }
  0x2c   : > { %848 = vmatpush3.msra.mxu0 %v280_v6  ;;  %912 = vmatpush3.msra.mxu1 %v280_v6  ;;  %v573_v42 = vld [vmem:[%s1303_s3 + $0x40] sm:$0xff]  ;;  %v631_v46 = vld [vmem:[%s1304_s4 + $0x18] sm:$0xff]  ;;  %v633_v48 = vld [vmem:[%s1304_s4 + $0x28] sm:$0xff] }
  0x2d   : > { %849 = vmatprep.subr.mxu0 %v1025_v0  ;;  %899 = vmatprep.subr.mxu1 %v1025_v0  ;;  %v628_v43 = vld [vmem:[%s1304_s4] sm:$0xff]  ;;  %v634_v49 = vld [vmem:[%s1304_s4 + $0x30] sm:$0xff]  ;;  %v635_v50 = vld [vmem:[%s1304_s4 + $0x38] sm:$0xff] }
  0x2e   : > { %850 = vmatpush3.msra.mxu0 %v279_v7  ;;  %913 = vmatpush3.msra.mxu1 %v279_v7  ;;  %v632_v47 = vld [vmem:[%s1304_s4 + $0x20] sm:$0xff] }
  0x2f   : > { %851 = vmatprep.subr.mxu0 %v1025_v0  ;;  %900 = vmatprep.subr.mxu1 %v1025_v0  ;;  %v636_v51 = vld [vmem:[%s1304_s4 + $0x40] sm:$0xff] }
  0x30   : > { %852 = vmatpush3.msra.mxu0 %v278_v8  ;;  %914 = vmatpush3.msra.mxu1 %v278_v8 }
  0x31   : > { %853 = vmatprep.subr.mxu0 %v1025_v0  ;;  %901 = vmatprep.subr.mxu1 %v1025_v0 }
  0x32   : > { %854 = vmatpush3.msra.mxu0 %v277_v9  ;;  %915 = vmatpush3.msra.mxu1 %v277_v9 }
  0x33   : > { %855 = vmatprep.subr.mxu0 %v1025_v0  ;;  %902 = vmatprep.subr.mxu1 %v1025_v0 }
  0x34   : > { %856 = vmatpush3.msra.mxu0 %v276_v10  ;;  %916 = vmatpush3.msra.mxu1 %v276_v10 }
  0x35   : > { %857 = vmatprep.subr.mxu0 %v1025_v0  ;;  %903 = vmatprep.subr.mxu1 %v1025_v0 }
  0x36   : > { %858 = vmatpush3.msra.mxu0 %v275_v11  ;;  %917 = vmatpush3.msra.mxu1 %v275_v11 }
  0x37   : > { %859 = vmatprep.subr.mxu0 %v1025_v0  ;;  %904 = vmatprep.subr.mxu1 %v1025_v0 }
  0x38   : > { %860 = vmatpush3.msra.mxu0 %v274_v12  ;;  %918 = vmatpush3.msra.mxu1 %v274_v12 }
  0x39   : > { %861 = vmatprep.subr.mxu0 %v1025_v0  ;;  %905 = vmatprep.subr.mxu1 %v1025_v0 }
  0x3a   : > { %862 = vmatpush3.msra.mxu0 %v273_v13  ;;  %919 = vmatpush3.msra.mxu1 %v273_v13 }
  0x3b   : > { %863 = vmatprep.subr.mxu0 %v1025_v0  ;;  %906 = vmatprep.subr.mxu1 %v1025_v0 }
  0x3c   : > { %864 = vmatpush3.msra.mxu0 %v272_v14  ;;  %920 = vmatpush3.msra.mxu1 %v272_v14 }
  0x3d   : > { %865 = vmatprep.subr.mxu0 %v1025_v0  ;;  %907 = vmatprep.subr.mxu1 %v1025_v0 }
  0x3e   : > { %866 = vmatpush3.msra.mxu0 %v271_v15  ;;  %921 = vmatpush3.msra.mxu1 %v271_v15 }
  0x3f   : > { %868 = vmatmul.mubr.msk.f32.vlgmr.msra.gmra.mxu0 %vm348_vm1, %v285_v16  ;;  %883 = vmatmul.mubr.msk.f32.vlgmr.msra.gmra.mxu1 %vm348_vm1, %v290_v17 }
  0x40   : > { %870 = vmatprep.mubr.msk.f32.mxu0 %vm1026_vm0, %v1025_v0  ;;  %885 = vmatprep.mubr.msk.f32.mxu1 %vm1026_vm0, %v1025_v0 }
  0x41   : > { %310 = vperm.xlu0 %964, %v295_v22   ;;  %320 = vperm.xlu1 %965, %v297_v23  }
  0x43   : > { %871 = vmatmul.mubr.msk.f32.gmra.mxu0 %vm348_vm1, %v286_v20  ;;  %886 = vmatmul.mubr.msk.f32.gmra.mxu1 %vm348_vm1, %v291_v21 }
  0x44   : > { %873 = vmatprep.mubr.msk.f32.mxu0 %vm1026_vm0, %v1025_v0  ;;  %888 = vmatprep.mubr.msk.f32.mxu1 %vm1026_vm0, %v1025_v0 }
  0x45   : > { %325 = vperm.xlu0 %964, %v298_v26   ;;  %330 = vperm.xlu1 %965, %v299_v27  }
  0x47   : > { %874 = vmatmul.mubr.msk.f32.gmra.mxu0 %vm348_vm1, %v287_v24  ;;  %889 = vmatmul.mubr.msk.f32.gmra.mxu1 %vm348_vm1, %v292_v25 }
  0x48   : > { %876 = vmatprep.mubr.msk.f32.mxu0 %vm1026_vm0, %v1025_v0  ;;  %891 = vmatprep.mubr.msk.f32.mxu1 %vm1026_vm0, %v1025_v0 }
  0x49   : > { %335 = vperm.xlu0 %964, %v300_v30   ;;  %340 = vperm.xlu1 %965, %v301_v31  }
  0x4b   : > { %877 = vmatmul.mubr.msk.f32.gmra.mxu0 %vm348_vm1, %v288_v28  ;;  %892 = vmatmul.mubr.msk.f32.gmra.mxu1 %vm348_vm1, %v293_v29 }
  0x4c   : > { %879 = vmatprep.mubr.msk.f32.mxu0 %vm1026_vm0, %v1025_v0 }
  0x4d   : > { %345 = vperm.xlu0 %964, %v302_v33   ;;  %576 = vperm.xlu1 %965, %v565_v34  }
  0x4f   : > { %880 = vmatmul.mubr.msk.f32.gmra.mxu0 %vm348_vm1, %v289_v32 }
  0x51   : > { %581 = vperm.xlu0 %964, %v566_v35   ;;  %586 = vperm.xlu1 %965, %v567_v36  }
  0x55   : > { %591 = vperm.xlu0 %964, %v568_v37   ;;  %596 = vperm.xlu1 %965, %v569_v38  }
  0x59   : > { %601 = vperm.xlu0 %964, %v570_v39   ;;  %606 = vperm.xlu1 %965, %v571_v40  }
  0x5d   : > { %611 = vperm.xlu0 %964, %v572_v41   ;;  %616 = vperm.xlu1 %965, %v573_v42  }
  0x61   : > { %639 = vperm.xlu0 %964, %v628_v43   ;;  %644 = vperm.xlu1 %965, %v629_v44  }
  0x65   : > { %649 = vperm.xlu0 %964, %v630_v45   ;;  %654 = vperm.xlu1 %965, %v631_v46  }
  0x69   : > { %659 = vperm.xlu0 %964, %v632_v47   ;;  %664 = vperm.xlu1 %965, %v633_v48  }
  0x6d   : > { %669 = vperm.xlu0 %964, %v634_v49   ;;  %674 = vperm.xlu1 %965, %v635_v50  }
  0x71   : > { %679 = vperm.xlu0 %964, %v636_v51  }
  0x9c   : > { %v306_v52 = vpop.permute.xlu0 %305  ;;  %v316_v55 = vpop.permute.xlu1 %315 }
  0xbc   : > { %v311_v58 = vpop.permute.xlu0 %310  ;;  %v321_v63 = vpop.permute.xlu1 %320 }
  0xc0   : > { %v326_v3 = vpop.permute.xlu0 %325  ;;  %v331_v11 = vpop.permute.xlu1 %330 }
  0xc4   : > { %v336_v19 = vpop.permute.xlu0 %335  ;;  %v341_v28 = vpop.permute.xlu1 %340 }
  0xc8   : > { %v346_v32 = vpop.permute.xlu0 %345 }
  0xff   : > { %v442_v53 = vpop.f32.mrf.mxu0  ;;  %v467_v54 = vpop.f32.mrf.mxu1 }
 0x100   : > { %v443_v4 = vadd.f32 %v442_v53, %v306_v52  ;;  %v468_v22 = vadd.f32 %v467_v54, %v331_v11 }
 0x101   : > { %v869_v56 = vpop.f32.mrf.mxu0  ;;  %v884_v57 = vpop.f32.mrf.mxu1 }
 0x102   : > { %v487_v12 = vsel %vm486_vm2, %v443_v4, 0.0  ;;  %v496_v30 = vsel %vm486_vm2, %v468_v22, 0.0 }
 0x103   : > { %v447_v59 = vpop.f32.mrf.mxu0  ;;  %v472_v60 = vpop.f32.mrf.mxu1 }
 0x104   : > { %v448_v0 = vadd.f32 %v447_v59, %v311_v58  ;;  %v473_v26 = vadd.f32 %v472_v60, %v336_v19 }
 0x105   : > { %v872_v61 = vpop.f32.mrf.mxu0  ;;  %v887_v62 = vpop.f32.mrf.mxu1 }
 0x106   : > { %v488_v8 = vsel %vm486_vm2, %v448_v0, 0.0  ;;  %v498_v34 = vsel %vm486_vm2, %v473_v26, 0.0 }
 0x107   : > { %v452_v1 = vpop.f32.mrf.mxu0  ;;  %v477_v2 = vpop.f32.mrf.mxu1  ;;  %v489_v15 = vadd.f32 %v488_v8, %v487_v12 }
 0x108   : > { %v453_v5 = vadd.f32 %v452_v1, %v316_v55  ;;  %v478_v31 = vadd.f32 %v477_v2, %v341_v28  ;;  %v582_v2 = vpop.permute.xlu0 %581 }
 0x109   : > { %v875_v6 = vpop.f32.mrf.mxu0  ;;  %v890_v7 = vpop.f32.mrf.mxu1 }
 0x10a   : > { %v490_v13 = vsel %vm486_vm2, %v453_v5, 0.0  ;;  %v500_v37 = vsel %vm486_vm2, %v478_v31, 0.0 }
 0x10b   : > { %v457_v9 = vpop.f32.mrf.mxu0  ;;  %v482_v10 = vpop.f32.mrf.mxu1  ;;  %v491_v20 = vadd.f32 %v490_v13, %v489_v15 }
 0x10c   : > { %v458_v14 = vadd.f32 %v457_v9, %v321_v63  ;;  %v483_v35 = vadd.f32 %v482_v10, %v346_v32 }
 0x10d   : > { %v878_v16 = vpop.f32.mrf.mxu0  ;;  %v893_v17 = vpop.f32.mrf.mxu1 }
 0x10e   : > { %v492_v18 = vsel %vm486_vm2, %v458_v14, 0.0  ;;  %v502_v39 = vsel %vm486_vm2, %v483_v35, 0.0 }
 0x10f   : > { %v462_v21 = vpop.f32.mrf.mxu0  ;;  %v493_v24 = vadd.f32 %v492_v18, %v491_v20 }
 0x110   : > { %v463_v23 = vadd.f32 %v462_v21, %v326_v3 }
 0x111   : > { %v881_v25 = vpop.f32.mrf.mxu0 }
 0x112   : > { %v494_v27 = vsel %vm486_vm2, %v463_v23, 0.0 }
 0x113   : > { %v495_v29 = vadd.f32 %v494_v27, %v493_v24 }
 0x115   : > { %v497_v33 = vadd.f32 %v496_v30, %v495_v29 }
 0x117   : > { %v499_v36 = vadd.f32 %v498_v34, %v497_v33 }
 0x119   : > { %v501_v38 = vadd.f32 %v500_v37, %v499_v36 }
 0x11b   : > { %v503_v40 = vadd.f32 %v502_v39, %v501_v38 }
 0x11d   : > { %v504_v41 = vrot.slane %v503_v40, 4 }
 0x11f   : > { %v505_v42 = vadd.f32 %v504_v41, %v503_v40 }
 0x121   : > { %v506_v43 = vrot.slane %v505_v42, 2 }
 0x123   : > { %v507_v44 = vadd.f32 %v506_v43, %v505_v42 }
 0x125   : > { %v508_v45 = vrot.slane %v507_v44, 1 }
 0x127   : > { %v509_v46 = vadd.f32 %v508_v45, %v507_v44 }
 0x129   : > { %v511_v47 = vmul.f32 0.013888889, %v509_v46 }
 0x12b   : > { %v512_v48 = vsub.f32 %v443_v4, %v511_v47  ;;  %v513_v49 = vsub.f32 %v448_v0, %v511_v47  ;;  %v514_v50 = vsub.f32 %v453_v5, %v511_v47  ;;  %v515_v51 = vsub.f32 %v458_v14, %v511_v47  ;;  %v577_v0 = vpop.permute.xlu1 %576  ;;  %v592_v14 = vpop.permute.xlu0 %591 }
 0x12c   : > { %v516_v52 = vsub.f32 %v463_v23, %v511_v47  ;;  %v517_v56 = vsub.f32 %v468_v22, %v511_v47  ;;  %v518_v61 = vsub.f32 %v473_v26, %v511_v47  ;;  %v519_v3 = vsub.f32 %v478_v31, %v511_v47 }
 0x12d   : > { %v521_v53 = vmul.f32 %v512_v48, %v512_v48  ;;  %v522_v54 = vmul.f32 %v513_v49, %v513_v49  ;;  %v523_v55 = vmul.f32 %v514_v50, %v514_v50  ;;  %v524_v57 = vmul.f32 %v515_v51, %v515_v51 }
 0x12e   : > { %v525_v62 = vmul.f32 %v516_v52, %v516_v52  ;;  %v526_v4 = vmul.f32 %v517_v56, %v517_v56  ;;  %v520_v7 = vsub.f32 %v483_v35, %v511_v47  ;;  %v527_v8 = vmul.f32 %v518_v61, %v518_v61 }
 0x12f   : > { %v530_v58 = vsel %vm486_vm2, %v521_v53, 0.0  ;;  %v531_v59 = vsel %vm486_vm2, %v522_v54, 0.0  ;;  %v533_v63 = vsel %vm486_vm2, %v523_v55, 0.0  ;;  %v535_v5 = vsel %vm486_vm2, %v524_v57, 0.0  ;;  %v587_v15 = vpop.permute.xlu1 %586  ;;  %v602_v23 = vpop.permute.xlu0 %601 }
 0x130   : > { %v532_v60 = vadd.f32 %v531_v59, %v530_v58  ;;  %v537_v9 = vsel %vm486_vm2, %v525_v62, 0.0  ;;  %v528_v11 = vmul.f32 %v519_v3, %v519_v3  ;;  %v539_v12 = vsel %vm486_vm2, %v526_v4, 0.0 }
 0x131   : > { %v529_v16 = vmul.f32 %v520_v7, %v520_v7  ;;  %v541_v17 = vsel %vm486_vm2, %v527_v8, 0.0 }
 0x132   : > { %v534_v1 = vadd.f32 %v533_v63, %v532_v60  ;;  %v543_v19 = vsel %vm486_vm2, %v528_v11, 0.0 }
 0x133   : > { %v545_v21 = vsel %vm486_vm2, %v529_v16, 0.0  ;;  %v597_v24 = vpop.permute.xlu1 %596  ;;  %v612_v28 = vpop.permute.xlu0 %611 }
 0x134   : > { %v536_v6 = vadd.f32 %v535_v5, %v534_v1 }
 0x136   : > { %v538_v10 = vadd.f32 %v537_v9, %v536_v6 }
 0x137   : > { %v607_v29 = vpop.permute.xlu1 %606  ;;  %v640_v33 = vpop.permute.xlu0 %639 }
 0x138   : > { %v540_v13 = vadd.f32 %v539_v12, %v538_v10 }
 0x13a   : > { %v542_v18 = vadd.f32 %v541_v17, %v540_v13 }
 0x13b   : > { %v617_v34 = vpop.permute.xlu1 %616  ;;  %v650_v37 = vpop.permute.xlu0 %649 }
 0x13c   : > { %v544_v20 = vadd.f32 %v543_v19, %v542_v18 }
 0x13e   : > { %v546_v22 = vadd.f32 %v545_v21, %v544_v20 }
 0x13f   : > { %v645_v38 = vpop.permute.xlu1 %644  ;;  %v660_v39 = vpop.permute.xlu0 %659 }
 0x140   : > { %v547_v25 = vrot.slane %v546_v22, 4 }
 0x142   : > { %v548_v26 = vadd.f32 %v547_v25, %v546_v22 }
 0x143   : > { %v655_v40 = vpop.permute.xlu1 %654  ;;  %v670_v42 = vpop.permute.xlu0 %669 }
 0x144   : > { %v549_v27 = vrot.slane %v548_v26, 2 }
 0x146   : > { %v550_v30 = vadd.f32 %v549_v27, %v548_v26 }
 0x147   : > { %v665_v43 = vpop.permute.xlu1 %664 }
 0x148   : > { %v551_v31 = vrot.slane %v550_v30, 1 }
 0x14a   : > { %v552_v32 = vadd.f32 %v551_v31, %v550_v30 }
 0x14c   : > { %v553_v35 = vmul.f32 0.013888889, %v552_v32 }
 0x14e   : > { %v554_v36 = vadd.f32 1e-06, %v553_v35 }
 0x150   : > { %966 = vrsqrt.f32 %v554_v36 }
 0x15d   : > { %v967_v41 = vpop.eup %966 }
 0x15e   : > { %v556_v44 = vmul.f32 %v967_v41, %v512_v48  ;;  %v557_v45 = vmul.f32 %v967_v41, %v513_v49  ;;  %v558_v46 = vmul.f32 %v967_v41, %v514_v50  ;;  %v559_v47 = vmul.f32 %v967_v41, %v515_v51 }
 0x15f   : > { %v560_v53 = vmul.f32 %v967_v41, %v516_v52  ;;  %v561_v54 = vmul.f32 %v967_v41, %v517_v56  ;;  %v562_v55 = vmul.f32 %v967_v41, %v518_v61  ;;  %v563_v57 = vmul.f32 %v967_v41, %v519_v3  ;;  %v680_v52 = vpop.permute.xlu0 %679  ;;  %v675_v56 = vpop.permute.xlu1 %674 }
 0x160   : > { %v564_v58 = vmul.f32 %v967_v41, %v520_v7  ;;  %v619_v59 = vmul.f32 %v577_v0, %v556_v44  ;;  %v620_v60 = vmul.f32 %v582_v2, %v557_v45  ;;  %v621_v62 = vmul.f32 %v587_v15, %v558_v46 }
 0x161   : > { %v622_v63 = vmul.f32 %v592_v14, %v559_v47  ;;  %v623_v1 = vmul.f32 %v597_v24, %v560_v53  ;;  %v624_v4 = vmul.f32 %v602_v23, %v561_v54  ;;  %v625_v5 = vmul.f32 %v607_v29, %v562_v55 }
 0x162   : > { %v626_v48 = vmul.f32 %v612_v28, %v563_v57  ;;  %v627_v49 = vmul.f32 %v617_v34, %v564_v58  ;;  %v682_v50 = vadd.f32 %v640_v33, %v619_v59  ;;  %v683_v51 = vadd.f32 %v645_v38, %v620_v60 }
 0x163   : > { %v684_v61 = vadd.f32 %v650_v37, %v621_v62  ;;  %v685_v3 = vadd.f32 %v655_v40, %v622_v63  ;;  %v686_v6 = vadd.f32 %v660_v39, %v623_v1  ;;  %v687_v0 = vadd.f32 %v665_v43, %v624_v4 }
 0x164   : > { %v688_v2 = vadd.f32 %v670_v42, %v625_v5  ;;  %v689_v7 = vadd.f32 %v675_v56, %v626_v48  ;;  %v690_v8 = vadd.f32 %v680_v52, %v627_v49  ;;  %691 = vst.msk [vmem:[%s270_s30] sm:$0xff] %vm486_vm2, %v682_v50  ;;  %692 = vst.msk [vmem:[%s270_s30 + $0x8] sm:$0xff] %vm486_vm2, %v683_v51 }
 0x165   : > { %693 = vst.msk [vmem:[%s270_s30 + $0x10] sm:$0xff] %vm486_vm2, %v684_v61  ;;  %694 = vst.msk [vmem:[%s270_s30 + $0x18] sm:$0xff] %vm486_vm2, %v685_v3 }
 0x166   : > { %695 = vst.msk [vmem:[%s270_s30 + $0x20] sm:$0xff] %vm486_vm2, %v686_v6  ;;  %696 = vst.msk [vmem:[%s270_s30 + $0x28] sm:$0xff] %vm486_vm2, %v687_v0 }
 0x167   : > { %697 = vst.msk [vmem:[%s270_s30 + $0x30] sm:$0xff] %vm486_vm2, %v688_v2  ;;  %698 = vst.msk [vmem:[%s270_s30 + $0x38] sm:$0xff] %vm486_vm2, %v689_v7 }
 0x168   : > { %699 = vst.msk [vmem:[%s270_s30 + $0x40] sm:$0xff] %vm486_vm2, %v690_v8 }
 0x169 PF: > { %s16_s20 = sadd.s32 1, %s1020_s20   ;;  %s1308_s18 = smov %s1016_s19 }
 0x16a   : > { %p13_p2 = scmp.ge.s32.totalorder %s16_s20, 4   ;;  %s1309_s19 = smov %s1311_s22 }
 0x16c   :  { %15 = sbr.rel (!%p13_p2) target bundleno = 2 (0x2), region = 75 }
 0x171   :  { %727 = vsyncpa [#allocation3], 1 }
 0x172   :  { %729 = vsyncpa [#allocation3 + $0x1], 1 }

// kernel: decoder_forward.8
= control target key start
LH: loop header
LB: loop body
LE: loop exit
PB: predicated region body
PF: predicated region fallthrough
CT: control target
= control target key end

     0   :  { %10 = vsyncpa [#allocation3], 0  ;;  %s1337_s18 = smov 0   ;;  %s1339_s19 = smov 0   ;;  %s1774_s0 = inlined_call_operand.vmem [shape: f32[2,112,16], index: 0, kind: input, shape index: {}]   ;;  %s1775_s1 = inlined_call_operand.hbm [shape: f32[72,112], index: 1, kind: input, shape index: {}]   ;;  %s1776_s2 = inlined_call_operand.vmem [shape: f32[72,1], index: 2, kind: input, shape index: {}]   ;;  %s1777_s3 = inlined_call_operand.vmem [shape: f32[72,1], index: 3, kind: input, shape index: {}]   ;;  %s1778_s4 = inlined_call_operand.vmem [shape: f32[72,1], index: 4, kind: input, shape index: {}]   ;;  %s1779_s5 = inlined_call_operand.vmem [shape: f32[2,72,16], index: 5, kind: output, shape index: {}]  }
   0x1   :  { %s1341_s20 = smov 0  }
   0x2 LB: > { %s1039_s21 = sadd.s32 4294967295, %s1299_s20   ;;  %s28_s22 = sadd.s32 1, %s1295_s19  ;;  %s1299_s20 = sphi %s1341_s20, %s16_s20   ;;  %s1295_s19 = sphi %s1339_s19, %s1783_s19   ;;  %s1291_s18 = sphi %s1337_s18, %s1782_s18  }
   0x3   : > { %p30_p0 = scmp.ge.s32.totalorder %s28_s22, 2  ;;  %p1041_p1 = scmp.ge.s32.totalorder %s1299_s20, 1 }
   0x4   : > { %p173_p2 = scmp.lt.s32.totalorder %s1299_s20, 3  ;;  %p1362_p4 = scmp.eq.s32.totalorder %s1039_s21, 0 }
   0x5   : > { %s1785_s22 = smov (%p30_p0, %s28_s22), 0  ;;  %s1301_s25 = smov [#allocation2]  }
   0x6   : > { %p1358_p3 = pnand %p1041_p1, %p173_p2  ;;  %s185_s26 = sshll.u32 %s1301_s25, 4  ;;  %s186_s26 = int_to_ptr.vmem [resolvable:$true] %s185_s26 }
   0x7   : > { %s1258_s27 = scalar_lea.vmem %s186_s26, 1152  ;;  %p1266_p11 = scmp.lt.s32.totalorder %s186_s26, %s186_s26 }
   0x8   : > { %p1171_p5 = pneg %p1358_p3  ;;  %p1259_p8 = scmp.ne.s32.totalorder %s186_s26, %s1258_s27 }
   0x9   : > { %p1267_p12 = scmp.lt.s32.totalorder %s1258_s27, %s1258_s27 }
   0xa   : > { %p1172_p6 = pnand %p1362_p4, %p1171_p5 }
   0xb   : > { %p1268_p13 = por %p1267_p12, %p1266_p11 }
   0xc   : > { %p1249_p7 = pneg %p1172_p6 }
   0xe   : > { %p1261_p9 = pnand %p1259_p8, %p1249_p7 }
  0x10   : > { %p1262_p10 = pneg %p1261_p9 }
  0x12   : > { %p1269_p0 = pnand %p1268_p13, %p1262_p10 }
  0x14   : > { %1272 = shalt.err (!%p1269_p0)
}
  0x15   : > { %s1302_s28 = smov 128   ;;  %s1303_s29 = smov 8  }
  0x16   : > { %1174 = dma.hbm_to_vmem [thread:$0]  (!%p1172_p6), %s1775_s1, 1152, %s186_s26, [#allocation3], %s1302_s28, %s1302_s28, %s1303_s29  }
  0x17   : > { %221 = sbr.rel (%p1358_p3) target bundleno = 422 (0x1a6), region = 40 }
  0x1c   : > { %1286 = dma.done.wait (%p1362_p4), [#allocation3], 1152  }
  0x1d   : > { %1288 = vsyncadd (%p1362_p4), [#allocation3], 4294966144  ;;  %p255_p1 = scmp.lt.s32.totalorder %s1291_s18, 1  ;;  %v1304_v0 = vmov 0.0   ;;  %vm1305_vm0 = vmmov 0   ;;  %v1306_v1 = vmov 0  }
  0x1e   : > { %1082 = vmatprep.subr.mxu0 %v1304_v0  ;;  %1137 = vmatprep.subr.mxu1 %v1304_v0  ;;  %v285_v16 = vld [vmem:[#allocation2] sm:$0xff]  ;;  %vm348_vm1 = vcmask 916480   ;;  %v290_v17 = vld [vmem:[#allocation2 + $0x28] sm:$0xff]  ;;  %v296_v19 = vld [vmem:[%s1776_s2 + $0x10] sm:$0xff]  ;;  %vm486_vm2 = vcmask 130048  }
  0x1f   : > { %s1787_s18 = smov (!%p255_p1, %s1291_s18), 1  ;;  %1110 = vmatprep.mubr.msk.f32.mxu0 %vm1305_vm0, %v1304_v0  ;;  %1125 = vmatprep.mubr.msk.f32.mxu1 %vm1305_vm0, %v1304_v0  ;;  %v294_v18 = vld [vmem:[%s1776_s2] sm:$0xff]  ;;  %v286_v20 = vld [vmem:[#allocation2 + $0x8] sm:$0xff]  ;;  %v291_v21 = vld [vmem:[#allocation2 + $0x30] sm:$0xff] }
  0x20   : > { %1207 = vset.pattern.permute.xlu0 %v1306_v1  ;;  %1208 = vset.pattern.permute.xlu1 %v1306_v1  ;;  %s1165_s7 = smul.u32 112, %s1787_s18  ;;  %v295_v22 = vld [vmem:[%s1776_s2 + $0x8] sm:$0xff]  ;;  %v297_v23 = vld [vmem:[%s1776_s2 + $0x18] sm:$0xff]  ;;  %v287_v24 = vld [vmem:[#allocation2 + $0x10] sm:$0xff] }
  0x21   : > { %305 = vperm.xlu0 %1207, %v294_v18   ;;  %315 = vperm.xlu1 %1208, %v296_v19   ;;  %v292_v25 = vld [vmem:[#allocation2 + $0x38] sm:$0xff]  ;;  %v298_v26 = vld [vmem:[%s1776_s2 + $0x20] sm:$0xff]  ;;  %v299_v27 = vld [vmem:[%s1776_s2 + $0x28] sm:$0xff]  ;;  %s1166_s27 = smul.u32 72, %s1787_s18 }
  0x22   : > { %s1393_s10 = scalar_lea.vmem %s1774_s0, %s1165_s7  ;;  %v288_v28 = vld [vmem:[#allocation2 + $0x18] sm:$0xff]  ;;  %v293_v29 = vld [vmem:[#allocation2 + $0x40] sm:$0xff]  ;;  %v300_v30 = vld [vmem:[%s1776_s2 + $0x30] sm:$0xff] }
  0x23   : > { %v284_v2 = vld [vmem:[%s1393_s10 + $0x68] sm:$0xff]  ;;  %v283_v3 = vld [vmem:[%s1393_s10 + $0x60] sm:$0xff]  ;;  %v282_v4 = vld [vmem:[%s1393_s10 + $0x58] sm:$0xff]  ;;  %s270_s29 = scalar_lea.vmem %s1779_s5, %s1166_s27 }
  0x24   : > { %1083 = vmatpush3.msra.mxu0 %v284_v2  ;;  %1151 = vmatpush3.msra.mxu1 %v284_v2  ;;  %v281_v5 = vld [vmem:[%s1393_s10 + $0x50] sm:$0xff]  ;;  %v280_v6 = vld [vmem:[%s1393_s10 + $0x48] sm:$0xff]  ;;  %v279_v7 = vld [vmem:[%s1393_s10 + $0x40] sm:$0xff] }
  0x25   : > { %1084 = vmatprep.subr.mxu0 %v1304_v0  ;;  %1138 = vmatprep.subr.mxu1 %v1304_v0  ;;  %v278_v8 = vld [vmem:[%s1393_s10 + $0x38] sm:$0xff]  ;;  %v277_v9 = vld [vmem:[%s1393_s10 + $0x30] sm:$0xff]  ;;  %v276_v10 = vld [vmem:[%s1393_s10 + $0x28] sm:$0xff] }
  0x26   : > { %1085 = vmatpush3.msra.mxu0 %v283_v3  ;;  %1152 = vmatpush3.msra.mxu1 %v283_v3  ;;  %v275_v11 = vld [vmem:[%s1393_s10 + $0x20] sm:$0xff]  ;;  %v274_v12 = vld [vmem:[%s1393_s10 + $0x18] sm:$0xff]  ;;  %v273_v13 = vld [vmem:[%s1393_s10 + $0x10] sm:$0xff] }
  0x27   : > { %1086 = vmatprep.subr.mxu0 %v1304_v0  ;;  %1139 = vmatprep.subr.mxu1 %v1304_v0  ;;  %v272_v14 = vld [vmem:[%s1393_s10 + $0x8] sm:$0xff]  ;;  %v271_v15 = vld [vmem:[%s1393_s10] sm:$0xff]  ;;  %v301_v31 = vld [vmem:[%s1776_s2 + $0x38] sm:$0xff] }
  0x28   : > { %1087 = vmatpush3.msra.mxu0 %v282_v4  ;;  %1153 = vmatpush3.msra.mxu1 %v282_v4  ;;  %v289_v32 = vld [vmem:[#allocation2 + $0x20] sm:$0xff]  ;;  %v566_v35 = vld [vmem:[%s1777_s3 + $0x8] sm:$0xff]  ;;  %v567_v36 = vld [vmem:[%s1777_s3 + $0x10] sm:$0xff] }
  0x29   : > { %1088 = vmatprep.subr.mxu0 %v1304_v0  ;;  %1140 = vmatprep.subr.mxu1 %v1304_v0  ;;  %v302_v33 = vld [vmem:[%s1776_s2 + $0x40] sm:$0xff]  ;;  %v568_v37 = vld [vmem:[%s1777_s3 + $0x18] sm:$0xff]  ;;  %v570_v39 = vld [vmem:[%s1777_s3 + $0x28] sm:$0xff] }
  0x2a   : > { %1089 = vmatpush3.msra.mxu0 %v281_v5  ;;  %1154 = vmatpush3.msra.mxu1 %v281_v5  ;;  %v565_v34 = vld [vmem:[%s1777_s3] sm:$0xff]  ;;  %v571_v40 = vld [vmem:[%s1777_s3 + $0x30] sm:$0xff]  ;;  %v572_v41 = vld [vmem:[%s1777_s3 + $0x38] sm:$0xff] }
  0x2b   : > { %1090 = vmatprep.subr.mxu0 %v1304_v0  ;;  %1141 = vmatprep.subr.mxu1 %v1304_v0  ;;  %v569_v38 = vld [vmem:[%s1777_s3 + $0x20] sm:$0xff]  ;;  %v629_v44 = vld [vmem:[%s1778_s4 + $0x8] sm:$0xff]  ;;  %v630_v45 = vld [vmem:[%s1778_s4 + $0x10] sm:$0xff] }
  0x2c   : > { %1091 = vmatpush3.msra.mxu0 %v280_v6  ;;  %1155 = vmatpush3.msra.mxu1 %v280_v6  ;;  %v573_v42 = vld [vmem:[%s1777_s3 + $0x40] sm:$0xff]  ;;  %v631_v46 = vld [vmem:[%s1778_s4 + $0x18] sm:$0xff]  ;;  %v633_v48 = vld [vmem:[%s1778_s4 + $0x28] sm:$0xff] }
  0x2d   : > { %1092 = vmatprep.subr.mxu0 %v1304_v0  ;;  %1142 = vmatprep.subr.mxu1 %v1304_v0  ;;  %v628_v43 = vld [vmem:[%s1778_s4] sm:$0xff]  ;;  %v634_v49 = vld [vmem:[%s1778_s4 + $0x30] sm:$0xff]  ;;  %v635_v50 = vld [vmem:[%s1778_s4 + $0x38] sm:$0xff] }
  0x2e   : > { %1093 = vmatpush3.msra.mxu0 %v279_v7  ;;  %1156 = vmatpush3.msra.mxu1 %v279_v7  ;;  %v632_v47 = vld [vmem:[%s1778_s4 + $0x20] sm:$0xff] }
  0x2f   : > { %1094 = vmatprep.subr.mxu0 %v1304_v0  ;;  %1143 = vmatprep.subr.mxu1 %v1304_v0  ;;  %v636_v51 = vld [vmem:[%s1778_s4 + $0x40] sm:$0xff] }
  0x30   : > { %1095 = vmatpush3.msra.mxu0 %v278_v8  ;;  %1157 = vmatpush3.msra.mxu1 %v278_v8 }
  0x31   : > { %1096 = vmatprep.subr.mxu0 %v1304_v0  ;;  %1144 = vmatprep.subr.mxu1 %v1304_v0 }
  0x32   : > { %1097 = vmatpush3.msra.mxu0 %v277_v9  ;;  %1158 = vmatpush3.msra.mxu1 %v277_v9 }
  0x33   : > { %1098 = vmatprep.subr.mxu0 %v1304_v0  ;;  %1145 = vmatprep.subr.mxu1 %v1304_v0 }
  0x34   : > { %1099 = vmatpush3.msra.mxu0 %v276_v10  ;;  %1159 = vmatpush3.msra.mxu1 %v276_v10 }
  0x35   : > { %1100 = vmatprep.subr.mxu0 %v1304_v0  ;;  %1146 = vmatprep.subr.mxu1 %v1304_v0 }
  0x36   : > { %1101 = vmatpush3.msra.mxu0 %v275_v11  ;;  %1160 = vmatpush3.msra.mxu1 %v275_v11 }
  0x37   : > { %1102 = vmatprep.subr.mxu0 %v1304_v0  ;;  %1147 = vmatprep.subr.mxu1 %v1304_v0 }
  0x38   : > { %1103 = vmatpush3.msra.mxu0 %v274_v12  ;;  %1161 = vmatpush3.msra.mxu1 %v274_v12 }
  0x39   : > { %1104 = vmatprep.subr.mxu0 %v1304_v0  ;;  %1148 = vmatprep.subr.mxu1 %v1304_v0 }
  0x3a   : > { %1105 = vmatpush3.msra.mxu0 %v273_v13  ;;  %1162 = vmatpush3.msra.mxu1 %v273_v13 }
  0x3b   : > { %1106 = vmatprep.subr.mxu0 %v1304_v0  ;;  %1149 = vmatprep.subr.mxu1 %v1304_v0 }
  0x3c   : > { %1107 = vmatpush3.msra.mxu0 %v272_v14  ;;  %1163 = vmatpush3.msra.mxu1 %v272_v14 }
  0x3d   : > { %1108 = vmatprep.subr.mxu0 %v1304_v0  ;;  %1150 = vmatprep.subr.mxu1 %v1304_v0 }
  0x3e   : > { %1109 = vmatpush3.msra.mxu0 %v271_v15  ;;  %1164 = vmatpush3.msra.mxu1 %v271_v15 }
  0x3f   : > { %1111 = vmatmul.mubr.msk.f32.vlgmr.msra.gmra.mxu0 %vm348_vm1, %v285_v16  ;;  %1126 = vmatmul.mubr.msk.f32.vlgmr.msra.gmra.mxu1 %vm348_vm1, %v290_v17 }
  0x40   : > { %1113 = vmatprep.mubr.msk.f32.mxu0 %vm1305_vm0, %v1304_v0  ;;  %1128 = vmatprep.mubr.msk.f32.mxu1 %vm1305_vm0, %v1304_v0 }
  0x41   : > { %310 = vperm.xlu0 %1207, %v295_v22   ;;  %320 = vperm.xlu1 %1208, %v297_v23  }
  0x43   : > { %1114 = vmatmul.mubr.msk.f32.gmra.mxu0 %vm348_vm1, %v286_v20  ;;  %1129 = vmatmul.mubr.msk.f32.gmra.mxu1 %vm348_vm1, %v291_v21 }
  0x44   : > { %1116 = vmatprep.mubr.msk.f32.mxu0 %vm1305_vm0, %v1304_v0  ;;  %1131 = vmatprep.mubr.msk.f32.mxu1 %vm1305_vm0, %v1304_v0 }
  0x45   : > { %325 = vperm.xlu0 %1207, %v298_v26   ;;  %330 = vperm.xlu1 %1208, %v299_v27  }
  0x47   : > { %1117 = vmatmul.mubr.msk.f32.gmra.mxu0 %vm348_vm1, %v287_v24  ;;  %1132 = vmatmul.mubr.msk.f32.gmra.mxu1 %vm348_vm1, %v292_v25 }
  0x48   : > { %1119 = vmatprep.mubr.msk.f32.mxu0 %vm1305_vm0, %v1304_v0  ;;  %1134 = vmatprep.mubr.msk.f32.mxu1 %vm1305_vm0, %v1304_v0 }
  0x49   : > { %335 = vperm.xlu0 %1207, %v300_v30   ;;  %340 = vperm.xlu1 %1208, %v301_v31  }
  0x4b   : > { %1120 = vmatmul.mubr.msk.f32.gmra.mxu0 %vm348_vm1, %v288_v28  ;;  %1135 = vmatmul.mubr.msk.f32.gmra.mxu1 %vm348_vm1, %v293_v29 }
  0x4c   : > { %1122 = vmatprep.mubr.msk.f32.mxu0 %vm1305_vm0, %v1304_v0 }
  0x4d   : > { %345 = vperm.xlu0 %1207, %v302_v33   ;;  %576 = vperm.xlu1 %1208, %v565_v34  }
  0x4f   : > { %1123 = vmatmul.mubr.msk.f32.gmra.mxu0 %vm348_vm1, %v289_v32 }
  0x51   : > { %581 = vperm.xlu0 %1207, %v566_v35   ;;  %586 = vperm.xlu1 %1208, %v567_v36  }
  0x55   : > { %591 = vperm.xlu0 %1207, %v568_v37   ;;  %596 = vperm.xlu1 %1208, %v569_v38  }
  0x59   : > { %601 = vperm.xlu0 %1207, %v570_v39   ;;  %606 = vperm.xlu1 %1208, %v571_v40  }
  0x5d   : > { %611 = vperm.xlu0 %1207, %v572_v41   ;;  %616 = vperm.xlu1 %1208, %v573_v42  }
  0x61   : > { %639 = vperm.xlu0 %1207, %v628_v43   ;;  %644 = vperm.xlu1 %1208, %v629_v44  }
  0x65   : > { %649 = vperm.xlu0 %1207, %v630_v45   ;;  %654 = vperm.xlu1 %1208, %v631_v46  }
  0x69   : > { %659 = vperm.xlu0 %1207, %v632_v47   ;;  %664 = vperm.xlu1 %1208, %v633_v48  }
  0x6d   : > { %669 = vperm.xlu0 %1207, %v634_v49   ;;  %674 = vperm.xlu1 %1208, %v635_v50  }
  0x71   : > { %679 = vperm.xlu0 %1207, %v636_v51  }
  0x9c   : > { %v306_v52 = vpop.permute.xlu0 %305  ;;  %v316_v55 = vpop.permute.xlu1 %315 }
  0xbc   : > { %v311_v58 = vpop.permute.xlu0 %310  ;;  %v321_v63 = vpop.permute.xlu1 %320 }
  0xc0   : > { %v326_v3 = vpop.permute.xlu0 %325  ;;  %v331_v11 = vpop.permute.xlu1 %330 }
  0xc4   : > { %v336_v19 = vpop.permute.xlu0 %335  ;;  %v341_v28 = vpop.permute.xlu1 %340 }
  0xc8   : > { %v346_v32 = vpop.permute.xlu0 %345 }
  0xff   : > { %v442_v53 = vpop.f32.mrf.mxu0  ;;  %v467_v54 = vpop.f32.mrf.mxu1 }
 0x100   : > { %v443_v4 = vadd.f32 %v442_v53, %v306_v52  ;;  %v468_v22 = vadd.f32 %v467_v54, %v331_v11 }
 0x101   : > { %v1112_v56 = vpop.f32.mrf.mxu0  ;;  %v1127_v57 = vpop.f32.mrf.mxu1 }
 0x102   : > { %v487_v12 = vsel %vm486_vm2, %v443_v4, 0.0  ;;  %v496_v30 = vsel %vm486_vm2, %v468_v22, 0.0 }
 0x103   : > { %v447_v59 = vpop.f32.mrf.mxu0  ;;  %v472_v60 = vpop.f32.mrf.mxu1 }
 0x104   : > { %v448_v0 = vadd.f32 %v447_v59, %v311_v58  ;;  %v473_v26 = vadd.f32 %v472_v60, %v336_v19 }
 0x105   : > { %v1115_v61 = vpop.f32.mrf.mxu0  ;;  %v1130_v62 = vpop.f32.mrf.mxu1 }
 0x106   : > { %v488_v8 = vsel %vm486_vm2, %v448_v0, 0.0  ;;  %v498_v34 = vsel %vm486_vm2, %v473_v26, 0.0 }
 0x107   : > { %v452_v1 = vpop.f32.mrf.mxu0  ;;  %v477_v2 = vpop.f32.mrf.mxu1  ;;  %v489_v15 = vadd.f32 %v488_v8, %v487_v12 }
 0x108   : > { %v453_v5 = vadd.f32 %v452_v1, %v316_v55  ;;  %v478_v31 = vadd.f32 %v477_v2, %v341_v28  ;;  %v582_v2 = vpop.permute.xlu0 %581 }
 0x109   : > { %v1118_v6 = vpop.f32.mrf.mxu0  ;;  %v1133_v7 = vpop.f32.mrf.mxu1 }
 0x10a   : > { %v490_v13 = vsel %vm486_vm2, %v453_v5, 0.0  ;;  %v500_v37 = vsel %vm486_vm2, %v478_v31, 0.0 }
 0x10b   : > { %v457_v9 = vpop.f32.mrf.mxu0  ;;  %v482_v10 = vpop.f32.mrf.mxu1  ;;  %v491_v20 = vadd.f32 %v490_v13, %v489_v15 }
 0x10c   : > { %v458_v14 = vadd.f32 %v457_v9, %v321_v63  ;;  %v483_v35 = vadd.f32 %v482_v10, %v346_v32 }
 0x10d   : > { %v1121_v16 = vpop.f32.mrf.mxu0  ;;  %v1136_v17 = vpop.f32.mrf.mxu1 }
 0x10e   : > { %v492_v18 = vsel %vm486_vm2, %v458_v14, 0.0  ;;  %v502_v39 = vsel %vm486_vm2, %v483_v35, 0.0 }
 0x10f   : > { %v462_v21 = vpop.f32.mrf.mxu0  ;;  %v493_v24 = vadd.f32 %v492_v18, %v491_v20 }
 0x110   : > { %v463_v23 = vadd.f32 %v462_v21, %v326_v3 }
 0x111   : > { %v1124_v25 = vpop.f32.mrf.mxu0 }
 0x112   : > { %v494_v27 = vsel %vm486_vm2, %v463_v23, 0.0 }
 0x113   : > { %v495_v29 = vadd.f32 %v494_v27, %v493_v24 }
 0x115   : > { %v497_v33 = vadd.f32 %v496_v30, %v495_v29 }
 0x117   : > { %v499_v36 = vadd.f32 %v498_v34, %v497_v33 }
 0x119   : > { %v501_v38 = vadd.f32 %v500_v37, %v499_v36 }
 0x11b   : > { %v503_v40 = vadd.f32 %v502_v39, %v501_v38 }
 0x11d   : > { %v504_v41 = vrot.slane %v503_v40, 4 }
 0x11f   : > { %v505_v42 = vadd.f32 %v504_v41, %v503_v40 }
 0x121   : > { %v506_v43 = vrot.slane %v505_v42, 2 }
 0x123   : > { %v507_v44 = vadd.f32 %v506_v43, %v505_v42 }
 0x125   : > { %v508_v45 = vrot.slane %v507_v44, 1 }
 0x127   : > { %v509_v46 = vadd.f32 %v508_v45, %v507_v44 }
 0x129   : > { %v511_v47 = vmul.f32 0.013888889, %v509_v46 }
 0x12b   : > { %v512_v48 = vsub.f32 %v443_v4, %v511_v47  ;;  %v513_v49 = vsub.f32 %v448_v0, %v511_v47  ;;  %v514_v50 = vsub.f32 %v453_v5, %v511_v47  ;;  %v515_v51 = vsub.f32 %v458_v14, %v511_v47  ;;  %v577_v0 = vpop.permute.xlu1 %576  ;;  %v592_v14 = vpop.permute.xlu0 %591 }
 0x12c   : > { %v516_v52 = vsub.f32 %v463_v23, %v511_v47  ;;  %v517_v56 = vsub.f32 %v468_v22, %v511_v47  ;;  %v518_v61 = vsub.f32 %v473_v26, %v511_v47  ;;  %v519_v3 = vsub.f32 %v478_v31, %v511_v47 }
 0x12d   : > { %v521_v53 = vmul.f32 %v512_v48, %v512_v48  ;;  %v522_v54 = vmul.f32 %v513_v49, %v513_v49  ;;  %v523_v55 = vmul.f32 %v514_v50, %v514_v50  ;;  %v524_v57 = vmul.f32 %v515_v51, %v515_v51 }
 0x12e   : > { %v525_v62 = vmul.f32 %v516_v52, %v516_v52  ;;  %v526_v4 = vmul.f32 %v517_v56, %v517_v56  ;;  %v520_v7 = vsub.f32 %v483_v35, %v511_v47  ;;  %v527_v8 = vmul.f32 %v518_v61, %v518_v61 }
 0x12f   : > { %v530_v58 = vsel %vm486_vm2, %v521_v53, 0.0  ;;  %v531_v59 = vsel %vm486_vm2, %v522_v54, 0.0  ;;  %v533_v63 = vsel %vm486_vm2, %v523_v55, 0.0  ;;  %v535_v5 = vsel %vm486_vm2, %v524_v57, 0.0  ;;  %v587_v15 = vpop.permute.xlu1 %586  ;;  %v602_v23 = vpop.permute.xlu0 %601 }
 0x130   : > { %v532_v60 = vadd.f32 %v531_v59, %v530_v58  ;;  %v537_v9 = vsel %vm486_vm2, %v525_v62, 0.0  ;;  %v528_v11 = vmul.f32 %v519_v3, %v519_v3  ;;  %v539_v12 = vsel %vm486_vm2, %v526_v4, 0.0 }
 0x131   : > { %v529_v16 = vmul.f32 %v520_v7, %v520_v7  ;;  %v541_v17 = vsel %vm486_vm2, %v527_v8, 0.0 }
 0x132   : > { %v534_v1 = vadd.f32 %v533_v63, %v532_v60  ;;  %v543_v19 = vsel %vm486_vm2, %v528_v11, 0.0 }
 0x133   : > { %v545_v21 = vsel %vm486_vm2, %v529_v16, 0.0  ;;  %v597_v24 = vpop.permute.xlu1 %596  ;;  %v612_v28 = vpop.permute.xlu0 %611 }
 0x134   : > { %v536_v6 = vadd.f32 %v535_v5, %v534_v1 }
 0x136   : > { %v538_v10 = vadd.f32 %v537_v9, %v536_v6 }
 0x137   : > { %v607_v29 = vpop.permute.xlu1 %606  ;;  %v640_v33 = vpop.permute.xlu0 %639 }
 0x138   : > { %v540_v13 = vadd.f32 %v539_v12, %v538_v10 }
 0x13a   : > { %v542_v18 = vadd.f32 %v541_v17, %v540_v13 }
 0x13b   : > { %v617_v34 = vpop.permute.xlu1 %616  ;;  %v650_v37 = vpop.permute.xlu0 %649 }
 0x13c   : > { %v544_v20 = vadd.f32 %v543_v19, %v542_v18 }
 0x13e   : > { %v546_v22 = vadd.f32 %v545_v21, %v544_v20 }
 0x13f   : > { %v645_v38 = vpop.permute.xlu1 %644  ;;  %v660_v39 = vpop.permute.xlu0 %659 }
 0x140   : > { %v547_v25 = vrot.slane %v546_v22, 4 }
 0x142   : > { %v548_v26 = vadd.f32 %v547_v25, %v546_v22 }
 0x143   : > { %v655_v40 = vpop.permute.xlu1 %654  ;;  %v670_v42 = vpop.permute.xlu0 %669 }
 0x144   : > { %v549_v27 = vrot.slane %v548_v26, 2 }
 0x146   : > { %v550_v30 = vadd.f32 %v549_v27, %v548_v26 }
 0x147   : > { %v665_v43 = vpop.permute.xlu1 %664 }
 0x148   : > { %v551_v31 = vrot.slane %v550_v30, 1 }
 0x14a   : > { %v552_v32 = vadd.f32 %v551_v31, %v550_v30 }
 0x14c   : > { %v553_v35 = vmul.f32 0.013888889, %v552_v32 }
 0x14e   : > { %v554_v36 = vadd.f32 1e-06, %v553_v35 }
 0x150   : > { %1209 = vrsqrt.f32 %v554_v36 }
 0x15d   : > { %v1210_v41 = vpop.eup %1209 }
 0x15e   : > { %v556_v44 = vmul.f32 %v1210_v41, %v512_v48  ;;  %v557_v45 = vmul.f32 %v1210_v41, %v513_v49  ;;  %v558_v46 = vmul.f32 %v1210_v41, %v514_v50  ;;  %v559_v47 = vmul.f32 %v1210_v41, %v515_v51  ;;  %v680_v49 = vpop.permute.xlu0 %679  ;;  %v675_v50 = vpop.permute.xlu1 %674 }
 0x15f   : > { %v560_v53 = vmul.f32 %v1210_v41, %v516_v52  ;;  %v561_v54 = vmul.f32 %v1210_v41, %v517_v56  ;;  %v562_v55 = vmul.f32 %v1210_v41, %v518_v61  ;;  %v563_v57 = vmul.f32 %v1210_v41, %v519_v3 }
 0x160   : > { %v564_v58 = vmul.f32 %v1210_v41, %v520_v7  ;;  %v619_v59 = vmul.f32 %v577_v0, %v556_v44  ;;  %v620_v60 = vmul.f32 %v582_v2, %v557_v45  ;;  %v621_v62 = vmul.f32 %v587_v15, %v558_v46 }
 0x161   : > { %v622_v63 = vmul.f32 %v592_v14, %v559_v47  ;;  %v623_v1 = vmul.f32 %v597_v24, %v560_v53  ;;  %v624_v4 = vmul.f32 %v602_v23, %v561_v54  ;;  %v625_v5 = vmul.f32 %v607_v29, %v562_v55 }
 0x162   : > { %v626_v6 = vmul.f32 %v612_v28, %v563_v57  ;;  %v627_v8 = vmul.f32 %v617_v34, %v564_v58  ;;  %v1557_v9 = vadd.f32 %v640_v33, %v619_v59  ;;  %v1559_v48 = vadd.f32 %v645_v38, %v620_v60 }
 0x163   : > { %v1561_v51 = vadd.f32 %v650_v37, %v621_v62  ;;  %v1563_v52 = vadd.f32 %v655_v40, %v622_v63  ;;  %v1565_v56 = vadd.f32 %v660_v39, %v623_v1  ;;  %v1567_v61 = vadd.f32 %v665_v43, %v624_v4 }
 0x164   : > { %v1569_v2 = vadd.f32 %v670_v42, %v625_v5  ;;  %v1571_v0 = vadd.f32 %v675_v50, %v626_v6  ;;  %v1573_v3 = vadd.f32 %v680_v49, %v627_v8  ;;  %v1576_v7 = vmul.f32 0.70710677, %v1557_v9 }
 0x165   : > { %v1579_v10 = vmul.f32 0.70710677, %v1559_v48  ;;  %v1582_v11 = vmul.f32 0.70710677, %v1561_v51  ;;  %v1585_v12 = vmul.f32 0.70710677, %v1563_v52 }
 0x166   : > { %v1588_v13 = vmul.f32 0.70710677, %v1565_v56  ;;  %v1591_v14 = vmul.f32 0.70710677, %v1567_v61  ;;  %v1594_v15 = vmul.f32 0.70710677, %v1569_v2 }
 0x167   : > { %v1597_v16 = vmul.f32 0.70710677, %v1571_v0  ;;  %v1600_v17 = vmul.f32 0.70710677, %v1573_v3  ;;  %v700_v18 = vand.u32 2147483647, %v1576_v7 }
 0x168   : > { %v701_v19 = vand.u32 2147483647, %v1579_v10  ;;  %v702_v20 = vand.u32 2147483647, %v1582_v11  ;;  %v703_v21 = vand.u32 2147483647, %v1585_v12 }
 0x169   : > { %v704_v22 = vand.u32 2147483647, %v1588_v13  ;;  %v705_v23 = vand.u32 2147483647, %v1591_v14  ;;  %v706_v24 = vand.u32 2147483647, %v1594_v15 }
 0x16a   : > { %v707_v25 = vand.u32 2147483647, %v1597_v16  ;;  %v708_v26 = vand.u32 2147483647, %v1600_v17  ;;  %v709_v27 = vmul.f32 0.3275911, %v700_v18 }
 0x16b   : > { %v710_v28 = vmul.f32 0.3275911, %v701_v19  ;;  %v711_v29 = vmul.f32 0.3275911, %v702_v20  ;;  %v712_v30 = vmul.f32 0.3275911, %v703_v21 }
 0x16c   : > { %v713_v31 = vmul.f32 0.3275911, %v704_v22  ;;  %v714_v32 = vmul.f32 0.3275911, %v705_v23  ;;  %v715_v33 = vmul.f32 0.3275911, %v706_v24 }
 0x16d   : > { %v716_v34 = vmul.f32 0.3275911, %v707_v25  ;;  %v718_v35 = vadd.f32 1.0, %v709_v27  ;;  %v719_v36 = vadd.f32 1.0, %v710_v28  ;;  %v717_v37 = vmul.f32 0.3275911, %v708_v26 }
 0x16e   : > { %v720_v38 = vadd.f32 1.0, %v711_v29  ;;  %v721_v39 = vadd.f32 1.0, %v712_v30  ;;  %v722_v40 = vadd.f32 1.0, %v713_v31  ;;  %v723_v41 = vadd.f32 1.0, %v714_v32 }
 0x16f   : > { %v724_v42 = vadd.f32 1.0, %v715_v33  ;;  %v725_v43 = vadd.f32 1.0, %v716_v34  ;;  %1211 = vrcp.f32 %v718_v35  ;;  %v826_v44 = vsub.f32 0.0, %v700_v18 }
 0x170   : > { %1213 = vrcp.f32 %v719_v36  ;;  %v827_v45 = vsub.f32 0.0, %v701_v19  ;;  %v828_v46 = vsub.f32 0.0, %v702_v20  ;;  %v829_v47 = vsub.f32 0.0, %v703_v21 }
 0x171   : > { %1215 = vrcp.f32 %v720_v38  ;;  %v830_v53 = vsub.f32 0.0, %v704_v22  ;;  %v831_v54 = vsub.f32 0.0, %v705_v23  ;;  %v726_v55 = vadd.f32 1.0, %v717_v37 }
 0x172   : > { %1217 = vrcp.f32 %v721_v39  ;;  %v832_v57 = vsub.f32 0.0, %v706_v24  ;;  %v833_v58 = vsub.f32 0.0, %v707_v25  ;;  %v835_v59 = vmul.f32 %v826_v44, %v700_v18 }
 0x173   : > { %1219 = vrcp.f32 %v722_v40  ;;  %v836_v60 = vmul.f32 %v827_v45, %v701_v19  ;;  %v837_v62 = vmul.f32 %v828_v46, %v702_v20  ;;  %v834_v63 = vsub.f32 0.0, %v708_v26 }
 0x174   : > { %1221 = vrcp.f32 %v723_v41  ;;  %v838_v1 = vmul.f32 %v829_v47, %v703_v21  ;;  %v839_v4 = vmul.f32 %v830_v53, %v704_v22  ;;  %v840_v5 = vmul.f32 %v831_v54, %v705_v23 }
 0x175   : > { %1223 = vrcp.f32 %v724_v42  ;;  %v841_v6 = vmul.f32 %v832_v57, %v706_v24  ;;  %v844_v8 = vmul.f32 1.442695, %v835_v59  ;;  %v846_v49 = vmul.f32 1.442695, %v836_v60 }
 0x176   : > { %1225 = vrcp.f32 %v725_v43  ;;  %v848_v50 = vmul.f32 1.442695, %v837_v62  ;;  %v850_v27 = vmul.f32 1.442695, %v838_v1  ;;  %v842_v28 = vmul.f32 %v833_v58, %v707_v25 }
 0x177   : > { %1227 = vrcp.f32 %v726_v55  ;;  %v843_v29 = vmul.f32 %v834_v63, %v708_v26  ;;  %v852_v30 = vmul.f32 1.442695, %v839_v4  ;;  %v854_v18 = vmul.f32 1.442695, %v840_v5 }
 0x178   : > { %1229 = vpow2.f32 %v844_v8  ;;  %v856_v19 = vmul.f32 1.442695, %v841_v6  ;;  %v858_v21 = vmul.f32 1.442695, %v842_v28  ;;  %v1614_v23 = vmul.f32 0.5, %v1557_v9 }
 0x179   : > { %1231 = vpow2.f32 %v846_v49  ;;  %v860_v22 = vmul.f32 1.442695, %v843_v29  ;;  %v1620_v26 = vmul.f32 0.5, %v1559_v48  ;;  %v1623_v31 = vmul.f32 0.5, %v1561_v51 }
 0x17a   : > { %1233 = vpow2.f32 %v848_v50  ;;  %v1629_v34 = vmul.f32 0.5, %v1563_v52  ;;  %v1632_v9 = vmul.f32 0.5, %v1565_v56  ;;  %v1638_v37 = vmul.f32 0.5, %v1567_v61 }
 0x17b   : > { %1235 = vpow2.f32 %v850_v27  ;;  %v1641_v51 = vmul.f32 0.5, %v1569_v2  ;;  %v1647_v56 = vmul.f32 0.5, %v1571_v0  ;;  %v1658_v46 = vmul.f32 0.5, %v1573_v3 }
 0x17c   : > { %v1611_v20 = vpop.eup %1211  ;;  %1237 = vpow2.f32 %v852_v30  ;;  %vm880_vm3 = vcmp.ge.f32.partialorder %v1576_v7, 0.0  ;;  %vm881_vm4 = vcmp.ge.f32.partialorder %v1579_v10, 0.0  ;;  %vm882_vm5 = vcmp.ge.f32.partialorder %v1582_v11, 0.0 }
 0x17d   : > { %v1616_v24 = vpop.eup %1213  ;;  %v745_v25 = vmul.f32 1.0614054, %v1611_v20  ;;  %1239 = vpow2.f32 %v854_v18  ;;  %vm883_vm6 = vcmp.ge.f32.partialorder %v1585_v12, 0.0  ;;  %vm884_vm7 = vcmp.ge.f32.partialorder %v1588_v13, 0.0 }
 0x17e   : > { %v1625_v32 = vpop.eup %1215  ;;  %v746_v33 = vmul.f32 1.0614054, %v1616_v24  ;;  %1241 = vpow2.f32 %v856_v19  ;;  %vm885_vm8 = vcmp.ge.f32.partialorder %v1591_v14, 0.0  ;;  %vm886_vm9 = vcmp.ge.f32.partialorder %v1594_v15, 0.0 }
 0x17f   : > { %v1634_v35 = vpop.eup %1217  ;;  %v747_v36 = vmul.f32 1.0614054, %v1625_v32  ;;  %v754_v48 = vadd.f32 -1.4531521, %v745_v25  ;;  %1243 = vpow2.f32 %v858_v21  ;;  %vm887_vm10 = vcmp.ge.f32.partialorder %v1597_v16, 0.0 }
 0x180   : > { %v1643_v38 = vpop.eup %1219  ;;  %v748_v39 = vmul.f32 1.0614054, %v1634_v35  ;;  %v755_v52 = vadd.f32 -1.4531521, %v746_v33  ;;  %1245 = vpow2.f32 %v860_v22  ;;  %vm888_vm11 = vcmp.ge.f32.partialorder %v1600_v17, 0.0 }
 0x181   : > { %v1649_v40 = vpop.eup %1221  ;;  %v749_v41 = vmul.f32 1.0614054, %v1643_v38  ;;  %v756_v42 = vadd.f32 -1.4531521, %v747_v36  ;;  %v763_v61 = vmul.f32 %v1611_v20, %v754_v48 }
 0x182   : > { %v1653_v43 = vpop.eup %1223  ;;  %v750_v2 = vmul.f32 1.0614054, %v1649_v40  ;;  %v757_v44 = vadd.f32 -1.4531521, %v748_v39  ;;  %v764_v45 = vmul.f32 %v1616_v24, %v755_v52 }
 0x183   : > { %v1660_v0 = vpop.eup %1225  ;;  %v751_v47 = vmul.f32 1.0614054, %v1653_v43  ;;  %v758_v53 = vadd.f32 -1.4531521, %v749_v41  ;;  %v765_v54 = vmul.f32 %v1625_v32, %v756_v42  ;;  %v772_v55 = vadd.f32 1.4214138, %v763_v61 }
 0x184   : > { %v1664_v57 = vpop.eup %1227  ;;  %v752_v58 = vmul.f32 1.0614054, %v1660_v0  ;;  %v759_v59 = vadd.f32 -1.4531521, %v750_v2  ;;  %v766_v60 = vmul.f32 %v1634_v35, %v757_v44  ;;  %v773_v62 = vadd.f32 1.4214138, %v764_v45 }
 0x185   : > { %v1668_v63 = vpop.eup %1229  ;;  %v753_v3 = vmul.f32 1.0614054, %v1664_v57  ;;  %v760_v1 = vadd.f32 -1.4531521, %v751_v47  ;;  %v767_v4 = vmul.f32 %v1643_v38, %v758_v53  ;;  %v774_v5 = vadd.f32 1.4214138, %v765_v54 }
 0x186   : > { %v1672_v6 = vpop.eup %1231  ;;  %v761_v8 = vadd.f32 -1.4531521, %v752_v58  ;;  %v768_v49 = vmul.f32 %v1649_v40, %v759_v59  ;;  %v775_v50 = vadd.f32 1.4214138, %v766_v60  ;;  %v781_v27 = vmul.f32 %v1611_v20, %v772_v55 }
 0x187   : > { %v1676_v28 = vpop.eup %1233  ;;  %v762_v29 = vadd.f32 -1.4531521, %v753_v3  ;;  %v769_v30 = vmul.f32 %v1653_v43, %v760_v1  ;;  %v776_v18 = vadd.f32 1.4214138, %v767_v4  ;;  %v782_v19 = vmul.f32 %v1616_v24, %v773_v62 }
 0x188   : > { %v1680_v21 = vpop.eup %1235  ;;  %v770_v22 = vmul.f32 %v1660_v0, %v761_v8  ;;  %v777_v25 = vadd.f32 1.4214138, %v768_v49  ;;  %v783_v33 = vmul.f32 %v1625_v32, %v774_v5  ;;  %v784_v36 = vmul.f32 %v1634_v35, %v775_v50 }
 0x189   : > { %v1685_v48 = vpop.eup %1237  ;;  %v771_v39 = vmul.f32 %v1664_v57, %v762_v29  ;;  %v778_v52 = vadd.f32 1.4214138, %v769_v30  ;;  %v785_v41 = vmul.f32 %v1643_v38, %v776_v18  ;;  %v790_v42 = vadd.f32 -0.28449672, %v781_v27 }
 0x18a   : > { %v1240_v61 = vpop.eup %1239  ;;  %v779_v2 = vadd.f32 1.4214138, %v770_v22  ;;  %v786_v44 = vmul.f32 %v1649_v40, %v777_v25  ;;  %v791_v45 = vadd.f32 -0.28449672, %v782_v19  ;;  %v792_v47 = vadd.f32 -0.28449672, %v783_v33 }
 0x18b   : > { %v1242_v53 = vpop.eup %1241  ;;  %v780_v54 = vadd.f32 1.4214138, %v771_v39  ;;  %v787_v55 = vmul.f32 %v1653_v43, %v778_v52  ;;  %v793_v58 = vadd.f32 -0.28449672, %v784_v36  ;;  %v794_v59 = vadd.f32 -0.28449672, %v785_v41 }
 0x18c   : > { %v788_v60 = vmul.f32 %v1660_v0, %v779_v2  ;;  %v795_v62 = vadd.f32 -0.28449672, %v786_v44  ;;  %v799_v3 = vmul.f32 %v1611_v20, %v790_v42  ;;  %v800_v1 = vmul.f32 %v1616_v24, %v791_v45  ;;  %v1244_v4 = vpop.eup %1243 }
 0x18d   : > { %v789_v5 = vmul.f32 %v1664_v57, %v780_v54  ;;  %v796_v8 = vadd.f32 -0.28449672, %v787_v55  ;;  %v801_v49 = vmul.f32 %v1625_v32, %v792_v47  ;;  %v802_v50 = vmul.f32 %v1634_v35, %v793_v58  ;;  %v1246_v27 = vpop.eup %1245 }
 0x18e   : > { %v797_v29 = vadd.f32 -0.28449672, %v788_v60  ;;  %v803_v30 = vmul.f32 %v1643_v38, %v794_v59  ;;  %v804_v18 = vmul.f32 %v1649_v40, %v795_v62  ;;  %v808_v19 = vadd.f32 0.2548296, %v799_v3 }
 0x18f   : > { %v798_v22 = vadd.f32 -0.28449672, %v789_v5  ;;  %v805_v25 = vmul.f32 %v1653_v43, %v796_v8  ;;  %v809_v33 = vadd.f32 0.2548296, %v800_v1  ;;  %v810_v36 = vadd.f32 0.2548296, %v801_v49 }
 0x190   : > { %v806_v39 = vmul.f32 %v1660_v0, %v797_v29  ;;  %v811_v52 = vadd.f32 0.2548296, %v802_v50  ;;  %v812_v41 = vadd.f32 0.2548296, %v803_v30  ;;  %v813_v42 = vadd.f32 0.2548296, %v804_v18 }
 0x191   : > { %v807_v2 = vmul.f32 %v1664_v57, %v798_v22  ;;  %v814_v44 = vadd.f32 0.2548296, %v805_v25  ;;  %v817_v45 = vmul.f32 %v1611_v20, %v808_v19  ;;  %v818_v47 = vmul.f32 %v1616_v24, %v809_v33 }
 0x192   : > { %v815_v54 = vadd.f32 0.2548296, %v806_v39  ;;  %v819_v55 = vmul.f32 %v1625_v32, %v810_v36  ;;  %v820_v58 = vmul.f32 %v1634_v35, %v811_v52  ;;  %v821_v59 = vmul.f32 %v1643_v38, %v812_v41 }
 0x193   : > { %v816_v60 = vadd.f32 0.2548296, %v807_v2  ;;  %v822_v20 = vmul.f32 %v1649_v40, %v813_v42  ;;  %v823_v24 = vmul.f32 %v1653_v43, %v814_v44  ;;  %v862_v62 = vmul.f32 %v1668_v63, %v817_v45 }
 0x194   : > { %v824_v32 = vmul.f32 %v1660_v0, %v815_v54  ;;  %v863_v35 = vmul.f32 %v1672_v6, %v818_v47  ;;  %v864_v38 = vmul.f32 %v1676_v28, %v819_v55  ;;  %v865_v40 = vmul.f32 %v1680_v21, %v820_v58 }
 0x195   : > { %v825_v43 = vmul.f32 %v1664_v57, %v816_v60  ;;  %v866_v63 = vmul.f32 %v1685_v48, %v821_v59  ;;  %v867_v3 = vmul.f32 %v1240_v61, %v822_v20  ;;  %v868_v1 = vmul.f32 %v1242_v53, %v823_v24 }
 0x196   : > { %v869_v5 = vmul.f32 %v1244_v4, %v824_v32  ;;  %v871_v8 = vsub.f32 1.0, %v862_v62  ;;  %v872_v49 = vsub.f32 1.0, %v863_v35  ;;  %v873_v50 = vsub.f32 1.0, %v864_v38 }
 0x197   : > { %v870_v0 = vmul.f32 %v1246_v27, %v825_v43  ;;  %v874_v29 = vsub.f32 1.0, %v865_v40  ;;  %v875_v6 = vsub.f32 1.0, %v866_v63  ;;  %v876_v30 = vsub.f32 1.0, %v867_v3 }
 0x198   : > { %v877_v28 = vsub.f32 1.0, %v868_v1  ;;  %v878_v18 = vsub.f32 1.0, %v869_v5  ;;  %v889_v21 = vsub.f32 0.0, %v871_v8  ;;  %v890_v19 = vsub.f32 0.0, %v872_v49 }
 0x199   : > { %v879_v22 = vsub.f32 1.0, %v870_v0  ;;  %v891_v25 = vsub.f32 0.0, %v873_v50  ;;  %v892_v57 = vsub.f32 0.0, %v874_v29  ;;  %v893_v33 = vsub.f32 0.0, %v875_v6 }
 0x19a   : > { %v894_v48 = vsub.f32 0.0, %v876_v30  ;;  %v895_v61 = vsub.f32 0.0, %v877_v28  ;;  %v896_v53 = vsub.f32 0.0, %v878_v18  ;;  %v898_v4 = vsel %vm880_vm3, %v871_v8, %v889_v21 }
 0x19b   : > { %v897_v36 = vsub.f32 0.0, %v879_v22  ;;  %v899_v27 = vsel %vm881_vm4, %v872_v49, %v890_v19  ;;  %v900_v39 = vsel %vm882_vm5, %v873_v50, %v891_v25  ;;  %v901_v52 = vsel %vm883_vm6, %v874_v29, %v892_v57 }
 0x19c   : > { %v902_v41 = vsel %vm884_vm7, %v875_v6, %v893_v33  ;;  %v903_v42 = vsel %vm885_vm8, %v876_v30, %v894_v48  ;;  %v904_v7 = vsel %vm886_vm9, %v877_v28, %v895_v61  ;;  %v905_v2 = vsel %vm887_vm10, %v878_v18, %v896_v53 }
 0x19d   : > { %v906_v10 = vsel %vm888_vm11, %v879_v22, %v897_v36  ;;  %v916_v11 = vadd.f32 1.0, %v898_v4  ;;  %v917_v44 = vadd.f32 1.0, %v899_v27  ;;  %v918_v45 = vadd.f32 1.0, %v900_v39 }
 0x19e   : > { %v919_v12 = vadd.f32 1.0, %v901_v52  ;;  %v920_v13 = vadd.f32 1.0, %v902_v41  ;;  %v921_v14 = vadd.f32 1.0, %v903_v42  ;;  %v922_v47 = vadd.f32 1.0, %v904_v7 }
 0x19f   : > { %v923_v54 = vadd.f32 1.0, %v905_v2  ;;  %v924_v15 = vadd.f32 1.0, %v906_v10  ;;  %v925_v55 = vmul.f32 %v916_v11, %v1614_v23  ;;  %v926_v16 = vmul.f32 %v917_v44, %v1620_v26 }
 0x1a0   : > { %v927_v17 = vmul.f32 %v918_v45, %v1623_v31  ;;  %v928_v58 = vmul.f32 %v919_v12, %v1629_v34  ;;  %v929_v59 = vmul.f32 %v920_v13, %v1632_v9  ;;  %v930_v60 = vmul.f32 %v921_v14, %v1638_v37 }
 0x1a1   : > { %v931_v20 = vmul.f32 %v922_v47, %v1641_v51  ;;  %v932_v24 = vmul.f32 %v923_v54, %v1647_v56  ;;  %v933_v62 = vmul.f32 %v924_v15, %v1658_v46  ;;  %934 = vst.msk [vmem:[%s270_s29] sm:$0xff] %vm486_vm2, %v925_v55  ;;  %935 = vst.msk [vmem:[%s270_s29 + $0x8] sm:$0xff] %vm486_vm2, %v926_v16 }
 0x1a2   : > { %936 = vst.msk [vmem:[%s270_s29 + $0x10] sm:$0xff] %vm486_vm2, %v927_v17  ;;  %937 = vst.msk [vmem:[%s270_s29 + $0x18] sm:$0xff] %vm486_vm2, %v928_v58 }
 0x1a3   : > { %938 = vst.msk [vmem:[%s270_s29 + $0x20] sm:$0xff] %vm486_vm2, %v929_v59  ;;  %939 = vst.msk [vmem:[%s270_s29 + $0x28] sm:$0xff] %vm486_vm2, %v930_v60 }
 0x1a4   : > { %940 = vst.msk [vmem:[%s270_s29 + $0x30] sm:$0xff] %vm486_vm2, %v931_v20  ;;  %941 = vst.msk [vmem:[%s270_s29 + $0x38] sm:$0xff] %vm486_vm2, %v932_v24 }
 0x1a5   : > { %942 = vst.msk [vmem:[%s270_s29 + $0x40] sm:$0xff] %vm486_vm2, %v933_v62 }
 0x1a6 PF: > { %s16_s20 = sadd.s32 1, %s1299_s20   ;;  %s1782_s18 = smov %s1295_s19 }
 0x1a7   : > { %p13_p2 = scmp.ge.s32.totalorder %s16_s20, 4   ;;  %s1783_s19 = smov %s1785_s22 }
 0x1a9   :  { %15 = sbr.rel (!%p13_p2) target bundleno = 2 (0x2), region = 75 }
 0x1ae   :  { %970 = vsyncpa [#allocation3], 1 }
 0x1af   :  { %972 = vsyncpa [#allocation3 + $0x1], 1 }

// kernel: decoder_forward.13
= control target key start
LH: loop header
LB: loop body
LE: loop exit
PB: predicated region body
PF: predicated region fallthrough
CT: control target
= control target key end

     0   :  { %11 = vsyncpa [#allocation3], 0  ;;  %s960_s21 = smov 0   ;;  %s962_s22 = smov 0   ;;  %s1141_s0 = inlined_call_operand.vmem [shape: f32[2,72,64], index: 0, kind: input, shape index: {}]   ;;  %s1142_s1 = inlined_call_operand.vmem [shape: f32[2,72,64], index: 1, kind: input, shape index: {}]   ;;  %s1143_s2 = inlined_call_operand.hbm [shape: f32[40,72], index: 2, kind: input, shape index: {}]   ;;  %s1144_s3 = inlined_call_operand.vmem [shape: f32[40,1], index: 3, kind: input, shape index: {}]   ;;  %s1145_s4 = inlined_call_operand.vmem [shape: f32[40,1], index: 4, kind: input, shape index: {}]   ;;  %s1146_s5 = inlined_call_operand.vmem [shape: f32[40,1], index: 5, kind: input, shape index: {}]   ;;  %s1147_s6 = inlined_call_operand.vmem [shape: f32[2,40,64], index: 6, kind: output, shape index: {}]  }
   0x1   :  { %s964_s23 = smov 0  }
   0x2 LB: > { %s737_s24 = sadd.s32 4294967295, %s917_s23   ;;  %s29_s25 = sadd.s32 1, %s913_s22  ;;  %s917_s23 = sphi %s964_s23, %s17_s23   ;;  %s913_s22 = sphi %s962_s22, %s1151_s22   ;;  %s909_s21 = sphi %s960_s21, %s1150_s21  }
   0x3   : > { %p31_p0 = scmp.ge.s32.totalorder %s29_s25, 2  ;;  %p739_p1 = scmp.ge.s32.totalorder %s917_s23, 1 }
   0x4   : > { %p202_p2 = scmp.lt.s32.totalorder %s917_s23, 3  ;;  %p985_p4 = scmp.eq.s32.totalorder %s737_s24, 0 }
   0x5   : > { %s1153_s25 = smov (%p31_p0, %s29_s25), 0  ;;  %s919_s28 = smov [#allocation2]  }
   0x6   : > { %p981_p3 = pnand %p739_p1, %p202_p2  ;;  %s214_s29 = sshll.u32 %s919_s28, 4  ;;  %s215_s29 = int_to_ptr.vmem [resolvable:$true] %s214_s29 }
   0x7   : > { %s876_s30 = scalar_lea.vmem %s215_s29, 640  ;;  %p884_p11 = scmp.lt.s32.totalorder %s215_s29, %s215_s29 }
   0x8   : > { %p825_p5 = pneg %p981_p3  ;;  %p877_p8 = scmp.ne.s32.totalorder %s215_s29, %s876_s30 }
   0x9   : > { %p885_p12 = scmp.lt.s32.totalorder %s876_s30, %s876_s30 }
   0xa   : > { %p826_p6 = pnand %p985_p4, %p825_p5 }
   0xb   : > { %p886_p13 = por %p885_p12, %p884_p11 }
   0xc   : > { %p867_p7 = pneg %p826_p6 }
   0xe   : > { %p879_p9 = pnand %p877_p8, %p867_p7 }
  0x10   : > { %p880_p10 = pneg %p879_p9 }
  0x12   : > { %p887_p0 = pnand %p886_p13, %p880_p10 }
  0x14   : > { %890 = shalt.err (!%p887_p0)
}
  0x15   : > { %s920_s7 = smov 128   ;;  %s921_s8 = smov 8  }
  0x16   : > { %828 = dma.hbm_to_vmem [thread:$0]  (!%p826_p6), %s1143_s2, 640, %s215_s29, [#allocation3], %s920_s7, %s920_s7, %s921_s8  }
  0x17   : > { %261 = sbr.rel (%p981_p3) target bundleno = 332 (0x14c), region = 44 }
  0x1c   : > { %904 = dma.done.wait (%p985_p4), [#allocation3], 640  }
  0x1d   : > { %906 = vsyncadd (%p985_p4), [#allocation3], 4294966656  ;;  %p305_p1 = scmp.lt.s32.totalorder %s909_s21, 1  ;;  %v922_v0 = vmov 0.0   ;;  %vm923_vm0 = vmmov 0   ;;  %v924_v1 = vmov 0  }
  0x1e   : > { %768 = vmatprep.subr.mxu0 %v922_v0  ;;  %801 = vmatprep.subr.mxu1 %v922_v0  ;;  %v356_v29 = vld [vmem:[#allocation2] sm:$0xff]  ;;  %vm391_vm1 = vcmask 588800   ;;  %v359_v30 = vld [vmem:[#allocation2 + $0x18] sm:$0xff]  ;;  %v363_v32 = vld [vmem:[%s1144_s3 + $0x10] sm:$0xff]  ;;  %vm497_vm2 = vcmask 523264  }
  0x1f   : > { %s1155_s21 = smov (!%p305_p1, %s909_s21), 1  ;;  %786 = vmatprep.mubr.msk.f32.mxu0 %vm923_vm0, %v922_v0  ;;  %795 = vmatprep.mubr.msk.f32.mxu1 %vm923_vm0, %v922_v0  ;;  %v361_v31 = vld [vmem:[%s1144_s3] sm:$0xff]  ;;  %v357_v33 = vld [vmem:[#allocation2 + $0x8] sm:$0xff]  ;;  %v364_v36 = vld [vmem:[%s1144_s3 + $0x18] sm:$0xff] }
  0x20   : > { %861 = vset.pattern.permute.xlu0 %v924_v1  ;;  %862 = vset.pattern.permute.xlu1 %v924_v1  ;;  %s819_s11 = smul.u32 72, %s1155_s21  ;;  %v360_v34 = vld [vmem:[#allocation2 + $0x20] sm:$0xff]  ;;  %v362_v35 = vld [vmem:[%s1144_s3 + $0x8] sm:$0xff]  ;;  %v358_v37 = vld [vmem:[#allocation2 + $0x10] sm:$0xff] }
  0x21   : > { %368 = vperm.xlu0 %861, %v361_v31   ;;  %378 = vperm.xlu1 %862, %v363_v32   ;;  %v365_v38 = vld [vmem:[%s1144_s3 + $0x20] sm:$0xff]  ;;  %v549_v40 = vld [vmem:[%s1145_s4 + $0x8] sm:$0xff]  ;;  %v550_v41 = vld [vmem:[%s1145_s4 + $0x10] sm:$0xff]  ;;  %s820_s8 = smul.u32 40, %s1155_s21 }
  0x22   : > { %s1016_s14 = scalar_lea.vmem %s1141_s0, %s819_s11  ;;  %s1021_s17 = scalar_lea.vmem %s1142_s1, %s819_s11  ;;  %v548_v39 = vld [vmem:[%s1145_s4] sm:$0xff]  ;;  %v551_v42 = vld [vmem:[%s1145_s4 + $0x18] sm:$0xff]  ;;  %v584_v45 = vld [vmem:[%s1146_s5 + $0x8] sm:$0xff] }
  0x23   : > { %v337_v2 = vld [vmem:[%s1016_s14 + $0x40] sm:$0xff]  ;;  %v336_v4 = vld [vmem:[%s1016_s14 + $0x38] sm:$0xff]  ;;  %v335_v7 = vld [vmem:[%s1016_s14 + $0x30] sm:$0xff]  ;;  %s328_s11 = scalar_lea.vmem %s1147_s6, %s820_s8 }
  0x24   : > { %v346_v3 = vld [vmem:[%s1021_s17 + $0x40] sm:$0xff]  ;;  %v345_v6 = vld [vmem:[%s1021_s17 + $0x38] sm:$0xff]  ;;  %v344_v8 = vld [vmem:[%s1021_s17 + $0x30] sm:$0xff] }
  0x25   : > { %v355_v5 = vmul.f32 %v346_v3, %v337_v2  ;;  %v354_v9 = vmul.f32 %v345_v6, %v336_v4  ;;  %v334_v10 = vld [vmem:[%s1016_s14 + $0x28] sm:$0xff]  ;;  %v353_v12 = vmul.f32 %v344_v8, %v335_v7  ;;  %v333_v13 = vld [vmem:[%s1016_s14 + $0x20] sm:$0xff]  ;;  %v332_v16 = vld [vmem:[%s1016_s14 + $0x18] sm:$0xff]  ;;  %373 = vperm.xlu0 %861, %v362_v35   ;;  %383 = vperm.xlu1 %862, %v364_v36  }
  0x26   : > { %v343_v11 = vld [vmem:[%s1021_s17 + $0x28] sm:$0xff]  ;;  %v342_v14 = vld [vmem:[%s1021_s17 + $0x20] sm:$0xff]  ;;  %v341_v17 = vld [vmem:[%s1021_s17 + $0x18] sm:$0xff] }
  0x27   : > { %769 = vmatpush3.msra.mxu0 %v355_v5  ;;  %810 = vmatpush3.msra.mxu1 %v355_v5  ;;  %v352_v15 = vmul.f32 %v343_v11, %v334_v10  ;;  %v351_v18 = vmul.f32 %v342_v14, %v333_v13  ;;  %v331_v19 = vld [vmem:[%s1016_s14 + $0x10] sm:$0xff]  ;;  %v350_v21 = vmul.f32 %v341_v17, %v332_v16  ;;  %v330_v22 = vld [vmem:[%s1016_s14 + $0x8] sm:$0xff]  ;;  %v329_v25 = vld [vmem:[%s1016_s14] sm:$0xff] }
  0x28   : > { %770 = vmatprep.subr.mxu0 %v922_v0  ;;  %802 = vmatprep.subr.mxu1 %v922_v0  ;;  %v340_v20 = vld [vmem:[%s1021_s17 + $0x10] sm:$0xff]  ;;  %v339_v23 = vld [vmem:[%s1021_s17 + $0x8] sm:$0xff]  ;;  %v338_v26 = vld [vmem:[%s1021_s17] sm:$0xff] }
  0x29   : > { %771 = vmatpush3.msra.mxu0 %v354_v9  ;;  %811 = vmatpush3.msra.mxu1 %v354_v9  ;;  %v349_v24 = vmul.f32 %v340_v20, %v331_v19  ;;  %v348_v27 = vmul.f32 %v339_v23, %v330_v22  ;;  %v347_v28 = vmul.f32 %v338_v26, %v329_v25  ;;  %v552_v43 = vld [vmem:[%s1145_s4 + $0x20] sm:$0xff]  ;;  %v585_v46 = vld [vmem:[%s1146_s5 + $0x10] sm:$0xff]  ;;  %v586_v47 = vld [vmem:[%s1146_s5 + $0x18] sm:$0xff] }
  0x2a   : > { %772 = vmatprep.subr.mxu0 %v922_v0  ;;  %803 = vmatprep.subr.mxu1 %v922_v0  ;;  %v583_v44 = vld [vmem:[%s1146_s5] sm:$0xff] }
  0x2b   : > { %773 = vmatpush3.msra.mxu0 %v353_v12  ;;  %812 = vmatpush3.msra.mxu1 %v353_v12  ;;  %v587_v48 = vld [vmem:[%s1146_s5 + $0x20] sm:$0xff] }
  0x2c   : > { %774 = vmatprep.subr.mxu0 %v922_v0  ;;  %804 = vmatprep.subr.mxu1 %v922_v0 }
  0x2d   : > { %775 = vmatpush3.msra.mxu0 %v352_v15  ;;  %813 = vmatpush3.msra.mxu1 %v352_v15 }
  0x2e   : > { %776 = vmatprep.subr.mxu0 %v922_v0  ;;  %805 = vmatprep.subr.mxu1 %v922_v0 }
  0x2f   : > { %777 = vmatpush3.msra.mxu0 %v351_v18  ;;  %814 = vmatpush3.msra.mxu1 %v351_v18 }
  0x30   : > { %778 = vmatprep.subr.mxu0 %v922_v0  ;;  %806 = vmatprep.subr.mxu1 %v922_v0 }
  0x31   : > { %779 = vmatpush3.msra.mxu0 %v350_v21  ;;  %815 = vmatpush3.msra.mxu1 %v350_v21 }
  0x32   : > { %780 = vmatprep.subr.mxu0 %v922_v0  ;;  %807 = vmatprep.subr.mxu1 %v922_v0 }
  0x33   : > { %781 = vmatpush3.msra.mxu0 %v349_v24  ;;  %816 = vmatpush3.msra.mxu1 %v349_v24 }
  0x34   : > { %782 = vmatprep.subr.mxu0 %v922_v0  ;;  %808 = vmatprep.subr.mxu1 %v922_v0 }
  0x35   : > { %783 = vmatpush3.msra.mxu0 %v348_v27  ;;  %817 = vmatpush3.msra.mxu1 %v348_v27 }
  0x36   : > { %784 = vmatprep.subr.mxu0 %v922_v0  ;;  %809 = vmatprep.subr.mxu1 %v922_v0 }
  0x37   : > { %785 = vmatpush3.msra.mxu0 %v347_v28  ;;  %818 = vmatpush3.msra.mxu1 %v347_v28 }
  0x38   : > { %787 = vmatmul.mubr.msk.f32.vlgmr.msra.gmra.mxu0 %vm391_vm1, %v356_v29  ;;  %796 = vmatmul.mubr.msk.f32.vlgmr.msra.gmra.mxu1 %vm391_vm1, %v359_v30 }
  0x39   : > { %789 = vmatprep.mubr.msk.f32.mxu0 %vm923_vm0, %v922_v0  ;;  %798 = vmatprep.mubr.msk.f32.mxu1 %vm923_vm0, %v922_v0 }
  0x3a   : > { %388 = vperm.xlu0 %861, %v365_v38   ;;  %555 = vperm.xlu1 %862, %v548_v39  }
  0x3c   : > { %790 = vmatmul.mubr.msk.f32.gmra.mxu0 %vm391_vm1, %v357_v33  ;;  %799 = vmatmul.mubr.msk.f32.gmra.mxu1 %vm391_vm1, %v360_v34 }
  0x3d   : > { %792 = vmatprep.mubr.msk.f32.mxu0 %vm923_vm0, %v922_v0 }
  0x3e   : > { %560 = vperm.xlu0 %861, %v549_v40   ;;  %565 = vperm.xlu1 %862, %v550_v41  }
  0x40   : > { %793 = vmatmul.mubr.msk.f32.gmra.mxu0 %vm391_vm1, %v358_v37 }
  0x42   : > { %570 = vperm.xlu0 %861, %v551_v42   ;;  %575 = vperm.xlu1 %862, %v552_v43  }
  0x46   : > { %590 = vperm.xlu0 %861, %v583_v44   ;;  %595 = vperm.xlu1 %862, %v584_v45  }
  0x4a   : > { %600 = vperm.xlu0 %861, %v585_v46   ;;  %605 = vperm.xlu1 %862, %v586_v47  }
  0x4e   : > { %610 = vperm.xlu0 %861, %v587_v48  }
  0x9c   : > { %v369_v49 = vpop.permute.xlu0 %368  ;;  %v379_v52 = vpop.permute.xlu1 %378 }
  0xa0   : > { %v374_v55 = vpop.permute.xlu0 %373  ;;  %v384_v63 = vpop.permute.xlu1 %383 }
  0xb5   : > { %v389_v4 = vpop.permute.xlu0 %388  ;;  %v556_v45 = vpop.permute.xlu1 %555 }
  0xb9   : > { %v561_v46 = vpop.permute.xlu0 %560 }
  0xf8   : > { %v473_v50 = vpop.f32.mrf.mxu0  ;;  %v488_v51 = vpop.f32.mrf.mxu1 }
  0xf9   : > { %v474_v58 = vadd.f32 %v473_v50, %v369_v49  ;;  %v489_v2 = vadd.f32 %v488_v51, %v384_v63  ;;  %v566_v50 = vpop.permute.xlu1 %565  ;;  %v571_v51 = vpop.permute.xlu0 %570 }
  0xfa   : > { %v788_v53 = vpop.f32.mrf.mxu0  ;;  %v797_v54 = vpop.f32.mrf.mxu1 }
  0xfb   : > { %v498_v1 = vsel %vm497_vm2, %v474_v58, 0.0  ;;  %v503_v10 = vsel %vm497_vm2, %v489_v2, 0.0 }
  0xfc   : > { %v478_v56 = vpop.f32.mrf.mxu0  ;;  %v493_v57 = vpop.f32.mrf.mxu1 }
  0xfd   : > { %v479_v59 = vadd.f32 %v478_v56, %v374_v55  ;;  %v494_v7 = vadd.f32 %v493_v57, %v389_v4  ;;  %v591_v53 = vpop.permute.xlu0 %590 }
  0xfe   : > { %v791_v60 = vpop.f32.mrf.mxu0  ;;  %v800_v61 = vpop.f32.mrf.mxu1 }
  0xff   : > { %v499_v62 = vsel %vm497_vm2, %v479_v59, 0.0  ;;  %v505_v12 = vsel %vm497_vm2, %v494_v7, 0.0 }
 0x100   : > { %v483_v0 = vpop.f32.mrf.mxu0  ;;  %v500_v5 = vadd.f32 %v499_v62, %v498_v1 }
 0x101   : > { %v484_v3 = vadd.f32 %v483_v0, %v379_v52  ;;  %v576_v52 = vpop.permute.xlu1 %575  ;;  %v601_v55 = vpop.permute.xlu0 %600 }
 0x102   : > { %v794_v6 = vpop.f32.mrf.mxu0 }
 0x103   : > { %v501_v8 = vsel %vm497_vm2, %v484_v3, 0.0 }
 0x104   : > { %v502_v9 = vadd.f32 %v501_v8, %v500_v5 }
 0x105   : > { %v596_v54 = vpop.permute.xlu1 %595  ;;  %v611_v4 = vpop.permute.xlu0 %610 }
 0x106   : > { %v504_v11 = vadd.f32 %v503_v10, %v502_v9 }
 0x108   : > { %v506_v13 = vadd.f32 %v505_v12, %v504_v11 }
 0x10a   : > { %v507_v14 = vrot.slane %v506_v13, 4 }
 0x10c   : > { %v508_v15 = vadd.f32 %v507_v14, %v506_v13 }
 0x10e   : > { %v509_v16 = vrot.slane %v508_v15, 2 }
 0x110   : > { %v510_v17 = vadd.f32 %v509_v16, %v508_v15 }
 0x112   : > { %v511_v18 = vrot.slane %v510_v17, 1 }
 0x114   : > { %v512_v19 = vadd.f32 %v511_v18, %v510_v17 }
 0x116   : > { %v514_v20 = vmul.f32 0.025, %v512_v19 }
 0x118   : > { %v515_v21 = vsub.f32 %v474_v58, %v514_v20  ;;  %v516_v22 = vsub.f32 %v479_v59, %v514_v20  ;;  %v517_v23 = vsub.f32 %v484_v3, %v514_v20  ;;  %v518_v24 = vsub.f32 %v489_v2, %v514_v20  ;;  %v606_v2 = vpop.permute.xlu1 %605 }
 0x119   : > { %v519_v25 = vsub.f32 %v494_v7, %v514_v20 }
 0x11a   : > { %v520_v26 = vmul.f32 %v515_v21, %v515_v21  ;;  %v521_v27 = vmul.f32 %v516_v22, %v516_v22  ;;  %v522_v28 = vmul.f32 %v517_v23, %v517_v23  ;;  %v523_v29 = vmul.f32 %v518_v24, %v518_v24 }
 0x11b   : > { %v524_v33 = vmul.f32 %v519_v25, %v519_v25 }
 0x11c   : > { %v525_v30 = vsel %vm497_vm2, %v520_v26, 0.0  ;;  %v526_v31 = vsel %vm497_vm2, %v521_v27, 0.0  ;;  %v528_v34 = vsel %vm497_vm2, %v522_v28, 0.0  ;;  %v530_v36 = vsel %vm497_vm2, %v523_v29, 0.0 }
 0x11d   : > { %v527_v32 = vadd.f32 %v526_v31, %v525_v30  ;;  %v532_v38 = vsel %vm497_vm2, %v524_v33, 0.0 }
 0x11f   : > { %v529_v35 = vadd.f32 %v528_v34, %v527_v32 }
 0x121   : > { %v531_v37 = vadd.f32 %v530_v36, %v529_v35 }
 0x123   : > { %v533_v39 = vadd.f32 %v532_v38, %v531_v37 }
 0x125   : > { %v534_v40 = vrot.slane %v533_v39, 4 }
 0x127   : > { %v535_v41 = vadd.f32 %v534_v40, %v533_v39 }
 0x129   : > { %v536_v42 = vrot.slane %v535_v41, 2 }
 0x12b   : > { %v537_v43 = vadd.f32 %v536_v42, %v535_v41 }
 0x12d   : > { %v538_v44 = vrot.slane %v537_v43, 1 }
 0x12f   : > { %v539_v47 = vadd.f32 %v538_v44, %v537_v43 }
 0x131   : > { %v540_v48 = vmul.f32 0.025, %v539_v47 }
 0x133   : > { %v541_v49 = vadd.f32 1e-06, %v540_v48 }
 0x135   : > { %863 = vrsqrt.f32 %v541_v49 }
 0x142   : > { %v864_v56 = vpop.eup %863 }
 0x143   : > { %v543_v57 = vmul.f32 %v864_v56, %v515_v21  ;;  %v544_v58 = vmul.f32 %v864_v56, %v516_v22  ;;  %v545_v59 = vmul.f32 %v864_v56, %v517_v23  ;;  %v546_v60 = vmul.f32 %v864_v56, %v518_v24 }
 0x144   : > { %v547_v61 = vmul.f32 %v864_v56, %v519_v25 }
 0x145   : > { %v578_v62 = vmul.f32 %v556_v45, %v543_v57  ;;  %v579_v63 = vmul.f32 %v561_v46, %v544_v58  ;;  %v580_v0 = vmul.f32 %v566_v50, %v545_v59  ;;  %v581_v1 = vmul.f32 %v571_v51, %v546_v60 }
 0x146   : > { %v582_v3 = vmul.f32 %v576_v52, %v547_v61 }
 0x147   : > { %v613_v5 = vadd.f32 %v591_v53, %v578_v62  ;;  %v614_v6 = vadd.f32 %v596_v54, %v579_v63  ;;  %v615_v7 = vadd.f32 %v601_v55, %v580_v0  ;;  %v616_v8 = vadd.f32 %v606_v2, %v581_v1 }
 0x148   : > { %v617_v9 = vadd.f32 %v611_v4, %v582_v3 }
 0x149   : > { %618 = vst.msk [vmem:[%s328_s11] sm:$0xff] %vm497_vm2, %v613_v5  ;;  %619 = vst.msk [vmem:[%s328_s11 + $0x8] sm:$0xff] %vm497_vm2, %v614_v6 }
 0x14a   : > { %620 = vst.msk [vmem:[%s328_s11 + $0x10] sm:$0xff] %vm497_vm2, %v615_v7  ;;  %621 = vst.msk [vmem:[%s328_s11 + $0x18] sm:$0xff] %vm497_vm2, %v616_v8 }
 0x14b   : > { %622 = vst.msk [vmem:[%s328_s11 + $0x20] sm:$0xff] %vm497_vm2, %v617_v9 }
 0x14c PF: > { %s17_s23 = sadd.s32 1, %s917_s23   ;;  %s1150_s21 = smov %s913_s22 }
 0x14d   : > { %p14_p2 = scmp.ge.s32.totalorder %s17_s23, 4   ;;  %s1151_s22 = smov %s1153_s25 }
 0x14f   :  { %16 = sbr.rel (!%p14_p2) target bundleno = 2 (0x2), region = 82 }
 0x154   :  { %650 = vsyncpa [#allocation3], 1 }
 0x155   :  { %652 = vsyncpa [#allocation3 + $0x1], 1 }

// kernel: decoder_forward.9
= control target key start
LH: loop header
LB: loop body
LE: loop exit
PB: predicated region body
PF: predicated region fallthrough
CT: control target
= control target key end

     0   :  { %11 = vsyncpa [#allocation3], 0  ;;  %s1115_s21 = smov 0   ;;  %s1117_s22 = smov 0   ;;  %s1336_s0 = inlined_call_operand.vmem [shape: f32[2,72,64], index: 0, kind: input, shape index: {}]   ;;  %s1337_s1 = inlined_call_operand.vmem [shape: f32[2,72,64], index: 1, kind: input, shape index: {}]   ;;  %s1338_s2 = inlined_call_operand.hbm [shape: f32[40,72], index: 2, kind: input, shape index: {}]   ;;  %s1339_s3 = inlined_call_operand.vmem [shape: f32[40,1], index: 3, kind: input, shape index: {}]   ;;  %s1340_s4 = inlined_call_operand.vmem [shape: f32[40,1], index: 4, kind: input, shape index: {}]   ;;  %s1341_s5 = inlined_call_operand.vmem [shape: f32[40,1], index: 5, kind: input, shape index: {}]   ;;  %s1342_s6 = inlined_call_operand.vmem [shape: f32[2,40,64], index: 6, kind: output, shape index: {}]  }
   0x1   :  { %s1119_s23 = smov 0  }
   0x2 LB: > { %s872_s24 = sadd.s32 4294967295, %s1072_s23   ;;  %s29_s25 = sadd.s32 1, %s1068_s22  ;;  %s1072_s23 = sphi %s1119_s23, %s17_s23   ;;  %s1068_s22 = sphi %s1117_s22, %s1346_s22   ;;  %s1064_s21 = sphi %s1115_s21, %s1345_s21  }
   0x3   : > { %p31_p0 = scmp.ge.s32.totalorder %s29_s25, 2  ;;  %p874_p1 = scmp.ge.s32.totalorder %s1072_s23, 1 }
   0x4   : > { %p202_p2 = scmp.lt.s32.totalorder %s1072_s23, 3  ;;  %p1140_p4 = scmp.eq.s32.totalorder %s872_s24, 0 }
   0x5   : > { %s1348_s25 = smov (%p31_p0, %s29_s25), 0  ;;  %s1074_s28 = smov [#allocation2]  }
   0x6   : > { %p1136_p3 = pnand %p874_p1, %p202_p2  ;;  %s214_s29 = sshll.u32 %s1074_s28, 4  ;;  %s215_s29 = int_to_ptr.vmem [resolvable:$true] %s214_s29 }
   0x7   : > { %s1031_s30 = scalar_lea.vmem %s215_s29, 640  ;;  %p1039_p11 = scmp.lt.s32.totalorder %s215_s29, %s215_s29 }
   0x8   : > { %p960_p5 = pneg %p1136_p3  ;;  %p1032_p8 = scmp.ne.s32.totalorder %s215_s29, %s1031_s30 }
   0x9   : > { %p1040_p12 = scmp.lt.s32.totalorder %s1031_s30, %s1031_s30 }
   0xa   : > { %p961_p6 = pnand %p1140_p4, %p960_p5 }
   0xb   : > { %p1041_p13 = por %p1040_p12, %p1039_p11 }
   0xc   : > { %p1022_p7 = pneg %p961_p6 }
   0xe   : > { %p1034_p9 = pnand %p1032_p8, %p1022_p7 }
  0x10   : > { %p1035_p10 = pneg %p1034_p9 }
  0x12   : > { %p1042_p0 = pnand %p1041_p13, %p1035_p10 }
  0x14   : > { %1045 = shalt.err (!%p1042_p0)
}
  0x15   : > { %s1075_s7 = smov 128   ;;  %s1076_s8 = smov 8  }
  0x16   : > { %963 = dma.hbm_to_vmem [thread:$0]  (!%p961_p6), %s1338_s2, 640, %s215_s29, [#allocation3], %s1075_s7, %s1075_s7, %s1076_s8  }
  0x17   : > { %261 = sbr.rel (%p1136_p3) target bundleno = 385 (0x181), region = 44 }
  0x1c   : > { %1059 = dma.done.wait (%p1140_p4), [#allocation3], 640  }
  0x1d   : > { %1061 = vsyncadd (%p1140_p4), [#allocation3], 4294966656  ;;  %p305_p1 = scmp.lt.s32.totalorder %s1064_s21, 1  ;;  %v1077_v0 = vmov 0.0   ;;  %vm1078_vm0 = vmmov 0   ;;  %v1079_v1 = vmov 0  }
  0x1e   : > { %903 = vmatprep.subr.mxu0 %v1077_v0  ;;  %936 = vmatprep.subr.mxu1 %v1077_v0  ;;  %v356_v29 = vld [vmem:[#allocation2] sm:$0xff]  ;;  %vm391_vm1 = vcmask 588800   ;;  %v359_v30 = vld [vmem:[#allocation2 + $0x18] sm:$0xff]  ;;  %v363_v32 = vld [vmem:[%s1339_s3 + $0x10] sm:$0xff]  ;;  %vm497_vm2 = vcmask 523264  }
  0x1f   : > { %s1350_s21 = smov (!%p305_p1, %s1064_s21), 1  ;;  %921 = vmatprep.mubr.msk.f32.mxu0 %vm1078_vm0, %v1077_v0  ;;  %930 = vmatprep.mubr.msk.f32.mxu1 %vm1078_vm0, %v1077_v0  ;;  %v361_v31 = vld [vmem:[%s1339_s3] sm:$0xff]  ;;  %v357_v33 = vld [vmem:[#allocation2 + $0x8] sm:$0xff]  ;;  %v364_v36 = vld [vmem:[%s1339_s3 + $0x18] sm:$0xff] }
  0x20   : > { %996 = vset.pattern.permute.xlu0 %v1079_v1  ;;  %997 = vset.pattern.permute.xlu1 %v1079_v1  ;;  %s954_s11 = smul.u32 72, %s1350_s21  ;;  %v360_v34 = vld [vmem:[#allocation2 + $0x20] sm:$0xff]  ;;  %v362_v35 = vld [vmem:[%s1339_s3 + $0x8] sm:$0xff]  ;;  %v358_v37 = vld [vmem:[#allocation2 + $0x10] sm:$0xff] }
  0x21   : > { %368 = vperm.xlu0 %996, %v361_v31   ;;  %378 = vperm.xlu1 %997, %v363_v32   ;;  %v365_v38 = vld [vmem:[%s1339_s3 + $0x20] sm:$0xff]  ;;  %v549_v40 = vld [vmem:[%s1340_s4 + $0x8] sm:$0xff]  ;;  %v550_v41 = vld [vmem:[%s1340_s4 + $0x10] sm:$0xff]  ;;  %s955_s8 = smul.u32 40, %s1350_s21 }
  0x22   : > { %s1171_s14 = scalar_lea.vmem %s1336_s0, %s954_s11  ;;  %s1176_s17 = scalar_lea.vmem %s1337_s1, %s954_s11  ;;  %v548_v39 = vld [vmem:[%s1340_s4] sm:$0xff]  ;;  %v551_v42 = vld [vmem:[%s1340_s4 + $0x18] sm:$0xff]  ;;  %v584_v45 = vld [vmem:[%s1341_s5 + $0x8] sm:$0xff] }
  0x23   : > { %v337_v2 = vld [vmem:[%s1171_s14 + $0x40] sm:$0xff]  ;;  %v336_v4 = vld [vmem:[%s1171_s14 + $0x38] sm:$0xff]  ;;  %v335_v7 = vld [vmem:[%s1171_s14 + $0x30] sm:$0xff]  ;;  %s328_s10 = scalar_lea.vmem %s1342_s6, %s955_s8 }
  0x24   : > { %v346_v3 = vld [vmem:[%s1176_s17 + $0x40] sm:$0xff]  ;;  %v345_v6 = vld [vmem:[%s1176_s17 + $0x38] sm:$0xff]  ;;  %v344_v8 = vld [vmem:[%s1176_s17 + $0x30] sm:$0xff] }
  0x25   : > { %v355_v5 = vmul.f32 %v346_v3, %v337_v2  ;;  %v354_v9 = vmul.f32 %v345_v6, %v336_v4  ;;  %v334_v10 = vld [vmem:[%s1171_s14 + $0x28] sm:$0xff]  ;;  %v353_v12 = vmul.f32 %v344_v8, %v335_v7  ;;  %v333_v13 = vld [vmem:[%s1171_s14 + $0x20] sm:$0xff]  ;;  %v332_v16 = vld [vmem:[%s1171_s14 + $0x18] sm:$0xff]  ;;  %373 = vperm.xlu0 %996, %v362_v35   ;;  %383 = vperm.xlu1 %997, %v364_v36  }
  0x26   : > { %v343_v11 = vld [vmem:[%s1176_s17 + $0x28] sm:$0xff]  ;;  %v342_v14 = vld [vmem:[%s1176_s17 + $0x20] sm:$0xff]  ;;  %v341_v17 = vld [vmem:[%s1176_s17 + $0x18] sm:$0xff] }
  0x27   : > { %904 = vmatpush3.msra.mxu0 %v355_v5  ;;  %945 = vmatpush3.msra.mxu1 %v355_v5  ;;  %v352_v15 = vmul.f32 %v343_v11, %v334_v10  ;;  %v351_v18 = vmul.f32 %v342_v14, %v333_v13  ;;  %v331_v19 = vld [vmem:[%s1171_s14 + $0x10] sm:$0xff]  ;;  %v350_v21 = vmul.f32 %v341_v17, %v332_v16  ;;  %v330_v22 = vld [vmem:[%s1171_s14 + $0x8] sm:$0xff]  ;;  %v329_v25 = vld [vmem:[%s1171_s14] sm:$0xff] }
  0x28   : > { %905 = vmatprep.subr.mxu0 %v1077_v0  ;;  %937 = vmatprep.subr.mxu1 %v1077_v0  ;;  %v340_v20 = vld [vmem:[%s1176_s17 + $0x10] sm:$0xff]  ;;  %v339_v23 = vld [vmem:[%s1176_s17 + $0x8] sm:$0xff]  ;;  %v338_v26 = vld [vmem:[%s1176_s17] sm:$0xff] }
  0x29   : > { %906 = vmatpush3.msra.mxu0 %v354_v9  ;;  %946 = vmatpush3.msra.mxu1 %v354_v9  ;;  %v349_v24 = vmul.f32 %v340_v20, %v331_v19  ;;  %v348_v27 = vmul.f32 %v339_v23, %v330_v22  ;;  %v347_v28 = vmul.f32 %v338_v26, %v329_v25  ;;  %v552_v43 = vld [vmem:[%s1340_s4 + $0x20] sm:$0xff]  ;;  %v585_v46 = vld [vmem:[%s1341_s5 + $0x10] sm:$0xff]  ;;  %v586_v47 = vld [vmem:[%s1341_s5 + $0x18] sm:$0xff] }
  0x2a   : > { %907 = vmatprep.subr.mxu0 %v1077_v0  ;;  %938 = vmatprep.subr.mxu1 %v1077_v0  ;;  %v583_v44 = vld [vmem:[%s1341_s5] sm:$0xff] }
  0x2b   : > { %908 = vmatpush3.msra.mxu0 %v353_v12  ;;  %947 = vmatpush3.msra.mxu1 %v353_v12  ;;  %v587_v48 = vld [vmem:[%s1341_s5 + $0x20] sm:$0xff] }
  0x2c   : > { %909 = vmatprep.subr.mxu0 %v1077_v0  ;;  %939 = vmatprep.subr.mxu1 %v1077_v0 }
  0x2d   : > { %910 = vmatpush3.msra.mxu0 %v352_v15  ;;  %948 = vmatpush3.msra.mxu1 %v352_v15 }
  0x2e   : > { %911 = vmatprep.subr.mxu0 %v1077_v0  ;;  %940 = vmatprep.subr.mxu1 %v1077_v0 }
  0x2f   : > { %912 = vmatpush3.msra.mxu0 %v351_v18  ;;  %949 = vmatpush3.msra.mxu1 %v351_v18 }
  0x30   : > { %913 = vmatprep.subr.mxu0 %v1077_v0  ;;  %941 = vmatprep.subr.mxu1 %v1077_v0 }
  0x31   : > { %914 = vmatpush3.msra.mxu0 %v350_v21  ;;  %950 = vmatpush3.msra.mxu1 %v350_v21 }
  0x32   : > { %915 = vmatprep.subr.mxu0 %v1077_v0  ;;  %942 = vmatprep.subr.mxu1 %v1077_v0 }
  0x33   : > { %916 = vmatpush3.msra.mxu0 %v349_v24  ;;  %951 = vmatpush3.msra.mxu1 %v349_v24 }
  0x34   : > { %917 = vmatprep.subr.mxu0 %v1077_v0  ;;  %943 = vmatprep.subr.mxu1 %v1077_v0 }
  0x35   : > { %918 = vmatpush3.msra.mxu0 %v348_v27  ;;  %952 = vmatpush3.msra.mxu1 %v348_v27 }
  0x36   : > { %919 = vmatprep.subr.mxu0 %v1077_v0  ;;  %944 = vmatprep.subr.mxu1 %v1077_v0 }
  0x37   : > { %920 = vmatpush3.msra.mxu0 %v347_v28  ;;  %953 = vmatpush3.msra.mxu1 %v347_v28 }
  0x38   : > { %922 = vmatmul.mubr.msk.f32.vlgmr.msra.gmra.mxu0 %vm391_vm1, %v356_v29  ;;  %931 = vmatmul.mubr.msk.f32.vlgmr.msra.gmra.mxu1 %vm391_vm1, %v359_v30 }
  0x39   : > { %924 = vmatprep.mubr.msk.f32.mxu0 %vm1078_vm0, %v1077_v0  ;;  %933 = vmatprep.mubr.msk.f32.mxu1 %vm1078_vm0, %v1077_v0 }
  0x3a   : > { %388 = vperm.xlu0 %996, %v365_v38   ;;  %555 = vperm.xlu1 %997, %v548_v39  }
  0x3c   : > { %925 = vmatmul.mubr.msk.f32.gmra.mxu0 %vm391_vm1, %v357_v33  ;;  %934 = vmatmul.mubr.msk.f32.gmra.mxu1 %vm391_vm1, %v360_v34 }
  0x3d   : > { %927 = vmatprep.mubr.msk.f32.mxu0 %vm1078_vm0, %v1077_v0 }
  0x3e   : > { %560 = vperm.xlu0 %996, %v549_v40   ;;  %565 = vperm.xlu1 %997, %v550_v41  }
  0x40   : > { %928 = vmatmul.mubr.msk.f32.gmra.mxu0 %vm391_vm1, %v358_v37 }
  0x42   : > { %570 = vperm.xlu0 %996, %v551_v42   ;;  %575 = vperm.xlu1 %997, %v552_v43  }
  0x46   : > { %590 = vperm.xlu0 %996, %v583_v44   ;;  %595 = vperm.xlu1 %997, %v584_v45  }
  0x4a   : > { %600 = vperm.xlu0 %996, %v585_v46   ;;  %605 = vperm.xlu1 %997, %v586_v47  }
  0x4e   : > { %610 = vperm.xlu0 %996, %v587_v48  }
  0x9c   : > { %v369_v49 = vpop.permute.xlu0 %368  ;;  %v379_v52 = vpop.permute.xlu1 %378 }
  0xa0   : > { %v374_v55 = vpop.permute.xlu0 %373  ;;  %v384_v63 = vpop.permute.xlu1 %383 }
  0xb5   : > { %v389_v4 = vpop.permute.xlu0 %388  ;;  %v556_v45 = vpop.permute.xlu1 %555 }
  0xb9   : > { %v561_v46 = vpop.permute.xlu0 %560 }
  0xf8   : > { %v473_v50 = vpop.f32.mrf.mxu0  ;;  %v488_v51 = vpop.f32.mrf.mxu1 }
  0xf9   : > { %v474_v58 = vadd.f32 %v473_v50, %v369_v49  ;;  %v489_v2 = vadd.f32 %v488_v51, %v384_v63  ;;  %v566_v50 = vpop.permute.xlu1 %565  ;;  %v571_v51 = vpop.permute.xlu0 %570 }
  0xfa   : > { %v923_v53 = vpop.f32.mrf.mxu0  ;;  %v932_v54 = vpop.f32.mrf.mxu1 }
  0xfb   : > { %v498_v1 = vsel %vm497_vm2, %v474_v58, 0.0  ;;  %v503_v10 = vsel %vm497_vm2, %v489_v2, 0.0 }
  0xfc   : > { %v478_v56 = vpop.f32.mrf.mxu0  ;;  %v493_v57 = vpop.f32.mrf.mxu1 }
  0xfd   : > { %v479_v59 = vadd.f32 %v478_v56, %v374_v55  ;;  %v494_v7 = vadd.f32 %v493_v57, %v389_v4  ;;  %v591_v53 = vpop.permute.xlu0 %590 }
  0xfe   : > { %v926_v60 = vpop.f32.mrf.mxu0  ;;  %v935_v61 = vpop.f32.mrf.mxu1 }
  0xff   : > { %v499_v62 = vsel %vm497_vm2, %v479_v59, 0.0  ;;  %v505_v12 = vsel %vm497_vm2, %v494_v7, 0.0 }
 0x100   : > { %v483_v0 = vpop.f32.mrf.mxu0  ;;  %v500_v5 = vadd.f32 %v499_v62, %v498_v1 }
 0x101   : > { %v484_v3 = vadd.f32 %v483_v0, %v379_v52  ;;  %v576_v52 = vpop.permute.xlu1 %575  ;;  %v601_v55 = vpop.permute.xlu0 %600 }
 0x102   : > { %v929_v6 = vpop.f32.mrf.mxu0 }
 0x103   : > { %v501_v8 = vsel %vm497_vm2, %v484_v3, 0.0 }
 0x104   : > { %v502_v9 = vadd.f32 %v501_v8, %v500_v5 }
 0x105   : > { %v596_v54 = vpop.permute.xlu1 %595  ;;  %v611_v4 = vpop.permute.xlu0 %610 }
 0x106   : > { %v504_v11 = vadd.f32 %v503_v10, %v502_v9 }
 0x108   : > { %v506_v13 = vadd.f32 %v505_v12, %v504_v11 }
 0x10a   : > { %v507_v14 = vrot.slane %v506_v13, 4 }
 0x10c   : > { %v508_v15 = vadd.f32 %v507_v14, %v506_v13 }
 0x10e   : > { %v509_v16 = vrot.slane %v508_v15, 2 }
 0x110   : > { %v510_v17 = vadd.f32 %v509_v16, %v508_v15 }
 0x112   : > { %v511_v18 = vrot.slane %v510_v17, 1 }
 0x114   : > { %v512_v19 = vadd.f32 %v511_v18, %v510_v17 }
 0x116   : > { %v514_v20 = vmul.f32 0.025, %v512_v19 }
 0x118   : > { %v515_v21 = vsub.f32 %v474_v58, %v514_v20  ;;  %v516_v22 = vsub.f32 %v479_v59, %v514_v20  ;;  %v517_v23 = vsub.f32 %v484_v3, %v514_v20  ;;  %v518_v24 = vsub.f32 %v489_v2, %v514_v20  ;;  %v606_v2 = vpop.permute.xlu1 %605 }
 0x119   : > { %v519_v25 = vsub.f32 %v494_v7, %v514_v20 }
 0x11a   : > { %v520_v26 = vmul.f32 %v515_v21, %v515_v21  ;;  %v521_v27 = vmul.f32 %v516_v22, %v516_v22  ;;  %v522_v28 = vmul.f32 %v517_v23, %v517_v23  ;;  %v523_v29 = vmul.f32 %v518_v24, %v518_v24 }
 0x11b   : > { %v524_v33 = vmul.f32 %v519_v25, %v519_v25 }
 0x11c   : > { %v525_v30 = vsel %vm497_vm2, %v520_v26, 0.0  ;;  %v526_v31 = vsel %vm497_vm2, %v521_v27, 0.0  ;;  %v528_v34 = vsel %vm497_vm2, %v522_v28, 0.0  ;;  %v530_v36 = vsel %vm497_vm2, %v523_v29, 0.0 }
 0x11d   : > { %v527_v32 = vadd.f32 %v526_v31, %v525_v30  ;;  %v532_v38 = vsel %vm497_vm2, %v524_v33, 0.0 }
 0x11f   : > { %v529_v35 = vadd.f32 %v528_v34, %v527_v32 }
 0x121   : > { %v531_v37 = vadd.f32 %v530_v36, %v529_v35 }
 0x123   : > { %v533_v39 = vadd.f32 %v532_v38, %v531_v37 }
 0x125   : > { %v534_v40 = vrot.slane %v533_v39, 4 }
 0x127   : > { %v535_v41 = vadd.f32 %v534_v40, %v533_v39 }
 0x129   : > { %v536_v42 = vrot.slane %v535_v41, 2 }
 0x12b   : > { %v537_v43 = vadd.f32 %v536_v42, %v535_v41 }
 0x12d   : > { %v538_v44 = vrot.slane %v537_v43, 1 }
 0x12f   : > { %v539_v47 = vadd.f32 %v538_v44, %v537_v43 }
 0x131   : > { %v540_v48 = vmul.f32 0.025, %v539_v47 }
 0x133   : > { %v541_v49 = vadd.f32 1e-06, %v540_v48 }
 0x135   : > { %998 = vrsqrt.f32 %v541_v49 }
 0x142   : > { %v999_v56 = vpop.eup %998 }
 0x143   : > { %v543_v57 = vmul.f32 %v999_v56, %v515_v21  ;;  %v544_v58 = vmul.f32 %v999_v56, %v516_v22  ;;  %v545_v59 = vmul.f32 %v999_v56, %v517_v23  ;;  %v546_v60 = vmul.f32 %v999_v56, %v518_v24 }
 0x144   : > { %v547_v61 = vmul.f32 %v999_v56, %v519_v25 }
 0x145   : > { %v578_v62 = vmul.f32 %v556_v45, %v543_v57  ;;  %v579_v63 = vmul.f32 %v561_v46, %v544_v58  ;;  %v580_v0 = vmul.f32 %v566_v50, %v545_v59  ;;  %v581_v1 = vmul.f32 %v571_v51, %v546_v60 }
 0x146   : > { %v582_v3 = vmul.f32 %v576_v52, %v547_v61 }
 0x147   : > { %v1278_v5 = vadd.f32 %v591_v53, %v578_v62  ;;  %v1280_v6 = vadd.f32 %v596_v54, %v579_v63  ;;  %v1282_v7 = vadd.f32 %v601_v55, %v580_v0  ;;  %v1284_v8 = vadd.f32 %v606_v2, %v581_v1 }
 0x148   : > { %v1286_v9 = vadd.f32 %v611_v4, %v582_v3 }
 0x149   : > { %v1289_v10 = vmul.f32 0.70710677, %v1278_v5  ;;  %v1292_v11 = vmul.f32 0.70710677, %v1280_v6  ;;  %v1295_v12 = vmul.f32 0.70710677, %v1282_v7 }
 0x14a   : > { %v1298_v13 = vmul.f32 0.70710677, %v1284_v8  ;;  %v1301_v14 = vmul.f32 0.70710677, %v1286_v9 }
 0x14b   : > { %v623_v15 = vand.u32 2147483647, %v1289_v10  ;;  %v624_v16 = vand.u32 2147483647, %v1292_v11  ;;  %v625_v17 = vand.u32 2147483647, %v1295_v12 }
 0x14c   : > { %v626_v18 = vand.u32 2147483647, %v1298_v13  ;;  %v627_v19 = vand.u32 2147483647, %v1301_v14  ;;  %vm723_vm3 = vcmp.ge.f32.partialorder %v1289_v10, 0.0  ;;  %vm724_vm4 = vcmp.ge.f32.partialorder %v1292_v11, 0.0 }
 0x14d   : > { %v628_v20 = vmul.f32 0.3275911, %v623_v15  ;;  %v629_v21 = vmul.f32 0.3275911, %v624_v16  ;;  %v630_v22 = vmul.f32 0.3275911, %v625_v17 }
 0x14e   : > { %v631_v23 = vmul.f32 0.3275911, %v626_v18  ;;  %v632_v24 = vmul.f32 0.3275911, %v627_v19  ;;  %v693_v30 = vsub.f32 0.0, %v623_v15  ;;  %v694_v31 = vsub.f32 0.0, %v624_v16 }
 0x14f   : > { %v633_v25 = vadd.f32 1.0, %v628_v20  ;;  %v634_v26 = vadd.f32 1.0, %v629_v21  ;;  %v635_v27 = vadd.f32 1.0, %v630_v22  ;;  %v695_v32 = vsub.f32 0.0, %v625_v17 }
 0x150   : > { %v636_v28 = vadd.f32 1.0, %v631_v23  ;;  %v637_v29 = vadd.f32 1.0, %v632_v24  ;;  %v696_v33 = vsub.f32 0.0, %v626_v18  ;;  %v697_v34 = vsub.f32 0.0, %v627_v19 }
 0x151   : > { %1000 = vrcp.f32 %v633_v25  ;;  %v698_v35 = vmul.f32 %v693_v30, %v623_v15  ;;  %v699_v36 = vmul.f32 %v694_v31, %v624_v16  ;;  %v700_v37 = vmul.f32 %v695_v32, %v625_v17 }
 0x152   : > { %1002 = vrcp.f32 %v634_v26  ;;  %v701_v38 = vmul.f32 %v696_v33, %v626_v18  ;;  %v702_v40 = vmul.f32 %v697_v34, %v627_v19  ;;  %vm725_vm5 = vcmp.ge.f32.partialorder %v1295_v12, 0.0 }
 0x153   : > { %1004 = vrcp.f32 %v635_v27  ;;  %v703_v43 = vmul.f32 1.442695, %v698_v35  ;;  %v705_v46 = vmul.f32 1.442695, %v699_v36  ;;  %v707_v47 = vmul.f32 1.442695, %v700_v37 }
 0x154   : > { %1006 = vrcp.f32 %v636_v28  ;;  %v709_v51 = vmul.f32 1.442695, %v701_v38  ;;  %v711_v55 = vmul.f32 1.442695, %v702_v40  ;;  %vm726_vm6 = vcmp.ge.f32.partialorder %v1298_v13, 0.0 }
 0x155   : > { %1008 = vrcp.f32 %v637_v29  ;;  %vm727_vm7 = vcmp.ge.f32.partialorder %v1301_v14, 0.0  ;;  %v741_v13 = vmul.f32 0.5, %v1284_v8 }
 0x156   : > { %1010 = vpow2.f32 %v703_v43 }
 0x157   : > { %1012 = vpow2.f32 %v705_v46 }
 0x158   : > { %1014 = vpow2.f32 %v707_v47 }
 0x159   : > { %1016 = vpow2.f32 %v709_v51 }
 0x15a   : > { %1018 = vpow2.f32 %v711_v55 }
 0x15e   : > { %v1001_v39 = vpop.eup %1000 }
 0x15f   : > { %v1003_v41 = vpop.eup %1002  ;;  %v648_v42 = vmul.f32 1.0614054, %v1001_v39 }
 0x160   : > { %v1005_v44 = vpop.eup %1004  ;;  %v649_v45 = vmul.f32 1.0614054, %v1003_v41 }
 0x161   : > { %v1007_v48 = vpop.eup %1006  ;;  %v650_v49 = vmul.f32 1.0614054, %v1005_v44  ;;  %v653_v50 = vadd.f32 -1.4531521, %v648_v42 }
 0x162   : > { %v1009_v52 = vpop.eup %1008  ;;  %v651_v53 = vmul.f32 1.0614054, %v1007_v48  ;;  %v654_v54 = vadd.f32 -1.4531521, %v649_v45 }
 0x163   : > { %v652_v56 = vmul.f32 1.0614054, %v1009_v52  ;;  %v655_v57 = vadd.f32 -1.4531521, %v650_v49  ;;  %v658_v58 = vmul.f32 %v1001_v39, %v653_v50  ;;  %v1011_v35 = vpop.eup %1010 }
 0x164   : > { %v656_v59 = vadd.f32 -1.4531521, %v651_v53  ;;  %v659_v60 = vmul.f32 %v1003_v41, %v654_v54  ;;  %v1013_v38 = vpop.eup %1012 }
 0x165   : > { %v657_v61 = vadd.f32 -1.4531521, %v652_v56  ;;  %v660_v62 = vmul.f32 %v1005_v44, %v655_v57  ;;  %v663_v63 = vadd.f32 1.4214138, %v658_v58  ;;  %v1015_v45 = vpop.eup %1014 }
 0x166   : > { %v661_v0 = vmul.f32 %v1007_v48, %v656_v59  ;;  %v664_v1 = vadd.f32 1.4214138, %v659_v60  ;;  %v1017_v49 = vpop.eup %1016  ;;  %v739_v59 = vmul.f32 0.5, %v1280_v6 }
 0x167   : > { %v662_v2 = vmul.f32 %v1009_v52, %v657_v61  ;;  %v665_v3 = vadd.f32 1.4214138, %v660_v62  ;;  %v668_v4 = vmul.f32 %v1001_v39, %v663_v63  ;;  %v1019_v54 = vpop.eup %1018 }
 0x168   : > { %v666_v15 = vadd.f32 1.4214138, %v661_v0  ;;  %v669_v16 = vmul.f32 %v1003_v41, %v664_v1  ;;  %v740_v1 = vmul.f32 0.5, %v1282_v7 }
 0x169   : > { %v667_v17 = vadd.f32 1.4214138, %v662_v2  ;;  %v670_v18 = vmul.f32 %v1005_v44, %v665_v3  ;;  %v673_v19 = vadd.f32 -0.28449672, %v668_v4 }
 0x16a   : > { %v671_v20 = vmul.f32 %v1007_v48, %v666_v15  ;;  %v674_v21 = vadd.f32 -0.28449672, %v669_v16  ;;  %v742_v16 = vmul.f32 0.5, %v1286_v9 }
 0x16b   : > { %v672_v22 = vmul.f32 %v1009_v52, %v667_v17  ;;  %v675_v23 = vadd.f32 -0.28449672, %v670_v18  ;;  %v678_v24 = vmul.f32 %v1001_v39, %v673_v19 }
 0x16c   : > { %v676_v25 = vadd.f32 -0.28449672, %v671_v20  ;;  %v679_v26 = vmul.f32 %v1003_v41, %v674_v21 }
 0x16d   : > { %v677_v27 = vadd.f32 -0.28449672, %v672_v22  ;;  %v680_v28 = vmul.f32 %v1005_v44, %v675_v23  ;;  %v683_v29 = vadd.f32 0.2548296, %v678_v24 }
 0x16e   : > { %v681_v30 = vmul.f32 %v1007_v48, %v676_v25  ;;  %v684_v31 = vadd.f32 0.2548296, %v679_v26 }
 0x16f   : > { %v682_v32 = vmul.f32 %v1009_v52, %v677_v27  ;;  %v685_v33 = vadd.f32 0.2548296, %v680_v28  ;;  %v688_v34 = vmul.f32 %v1001_v39, %v683_v29  ;;  %v738_v39 = vmul.f32 0.5, %v1278_v5 }
 0x170   : > { %v686_v36 = vadd.f32 0.2548296, %v681_v30  ;;  %v689_v37 = vmul.f32 %v1003_v41, %v684_v31 }
 0x171   : > { %v687_v40 = vadd.f32 0.2548296, %v682_v32  ;;  %v690_v42 = vmul.f32 %v1005_v44, %v685_v33  ;;  %v713_v43 = vmul.f32 %v1011_v35, %v688_v34 }
 0x172   : > { %v691_v46 = vmul.f32 %v1007_v48, %v686_v36  ;;  %v714_v47 = vmul.f32 %v1013_v38, %v689_v37 }
 0x173   : > { %v692_v50 = vmul.f32 %v1009_v52, %v687_v40  ;;  %v715_v51 = vmul.f32 %v1015_v45, %v690_v42  ;;  %v718_v53 = vsub.f32 1.0, %v713_v43 }
 0x174   : > { %v716_v55 = vmul.f32 %v1017_v49, %v691_v46  ;;  %v719_v56 = vsub.f32 1.0, %v714_v47 }
 0x175   : > { %v717_v57 = vmul.f32 %v1019_v54, %v692_v50  ;;  %v720_v41 = vsub.f32 1.0, %v715_v51  ;;  %v728_v58 = vsub.f32 0.0, %v718_v53 }
 0x176   : > { %v721_v44 = vsub.f32 1.0, %v716_v55  ;;  %v729_v48 = vsub.f32 0.0, %v719_v56 }
 0x177   : > { %v722_v52 = vsub.f32 1.0, %v717_v57  ;;  %v730_v60 = vsub.f32 0.0, %v720_v41  ;;  %v733_v61 = vsel %vm723_vm3, %v718_v53, %v728_v58 }
 0x178   : > { %v731_v5 = vsub.f32 0.0, %v721_v44  ;;  %v734_v62 = vsel %vm724_vm4, %v719_v56, %v729_v48  ;;  %v743_v63 = vadd.f32 1.0, %v733_v61 }
 0x179   : > { %v732_v6 = vsub.f32 0.0, %v722_v52  ;;  %v735_v10 = vsel %vm725_vm5, %v720_v41, %v730_v60  ;;  %v744_v11 = vadd.f32 1.0, %v734_v62 }
 0x17a   : > { %v736_v0 = vsel %vm726_vm6, %v721_v44, %v731_v5  ;;  %v745_v12 = vadd.f32 1.0, %v735_v10  ;;  %v748_v2 = vmul.f32 %v743_v63, %v738_v39 }
 0x17b   : > { %v737_v3 = vsel %vm727_vm7, %v722_v52, %v732_v6  ;;  %v746_v4 = vadd.f32 1.0, %v736_v0  ;;  %v749_v15 = vmul.f32 %v744_v11, %v739_v59 }
 0x17c   : > { %v747_v17 = vadd.f32 1.0, %v737_v3  ;;  %v750_v18 = vmul.f32 %v745_v12, %v740_v1  ;;  %753 = vst.msk [vmem:[%s328_s10] sm:$0xff] %vm497_vm2, %v748_v2 }
 0x17d   : > { %v751_v14 = vmul.f32 %v746_v4, %v741_v13  ;;  %754 = vst.msk [vmem:[%s328_s10 + $0x8] sm:$0xff] %vm497_vm2, %v749_v15 }
 0x17e   : > { %v752_v19 = vmul.f32 %v747_v17, %v742_v16  ;;  %755 = vst.msk [vmem:[%s328_s10 + $0x10] sm:$0xff] %vm497_vm2, %v750_v18 }
 0x17f   : > { %756 = vst.msk [vmem:[%s328_s10 + $0x18] sm:$0xff] %vm497_vm2, %v751_v14 }
 0x180   : > { %757 = vst.msk [vmem:[%s328_s10 + $0x20] sm:$0xff] %vm497_vm2, %v752_v19 }
 0x181 PF: > { %s17_s23 = sadd.s32 1, %s1072_s23   ;;  %s1345_s21 = smov %s1068_s22 }
 0x182   : > { %p14_p2 = scmp.ge.s32.totalorder %s17_s23, 4   ;;  %s1346_s22 = smov %s1348_s25 }
 0x184   :  { %16 = sbr.rel (!%p14_p2) target bundleno = 2 (0x2), region = 82 }
 0x189   :  { %785 = vsyncpa [#allocation3], 1 }
 0x18a   :  { %787 = vsyncpa [#allocation3 + $0x1], 1 }

// kernel: decoder_forward.14
= control target key start
LH: loop header
LB: loop body
LE: loop exit
PB: predicated region body
PF: predicated region fallthrough
CT: control target
= control target key end

     0   :  { %11 = vsyncpa [#allocation3], 0  ;;  %s882_s21 = smov 0   ;;  %s884_s22 = smov 0   ;;  %s1005_s0 = inlined_call_operand.vmem [shape: f32[2,40,256], index: 0, kind: input, shape index: {}]   ;;  %s1006_s1 = inlined_call_operand.vmem [shape: f32[2,40,256], index: 1, kind: input, shape index: {}]   ;;  %s1007_s2 = inlined_call_operand.hbm [shape: f32[24,40], index: 2, kind: input, shape index: {}]   ;;  %s1008_s3 = inlined_call_operand.vmem [shape: f32[24,1], index: 3, kind: input, shape index: {}]   ;;  %s1009_s4 = inlined_call_operand.vmem [shape: f32[24,1], index: 4, kind: input, shape index: {}]   ;;  %s1010_s5 = inlined_call_operand.vmem [shape: f32[24,1], index: 5, kind: input, shape index: {}]   ;;  %s1011_s6 = inlined_call_operand.vmem [shape: f32[2,24,256], index: 6, kind: output, shape index: {}]  }
   0x1   :  { %s886_s23 = smov 0  }
   0x2 LB: > { %s716_s24 = sadd.s32 4294967295, %s840_s23   ;;  %s29_s25 = sadd.s32 1, %s836_s22  ;;  %s840_s23 = sphi %s886_s23, %s17_s23   ;;  %s836_s22 = sphi %s884_s22, %s1015_s22   ;;  %s832_s21 = sphi %s882_s21, %s1014_s21  }
   0x3   : > { %p31_p0 = scmp.ge.s32.totalorder %s29_s25, 2  ;;  %p718_p1 = scmp.ge.s32.totalorder %s840_s23, 1 }
   0x4   : > { %p202_p2 = scmp.lt.s32.totalorder %s840_s23, 3  ;;  %p907_p4 = scmp.eq.s32.totalorder %s716_s24, 0 }
   0x5   : > { %s1017_s25 = smov (%p31_p0, %s29_s25), 0  ;;  %s842_s28 = smov [#allocation2]  }
   0x6   : > { %p903_p3 = pnand %p718_p1, %p202_p2  ;;  %s214_s29 = sshll.u32 %s842_s28, 4  ;;  %s215_s29 = int_to_ptr.vmem [resolvable:$true] %s214_s29 }
   0x7   : > { %s799_s30 = scalar_lea.vmem %s215_s29, 384  ;;  %p807_p11 = scmp.lt.s32.totalorder %s215_s29, %s215_s29 }
   0x8   : > { %p747_p5 = pneg %p903_p3  ;;  %p800_p8 = scmp.ne.s32.totalorder %s215_s29, %s799_s30 }
   0x9   : > { %p808_p12 = scmp.lt.s32.totalorder %s799_s30, %s799_s30 }
   0xa   : > { %p748_p6 = pnand %p907_p4, %p747_p5 }
   0xb   : > { %p809_p13 = por %p808_p12, %p807_p11 }
   0xc   : > { %p790_p7 = pneg %p748_p6 }
   0xe   : > { %p802_p9 = pnand %p800_p8, %p790_p7 }
  0x10   : > { %p803_p10 = pneg %p802_p9 }
  0x12   : > { %p810_p0 = pnand %p809_p13, %p803_p10 }
  0x14   : > { %813 = shalt.err (!%p810_p0)
}
  0x15   : > { %s843_s7 = smov 128   ;;  %s844_s8 = smov 8  }
  0x16   : > { %750 = dma.hbm_to_vmem [thread:$0]  (!%p748_p6), %s1007_s2, 384, %s215_s29, [#allocation3], %s843_s7, %s843_s7, %s844_s8  }
  0x17   : > { %265 = sbr.rel (%p903_p3) target bundleno = 312 (0x138), region = 44 }
  0x1c   : > { %827 = dma.done.wait (%p907_p4), [#allocation3], 384  }
  0x1d   : > { %829 = vsyncadd (%p907_p4), [#allocation3], 4294966912  ;;  %p313_p1 = scmp.lt.s32.totalorder %s832_s21, 1  ;;  %v845_v0 = vmov 0.0   ;;  %v846_v1 = vmov 0   ;;  %v372_v32 = vld [vmem:[#allocation2] sm:$0xff] }
  0x1e   : > { %467 = vmatprep.mubr.f32.mxu0 %v845_v0  ;;  %473 = vmatprep.mubr.f32.mxu1 %v845_v0  ;;  %vm393_vm0 = vcmask 326656   ;;  %v373_v33 = vld [vmem:[#allocation2 + $0x8] sm:$0xff]  ;;  %v375_v34 = vld [vmem:[%s1008_s3] sm:$0xff]  ;;  %v377_v35 = vld [vmem:[%s1008_s3 + $0x10] sm:$0xff] }
  0x1f   : > { %s1019_s21 = smov (!%p313_p1, %s832_s21), 1  ;;  %782 = vset.pattern.permute.xlu0 %v846_v1  ;;  %783 = vset.pattern.permute.xlu1 %v846_v1  ;;  %v374_v36 = vld [vmem:[#allocation2 + $0x10] sm:$0xff]  ;;  %v376_v37 = vld [vmem:[%s1008_s3 + $0x8] sm:$0xff]  ;;  %v545_v38 = vld [vmem:[%s1009_s4] sm:$0xff] }
  0x20   : > { %s741_s11 = smul.u32 80, %s1019_s21  ;;  %380 = vperm.xlu0 %782, %v375_v34   ;;  %390 = vperm.xlu1 %783, %v377_v35   ;;  %v546_v39 = vld [vmem:[%s1009_s4 + $0x8] sm:$0xff]  ;;  %v547_v40 = vld [vmem:[%s1009_s4 + $0x10] sm:$0xff]  ;;  %v569_v41 = vld [vmem:[%s1010_s5] sm:$0xff] }
  0x21   : > { %v570_v42 = vld [vmem:[%s1010_s5 + $0x8] sm:$0xff]  ;;  %v571_v43 = vld [vmem:[%s1010_s5 + $0x10] sm:$0xff]  ;;  %s742_s16 = smul.u32 48, %s1019_s21 }
  0x22   : > { %s934_s14 = scalar_lea.vmem %s1005_s0, %s741_s11  ;;  %s939_s17 = scalar_lea.vmem %s1006_s1, %s741_s11 }
  0x23   : > { %v351_v2 = vld [vmem:[%s934_s14 + $0x48] sm:$0xff]  ;;  %v350_v4 = vld [vmem:[%s934_s14 + $0x40] sm:$0xff]  ;;  %v349_v7 = vld [vmem:[%s934_s14 + $0x38] sm:$0xff]  ;;  %s340_s19 = scalar_lea.vmem %s1011_s6, %s742_s16 }
  0x24   : > { %v361_v3 = vld [vmem:[%s939_s17 + $0x48] sm:$0xff]  ;;  %v360_v6 = vld [vmem:[%s939_s17 + $0x40] sm:$0xff]  ;;  %v359_v8 = vld [vmem:[%s939_s17 + $0x38] sm:$0xff]  ;;  %385 = vperm.xlu0 %782, %v376_v37   ;;  %550 = vperm.xlu1 %783, %v545_v38  }
  0x25   : > { %v371_v5 = vmul.f32 %v361_v3, %v351_v2  ;;  %v370_v9 = vmul.f32 %v360_v6, %v350_v4  ;;  %v369_v10 = vmul.f32 %v359_v8, %v349_v7  ;;  %v348_v11 = vld [vmem:[%s934_s14 + $0x30] sm:$0xff]  ;;  %v347_v13 = vld [vmem:[%s934_s14 + $0x28] sm:$0xff]  ;;  %v346_v16 = vld [vmem:[%s934_s14 + $0x20] sm:$0xff] }
  0x26   : > { %v358_v12 = vld [vmem:[%s939_s17 + $0x30] sm:$0xff]  ;;  %v357_v15 = vld [vmem:[%s939_s17 + $0x28] sm:$0xff]  ;;  %v356_v17 = vld [vmem:[%s939_s17 + $0x20] sm:$0xff] }
  0x27   : > { %425 = vmatprep.subr.mxu0 %v371_v5  ;;  %731 = vmatprep.subr.mxu1 %v371_v5  ;;  %v368_v14 = vmul.f32 %v358_v12, %v348_v11  ;;  %v367_v18 = vmul.f32 %v357_v15, %v347_v13  ;;  %v366_v19 = vmul.f32 %v356_v17, %v346_v16  ;;  %v345_v20 = vld [vmem:[%s934_s14 + $0x18] sm:$0xff]  ;;  %v344_v22 = vld [vmem:[%s934_s14 + $0x10] sm:$0xff]  ;;  %v343_v25 = vld [vmem:[%s934_s14 + $0x8] sm:$0xff] }
  0x28   : > { %426 = vmatpush1.msra.mxu0 %v370_v9  ;;  %736 = vmatpush1.msra.mxu1 %v370_v9  ;;  %v355_v21 = vld [vmem:[%s939_s17 + $0x18] sm:$0xff]  ;;  %v354_v24 = vld [vmem:[%s939_s17 + $0x10] sm:$0xff]  ;;  %v353_v26 = vld [vmem:[%s939_s17 + $0x8] sm:$0xff] }
  0x29   : > { %427 = vmatprep.subr.mxu0 %v369_v10  ;;  %732 = vmatprep.subr.mxu1 %v369_v10  ;;  %v365_v23 = vmul.f32 %v355_v21, %v345_v20  ;;  %v364_v27 = vmul.f32 %v354_v24, %v344_v22  ;;  %v342_v28 = vld [vmem:[%s934_s14] sm:$0xff]  ;;  %v363_v30 = vmul.f32 %v353_v26, %v343_v25 }
  0x2a   : > { %428 = vmatpush1.msra.mxu0 %v368_v14  ;;  %737 = vmatpush1.msra.mxu1 %v368_v14  ;;  %v352_v29 = vld [vmem:[%s939_s17] sm:$0xff] }
  0x2b   : > { %429 = vmatprep.subr.mxu0 %v367_v18  ;;  %733 = vmatprep.subr.mxu1 %v367_v18  ;;  %v362_v31 = vmul.f32 %v352_v29, %v342_v28 }
  0x2c   : > { %430 = vmatpush1.msra.mxu0 %v366_v19  ;;  %738 = vmatpush1.msra.mxu1 %v366_v19 }
  0x2d   : > { %431 = vmatprep.subr.mxu0 %v365_v23  ;;  %734 = vmatprep.subr.mxu1 %v365_v23 }
  0x2e   : > { %432 = vmatpush1.msra.mxu0 %v364_v27  ;;  %739 = vmatpush1.msra.mxu1 %v364_v27 }
  0x2f   : > { %433 = vmatprep.subr.mxu0 %v363_v30  ;;  %735 = vmatprep.subr.mxu1 %v363_v30 }
  0x30   : > { %434 = vmatpush1.msra.mxu0 %v362_v31  ;;  %740 = vmatpush1.msra.mxu1 %v362_v31 }
  0x31   : > { %726 = vmatmul.mubr.msk.f32.vlgmr.msra.gmra.mxu0 %vm393_vm0, %v372_v32  ;;  %727 = vmatmul.mubr.msk.f32.vlgmr.msra.gmra.mxu1 %vm393_vm0, %v373_v33 }
  0x32   : > { %479 = vmatprep.mubr.f32.mxu1 %v845_v0  ;;  %555 = vperm.xlu0 %782, %v546_v39  }
  0x33   : > { %560 = vperm.xlu1 %783, %v547_v40  }
  0x35   : > { %728 = vmatmul.mubr.msk.f32.gmra.mxu1 %vm393_vm0, %v374_v36 }
  0x36   : > { %574 = vperm.xlu0 %782, %v569_v41  }
  0x37   : > { %579 = vperm.xlu1 %783, %v570_v42  }
  0x3a   : > { %584 = vperm.xlu0 %782, %v571_v43  }
  0x9b   : > { %v381_v44 = vpop.permute.xlu0 %380  ;;  %v391_v54 = vpop.permute.xlu1 %390 }
  0x9f   : > { %v386_v45 = vpop.permute.xlu0 %385 }
  0xf1   : > { %v469_v46 = vpop.f32.mrf.mxu0  ;;  %v475_v47 = vpop.f32.mrf.mxu1 }
  0xf2   : > { %v470_v48 = vadd.f32 %v469_v46, %v381_v44  ;;  %v476_v49 = vadd.f32 %v475_v47, %v386_v45  ;;  %v551_v46 = vpop.permute.xlu1 %550 }
  0xf3   : > { %v471_v50 = vpop.f32.mrf.mxu0  ;;  %v477_v51 = vpop.f32.mrf.mxu1 }
  0xf4   : > { %v472_v52 = vadd.f32 %v471_v50, %v381_v44  ;;  %v478_v53 = vadd.f32 %v477_v51, %v386_v45  ;;  %v486_v56 = vadd.f32 %v476_v49, %v470_v48  ;;  %v556_v45 = vpop.permute.xlu0 %555 }
  0xf5   : > { %v481_v55 = vpop.f32.mrf.mxu1 }
  0xf6   : > { %v482_v57 = vadd.f32 %v481_v55, %v391_v54  ;;  %v494_v59 = vadd.f32 %v478_v53, %v472_v52 }
  0xf7   : > { %v483_v58 = vpop.f32.mrf.mxu1 }
  0xf8   : > { %v487_v60 = vadd.f32 %v486_v56, %v482_v57  ;;  %v484_v61 = vadd.f32 %v483_v58, %v391_v54  ;;  %v575_v47 = vpop.permute.xlu0 %574 }
  0xfa   : > { %v488_v62 = vrot.slane %v487_v60, 4  ;;  %v495_v63 = vadd.f32 %v494_v59, %v484_v61 }
  0xfc   : > { %v489_v0 = vadd.f32 %v488_v62, %v487_v60  ;;  %v496_v1 = vrot.slane %v495_v63, 4 }
  0xfe   : > { %v490_v2 = vrot.slane %v489_v0, 2  ;;  %v497_v3 = vadd.f32 %v496_v1, %v495_v63 }
 0x100   : > { %v491_v4 = vadd.f32 %v490_v2, %v489_v0  ;;  %v498_v5 = vrot.slane %v497_v3, 2 }
 0x102   : > { %v492_v6 = vrot.slane %v491_v4, 1  ;;  %v499_v7 = vadd.f32 %v498_v5, %v497_v3 }
 0x104   : > { %v493_v8 = vadd.f32 %v492_v6, %v491_v4  ;;  %v500_v9 = vrot.slane %v499_v7, 1 }
 0x106   : > { %v503_v10 = vmul.f32 0.041666668, %v493_v8  ;;  %v501_v11 = vadd.f32 %v500_v9, %v499_v7 }
 0x108   : > { %v505_v12 = vsub.f32 %v470_v48, %v503_v10  ;;  %v507_v13 = vsub.f32 %v476_v49, %v503_v10  ;;  %v509_v14 = vsub.f32 %v482_v57, %v503_v10  ;;  %v504_v15 = vmul.f32 0.041666668, %v501_v11  ;;  %v561_v48 = vpop.permute.xlu1 %560  ;;  %v585_v57 = vpop.permute.xlu0 %584 }
 0x10a   : > { %v511_v16 = vmul.f32 %v505_v12, %v505_v12  ;;  %v513_v17 = vmul.f32 %v507_v13, %v507_v13  ;;  %v506_v18 = vsub.f32 %v472_v52, %v504_v15  ;;  %v508_v19 = vsub.f32 %v478_v53, %v504_v15 }
 0x10b   : > { %v510_v20 = vsub.f32 %v484_v61, %v504_v15  ;;  %v515_v21 = vmul.f32 %v509_v14, %v509_v14 }
 0x10c   : > { %v517_v22 = vadd.f32 %v513_v17, %v511_v16  ;;  %v512_v23 = vmul.f32 %v506_v18, %v506_v18  ;;  %v514_v24 = vmul.f32 %v508_v19, %v508_v19  ;;  %v580_v58 = vpop.permute.xlu1 %579 }
 0x10d   : > { %v516_v26 = vmul.f32 %v510_v20, %v510_v20 }
 0x10e   : > { %v518_v25 = vadd.f32 %v517_v22, %v515_v21  ;;  %v525_v27 = vadd.f32 %v514_v24, %v512_v23 }
 0x110   : > { %v519_v28 = vrot.slane %v518_v25, 4  ;;  %v526_v29 = vadd.f32 %v525_v27, %v516_v26 }
 0x112   : > { %v520_v30 = vadd.f32 %v519_v28, %v518_v25  ;;  %v527_v31 = vrot.slane %v526_v29, 4 }
 0x114   : > { %v521_v32 = vrot.slane %v520_v30, 2  ;;  %v528_v33 = vadd.f32 %v527_v31, %v526_v29 }
 0x116   : > { %v522_v34 = vadd.f32 %v521_v32, %v520_v30  ;;  %v529_v35 = vrot.slane %v528_v33, 2 }
 0x118   : > { %v523_v36 = vrot.slane %v522_v34, 1  ;;  %v530_v37 = vadd.f32 %v529_v35, %v528_v33 }
 0x11a   : > { %v524_v38 = vadd.f32 %v523_v36, %v522_v34  ;;  %v531_v39 = vrot.slane %v530_v37, 1 }
 0x11c   : > { %v533_v40 = vmul.f32 0.041666668, %v524_v38  ;;  %v532_v41 = vadd.f32 %v531_v39, %v530_v37 }
 0x11e   : > { %v535_v42 = vadd.f32 1e-06, %v533_v40  ;;  %v534_v43 = vmul.f32 0.041666668, %v532_v41 }
 0x120   : > { %784 = vrsqrt.f32 %v535_v42  ;;  %v536_v44 = vadd.f32 1e-06, %v534_v43 }
 0x122   : > { %786 = vrsqrt.f32 %v536_v44 }
 0x12d   : > { %v785_v49 = vpop.eup %784 }
 0x12e   : > { %v539_v50 = vmul.f32 %v785_v49, %v505_v12  ;;  %v543_v51 = vmul.f32 %v785_v49, %v509_v14  ;;  %v541_v52 = vmul.f32 %v785_v49, %v507_v13 }
 0x12f   : > { %v787_v53 = vpop.eup %786 }
 0x130   : > { %v563_v54 = vmul.f32 %v551_v46, %v539_v50  ;;  %v567_v55 = vmul.f32 %v561_v48, %v543_v51  ;;  %v565_v56 = vmul.f32 %v556_v45, %v541_v52  ;;  %v540_v59 = vmul.f32 %v787_v53, %v506_v18 }
 0x131   : > { %v542_v60 = vmul.f32 %v787_v53, %v508_v19  ;;  %v544_v61 = vmul.f32 %v787_v53, %v510_v20 }
 0x132   : > { %v587_v62 = vadd.f32 %v575_v47, %v563_v54  ;;  %v591_v63 = vadd.f32 %v585_v57, %v567_v55  ;;  %v589_v0 = vadd.f32 %v580_v58, %v565_v56  ;;  %v564_v1 = vmul.f32 %v551_v46, %v540_v59 }
 0x133   : > { %v566_v2 = vmul.f32 %v556_v45, %v542_v60  ;;  %v568_v3 = vmul.f32 %v561_v48, %v544_v61 }
 0x134   : > { %593 = vst [vmem:[%s340_s19] sm:$0xff] %v587_v62  ;;  %597 = vst [vmem:[%s340_s19 + $0x20] sm:$0xff] %v591_v63  ;;  %v588_v4 = vadd.f32 %v575_v47, %v564_v1 }
 0x135   : > { %595 = vst [vmem:[%s340_s19 + $0x10] sm:$0xff] %v589_v0  ;;  %v590_v5 = vadd.f32 %v580_v58, %v566_v2  ;;  %v592_v6 = vadd.f32 %v585_v57, %v568_v3 }
 0x136   : > { %594 = vst [vmem:[%s340_s19 + $0x8] sm:$0xff] %v588_v4 }
 0x137   : > { %596 = vst [vmem:[%s340_s19 + $0x18] sm:$0xff] %v590_v5  ;;  %598 = vst [vmem:[%s340_s19 + $0x28] sm:$0xff] %v592_v6 }
 0x138 PF: > { %s17_s23 = sadd.s32 1, %s840_s23   ;;  %s1014_s21 = smov %s836_s22 }
 0x139   : > { %p14_p2 = scmp.ge.s32.totalorder %s17_s23, 4   ;;  %s1015_s22 = smov %s1017_s25 }
 0x13b   :  { %16 = sbr.rel (!%p14_p2) target bundleno = 2 (0x2), region = 82 }
 0x140   :  { %629 = vsyncpa [#allocation3], 1 }
 0x141   :  { %631 = vsyncpa [#allocation3 + $0x1], 1 }

// kernel: decoder_forward.10
= control target key start
LH: loop header
LB: loop body
LE: loop exit
PB: predicated region body
PF: predicated region fallthrough
CT: control target
= control target key end

     0   :  { %11 = vsyncpa [#allocation3], 0  ;;  %s1068_s21 = smov 0   ;;  %s1070_s22 = smov 0   ;;  %s1275_s0 = inlined_call_operand.vmem [shape: f32[2,40,256], index: 0, kind: input, shape index: {}]   ;;  %s1276_s1 = inlined_call_operand.vmem [shape: f32[2,40,256], index: 1, kind: input, shape index: {}]   ;;  %s1277_s2 = inlined_call_operand.hbm [shape: f32[24,40], index: 2, kind: input, shape index: {}]   ;;  %s1278_s3 = inlined_call_operand.vmem [shape: f32[24,1], index: 3, kind: input, shape index: {}]   ;;  %s1279_s4 = inlined_call_operand.vmem [shape: f32[24,1], index: 4, kind: input, shape index: {}]   ;;  %s1280_s5 = inlined_call_operand.vmem [shape: f32[24,1], index: 5, kind: input, shape index: {}]   ;;  %s1281_s6 = inlined_call_operand.vmem [shape: f32[2,24,256], index: 6, kind: output, shape index: {}]  }
   0x1   :  { %s1072_s23 = smov 0  }
   0x2 LB: > { %s878_s24 = sadd.s32 4294967295, %s1026_s23   ;;  %s29_s25 = sadd.s32 1, %s1022_s22  ;;  %s1026_s23 = sphi %s1072_s23, %s17_s23   ;;  %s1022_s22 = sphi %s1070_s22, %s1285_s22   ;;  %s1018_s21 = sphi %s1068_s21, %s1284_s21  }
   0x3   : > { %p31_p0 = scmp.ge.s32.totalorder %s29_s25, 2  ;;  %p880_p1 = scmp.ge.s32.totalorder %s1026_s23, 1 }
   0x4   : > { %p202_p2 = scmp.lt.s32.totalorder %s1026_s23, 3  ;;  %p1093_p4 = scmp.eq.s32.totalorder %s878_s24, 0 }
   0x5   : > { %s1287_s25 = smov (%p31_p0, %s29_s25), 0  ;;  %s1028_s28 = smov [#allocation2]  }
   0x6   : > { %p1089_p3 = pnand %p880_p1, %p202_p2  ;;  %s214_s29 = sshll.u32 %s1028_s28, 4  ;;  %s215_s29 = int_to_ptr.vmem [resolvable:$true] %s214_s29 }
   0x7   : > { %s985_s30 = scalar_lea.vmem %s215_s29, 384  ;;  %p993_p11 = scmp.lt.s32.totalorder %s215_s29, %s215_s29 }
   0x8   : > { %p909_p5 = pneg %p1089_p3  ;;  %p986_p8 = scmp.ne.s32.totalorder %s215_s29, %s985_s30 }
   0x9   : > { %p994_p12 = scmp.lt.s32.totalorder %s985_s30, %s985_s30 }
   0xa   : > { %p910_p6 = pnand %p1093_p4, %p909_p5 }
   0xb   : > { %p995_p13 = por %p994_p12, %p993_p11 }
   0xc   : > { %p976_p7 = pneg %p910_p6 }
   0xe   : > { %p988_p9 = pnand %p986_p8, %p976_p7 }
  0x10   : > { %p989_p10 = pneg %p988_p9 }
  0x12   : > { %p996_p0 = pnand %p995_p13, %p989_p10 }
  0x14   : > { %999 = shalt.err (!%p996_p0)
}
  0x15   : > { %s1029_s7 = smov 128   ;;  %s1030_s8 = smov 8  }
  0x16   : > { %912 = dma.hbm_to_vmem [thread:$0]  (!%p910_p6), %s1277_s2, 384, %s215_s29, [#allocation3], %s1029_s7, %s1029_s7, %s1030_s8  }
  0x17   : > { %265 = sbr.rel (%p1089_p3) target bundleno = 365 (0x16d), region = 44 }
  0x1c   : > { %1013 = dma.done.wait (%p1093_p4), [#allocation3], 384  }
  0x1d   : > { %1015 = vsyncadd (%p1093_p4), [#allocation3], 4294966912  ;;  %p313_p1 = scmp.lt.s32.totalorder %s1018_s21, 1  ;;  %v1031_v0 = vmov 0.0   ;;  %v1032_v1 = vmov 0   ;;  %v372_v32 = vld [vmem:[#allocation2] sm:$0xff] }
  0x1e   : > { %467 = vmatprep.mubr.f32.mxu0 %v1031_v0  ;;  %473 = vmatprep.mubr.f32.mxu1 %v1031_v0  ;;  %vm393_vm0 = vcmask 326656   ;;  %v373_v33 = vld [vmem:[#allocation2 + $0x8] sm:$0xff]  ;;  %v375_v34 = vld [vmem:[%s1278_s3] sm:$0xff]  ;;  %v377_v35 = vld [vmem:[%s1278_s3 + $0x10] sm:$0xff] }
  0x1f   : > { %s1289_s21 = smov (!%p313_p1, %s1018_s21), 1  ;;  %944 = vset.pattern.permute.xlu0 %v1032_v1  ;;  %945 = vset.pattern.permute.xlu1 %v1032_v1  ;;  %v374_v36 = vld [vmem:[#allocation2 + $0x10] sm:$0xff]  ;;  %v376_v37 = vld [vmem:[%s1278_s3 + $0x8] sm:$0xff]  ;;  %v545_v38 = vld [vmem:[%s1279_s4] sm:$0xff] }
  0x20   : > { %s903_s11 = smul.u32 80, %s1289_s21  ;;  %380 = vperm.xlu0 %944, %v375_v34   ;;  %390 = vperm.xlu1 %945, %v377_v35   ;;  %v546_v39 = vld [vmem:[%s1279_s4 + $0x8] sm:$0xff]  ;;  %v547_v40 = vld [vmem:[%s1279_s4 + $0x10] sm:$0xff]  ;;  %v569_v41 = vld [vmem:[%s1280_s5] sm:$0xff] }
  0x21   : > { %v570_v42 = vld [vmem:[%s1280_s5 + $0x8] sm:$0xff]  ;;  %v571_v43 = vld [vmem:[%s1280_s5 + $0x10] sm:$0xff]  ;;  %s904_s16 = smul.u32 48, %s1289_s21 }
  0x22   : > { %s1120_s14 = scalar_lea.vmem %s1275_s0, %s903_s11  ;;  %s1125_s17 = scalar_lea.vmem %s1276_s1, %s903_s11 }
  0x23   : > { %v351_v2 = vld [vmem:[%s1120_s14 + $0x48] sm:$0xff]  ;;  %v350_v4 = vld [vmem:[%s1120_s14 + $0x40] sm:$0xff]  ;;  %v349_v7 = vld [vmem:[%s1120_s14 + $0x38] sm:$0xff]  ;;  %s1250_s18 = scalar_lea.vmem %s1281_s6, %s904_s16 }
  0x24   : > { %v361_v3 = vld [vmem:[%s1125_s17 + $0x48] sm:$0xff]  ;;  %v360_v6 = vld [vmem:[%s1125_s17 + $0x40] sm:$0xff]  ;;  %v359_v8 = vld [vmem:[%s1125_s17 + $0x38] sm:$0xff]  ;;  %385 = vperm.xlu0 %944, %v376_v37   ;;  %550 = vperm.xlu1 %945, %v545_v38  }
  0x25   : > { %v371_v5 = vmul.f32 %v361_v3, %v351_v2  ;;  %v370_v9 = vmul.f32 %v360_v6, %v350_v4  ;;  %v369_v10 = vmul.f32 %v359_v8, %v349_v7  ;;  %v348_v11 = vld [vmem:[%s1120_s14 + $0x30] sm:$0xff]  ;;  %v347_v13 = vld [vmem:[%s1120_s14 + $0x28] sm:$0xff]  ;;  %v346_v16 = vld [vmem:[%s1120_s14 + $0x20] sm:$0xff] }
  0x26   : > { %v358_v12 = vld [vmem:[%s1125_s17 + $0x30] sm:$0xff]  ;;  %v357_v15 = vld [vmem:[%s1125_s17 + $0x28] sm:$0xff]  ;;  %v356_v17 = vld [vmem:[%s1125_s17 + $0x20] sm:$0xff] }
  0x27   : > { %425 = vmatprep.subr.mxu0 %v371_v5  ;;  %893 = vmatprep.subr.mxu1 %v371_v5  ;;  %v368_v14 = vmul.f32 %v358_v12, %v348_v11  ;;  %v367_v18 = vmul.f32 %v357_v15, %v347_v13  ;;  %v366_v19 = vmul.f32 %v356_v17, %v346_v16  ;;  %v345_v20 = vld [vmem:[%s1120_s14 + $0x18] sm:$0xff]  ;;  %v344_v22 = vld [vmem:[%s1120_s14 + $0x10] sm:$0xff]  ;;  %v343_v25 = vld [vmem:[%s1120_s14 + $0x8] sm:$0xff] }
  0x28   : > { %426 = vmatpush1.msra.mxu0 %v370_v9  ;;  %898 = vmatpush1.msra.mxu1 %v370_v9  ;;  %v355_v21 = vld [vmem:[%s1125_s17 + $0x18] sm:$0xff]  ;;  %v354_v24 = vld [vmem:[%s1125_s17 + $0x10] sm:$0xff]  ;;  %v353_v26 = vld [vmem:[%s1125_s17 + $0x8] sm:$0xff] }
  0x29   : > { %427 = vmatprep.subr.mxu0 %v369_v10  ;;  %894 = vmatprep.subr.mxu1 %v369_v10  ;;  %v365_v23 = vmul.f32 %v355_v21, %v345_v20  ;;  %v364_v27 = vmul.f32 %v354_v24, %v344_v22  ;;  %v342_v28 = vld [vmem:[%s1120_s14] sm:$0xff]  ;;  %v363_v30 = vmul.f32 %v353_v26, %v343_v25 }
  0x2a   : > { %428 = vmatpush1.msra.mxu0 %v368_v14  ;;  %899 = vmatpush1.msra.mxu1 %v368_v14  ;;  %v352_v29 = vld [vmem:[%s1125_s17] sm:$0xff] }
  0x2b   : > { %429 = vmatprep.subr.mxu0 %v367_v18  ;;  %895 = vmatprep.subr.mxu1 %v367_v18  ;;  %v362_v31 = vmul.f32 %v352_v29, %v342_v28 }
  0x2c   : > { %430 = vmatpush1.msra.mxu0 %v366_v19  ;;  %900 = vmatpush1.msra.mxu1 %v366_v19 }
  0x2d   : > { %431 = vmatprep.subr.mxu0 %v365_v23  ;;  %896 = vmatprep.subr.mxu1 %v365_v23 }
  0x2e   : > { %432 = vmatpush1.msra.mxu0 %v364_v27  ;;  %901 = vmatpush1.msra.mxu1 %v364_v27 }
  0x2f   : > { %433 = vmatprep.subr.mxu0 %v363_v30  ;;  %897 = vmatprep.subr.mxu1 %v363_v30 }
  0x30   : > { %434 = vmatpush1.msra.mxu0 %v362_v31  ;;  %902 = vmatpush1.msra.mxu1 %v362_v31 }
  0x31   : > { %888 = vmatmul.mubr.msk.f32.vlgmr.msra.gmra.mxu0 %vm393_vm0, %v372_v32  ;;  %889 = vmatmul.mubr.msk.f32.vlgmr.msra.gmra.mxu1 %vm393_vm0, %v373_v33 }
  0x32   : > { %479 = vmatprep.mubr.f32.mxu1 %v1031_v0  ;;  %555 = vperm.xlu0 %944, %v546_v39  }
  0x33   : > { %560 = vperm.xlu1 %945, %v547_v40  }
  0x35   : > { %890 = vmatmul.mubr.msk.f32.gmra.mxu1 %vm393_vm0, %v374_v36 }
  0x36   : > { %574 = vperm.xlu0 %944, %v569_v41  }
  0x37   : > { %579 = vperm.xlu1 %945, %v570_v42  }
  0x3a   : > { %584 = vperm.xlu0 %944, %v571_v43  }
  0x9b   : > { %v381_v44 = vpop.permute.xlu0 %380  ;;  %v391_v54 = vpop.permute.xlu1 %390 }
  0x9f   : > { %v386_v45 = vpop.permute.xlu0 %385 }
  0xf1   : > { %v469_v46 = vpop.f32.mrf.mxu0  ;;  %v475_v47 = vpop.f32.mrf.mxu1 }
  0xf2   : > { %v470_v48 = vadd.f32 %v469_v46, %v381_v44  ;;  %v476_v49 = vadd.f32 %v475_v47, %v386_v45  ;;  %v551_v46 = vpop.permute.xlu1 %550 }
  0xf3   : > { %v471_v50 = vpop.f32.mrf.mxu0  ;;  %v477_v51 = vpop.f32.mrf.mxu1 }
  0xf4   : > { %v472_v52 = vadd.f32 %v471_v50, %v381_v44  ;;  %v478_v53 = vadd.f32 %v477_v51, %v386_v45  ;;  %v486_v56 = vadd.f32 %v476_v49, %v470_v48  ;;  %v556_v45 = vpop.permute.xlu0 %555 }
  0xf5   : > { %v481_v55 = vpop.f32.mrf.mxu1 }
  0xf6   : > { %v482_v57 = vadd.f32 %v481_v55, %v391_v54  ;;  %v494_v59 = vadd.f32 %v478_v53, %v472_v52 }
  0xf7   : > { %v483_v58 = vpop.f32.mrf.mxu1 }
  0xf8   : > { %v487_v60 = vadd.f32 %v486_v56, %v482_v57  ;;  %v484_v61 = vadd.f32 %v483_v58, %v391_v54  ;;  %v575_v47 = vpop.permute.xlu0 %574 }
  0xfa   : > { %v488_v62 = vrot.slane %v487_v60, 4  ;;  %v495_v63 = vadd.f32 %v494_v59, %v484_v61 }
  0xfc   : > { %v489_v0 = vadd.f32 %v488_v62, %v487_v60  ;;  %v496_v1 = vrot.slane %v495_v63, 4 }
  0xfe   : > { %v490_v2 = vrot.slane %v489_v0, 2  ;;  %v497_v3 = vadd.f32 %v496_v1, %v495_v63 }
 0x100   : > { %v491_v4 = vadd.f32 %v490_v2, %v489_v0  ;;  %v498_v5 = vrot.slane %v497_v3, 2 }
 0x102   : > { %v492_v6 = vrot.slane %v491_v4, 1  ;;  %v499_v7 = vadd.f32 %v498_v5, %v497_v3 }
 0x104   : > { %v493_v8 = vadd.f32 %v492_v6, %v491_v4  ;;  %v500_v9 = vrot.slane %v499_v7, 1 }
 0x106   : > { %v503_v10 = vmul.f32 0.041666668, %v493_v8  ;;  %v501_v11 = vadd.f32 %v500_v9, %v499_v7 }
 0x108   : > { %v505_v12 = vsub.f32 %v470_v48, %v503_v10  ;;  %v507_v13 = vsub.f32 %v476_v49, %v503_v10  ;;  %v509_v14 = vsub.f32 %v482_v57, %v503_v10  ;;  %v504_v15 = vmul.f32 0.041666668, %v501_v11  ;;  %v561_v48 = vpop.permute.xlu1 %560  ;;  %v585_v57 = vpop.permute.xlu0 %584 }
 0x10a   : > { %v511_v16 = vmul.f32 %v505_v12, %v505_v12  ;;  %v513_v17 = vmul.f32 %v507_v13, %v507_v13  ;;  %v506_v18 = vsub.f32 %v472_v52, %v504_v15  ;;  %v508_v19 = vsub.f32 %v478_v53, %v504_v15 }
 0x10b   : > { %v510_v20 = vsub.f32 %v484_v61, %v504_v15  ;;  %v515_v21 = vmul.f32 %v509_v14, %v509_v14 }
 0x10c   : > { %v517_v22 = vadd.f32 %v513_v17, %v511_v16  ;;  %v512_v23 = vmul.f32 %v506_v18, %v506_v18  ;;  %v514_v24 = vmul.f32 %v508_v19, %v508_v19  ;;  %v580_v58 = vpop.permute.xlu1 %579 }
 0x10d   : > { %v516_v26 = vmul.f32 %v510_v20, %v510_v20 }
 0x10e   : > { %v518_v25 = vadd.f32 %v517_v22, %v515_v21  ;;  %v525_v27 = vadd.f32 %v514_v24, %v512_v23 }
 0x110   : > { %v519_v28 = vrot.slane %v518_v25, 4  ;;  %v526_v29 = vadd.f32 %v525_v27, %v516_v26 }
 0x112   : > { %v520_v30 = vadd.f32 %v519_v28, %v518_v25  ;;  %v527_v31 = vrot.slane %v526_v29, 4 }
 0x114   : > { %v521_v32 = vrot.slane %v520_v30, 2  ;;  %v528_v33 = vadd.f32 %v527_v31, %v526_v29 }
 0x116   : > { %v522_v34 = vadd.f32 %v521_v32, %v520_v30  ;;  %v529_v35 = vrot.slane %v528_v33, 2 }
 0x118   : > { %v523_v36 = vrot.slane %v522_v34, 1  ;;  %v530_v37 = vadd.f32 %v529_v35, %v528_v33 }
 0x11a   : > { %v524_v38 = vadd.f32 %v523_v36, %v522_v34  ;;  %v531_v39 = vrot.slane %v530_v37, 1 }
 0x11c   : > { %v533_v40 = vmul.f32 0.041666668, %v524_v38  ;;  %v532_v41 = vadd.f32 %v531_v39, %v530_v37 }
 0x11e   : > { %v535_v42 = vadd.f32 1e-06, %v533_v40  ;;  %v534_v43 = vmul.f32 0.041666668, %v532_v41 }
 0x120   : > { %946 = vrsqrt.f32 %v535_v42  ;;  %v536_v44 = vadd.f32 1e-06, %v534_v43 }
 0x122   : > { %948 = vrsqrt.f32 %v536_v44 }
 0x12d   : > { %v947_v49 = vpop.eup %946 }
 0x12e   : > { %v539_v50 = vmul.f32 %v947_v49, %v505_v12  ;;  %v543_v51 = vmul.f32 %v947_v49, %v509_v14  ;;  %v541_v52 = vmul.f32 %v947_v49, %v507_v13 }
 0x12f   : > { %v949_v53 = vpop.eup %948 }
 0x130   : > { %v563_v54 = vmul.f32 %v551_v46, %v539_v50  ;;  %v567_v55 = vmul.f32 %v561_v48, %v543_v51  ;;  %v565_v56 = vmul.f32 %v556_v45, %v541_v52  ;;  %v540_v59 = vmul.f32 %v949_v53, %v506_v18 }
 0x131   : > { %v542_v60 = vmul.f32 %v949_v53, %v508_v19  ;;  %v544_v61 = vmul.f32 %v949_v53, %v510_v20 }
 0x132   : > { %v1178_v62 = vadd.f32 %v575_v47, %v563_v54  ;;  %v1180_v63 = vadd.f32 %v585_v57, %v567_v55  ;;  %v1182_v0 = vadd.f32 %v580_v58, %v565_v56  ;;  %v564_v1 = vmul.f32 %v551_v46, %v540_v59 }
 0x133   : > { %v566_v2 = vmul.f32 %v556_v45, %v542_v60  ;;  %v568_v3 = vmul.f32 %v561_v48, %v544_v61 }
 0x134   : > { %v1185_v4 = vmul.f32 0.70710677, %v1178_v62  ;;  %v1188_v5 = vmul.f32 0.70710677, %v1180_v63  ;;  %v1191_v6 = vmul.f32 0.70710677, %v1182_v0  ;;  %v1193_v7 = vadd.f32 %v575_v47, %v564_v1 }
 0x135   : > { %v1195_v8 = vadd.f32 %v580_v58, %v566_v2  ;;  %v1200_v12 = vadd.f32 %v585_v57, %v568_v3 }
 0x136   : > { %v599_v9 = vand.u32 2147483647, %v1185_v4  ;;  %v603_v10 = vand.u32 2147483647, %v1188_v5  ;;  %v601_v11 = vand.u32 2147483647, %v1191_v6 }
 0x137   : > { %v1203_v13 = vmul.f32 0.70710677, %v1193_v7  ;;  %v1206_v17 = vmul.f32 0.70710677, %v1195_v8  ;;  %v1209_v20 = vmul.f32 0.70710677, %v1200_v12 }
 0x138   : > { %v605_v14 = vmul.f32 0.3275911, %v599_v9  ;;  %v609_v15 = vmul.f32 0.3275911, %v603_v10  ;;  %v607_v16 = vmul.f32 0.3275911, %v601_v11 }
 0x139   : > { %v600_v21 = vand.u32 2147483647, %v1203_v13  ;;  %v602_v23 = vand.u32 2147483647, %v1206_v17  ;;  %v604_v24 = vand.u32 2147483647, %v1209_v20 }
 0x13a   : > { %v611_v18 = vadd.f32 1.0, %v605_v14  ;;  %v615_v19 = vadd.f32 1.0, %v609_v15  ;;  %v613_v22 = vadd.f32 1.0, %v607_v16  ;;  %v683_v31 = vsub.f32 0.0, %v599_v9 }
 0x13b   : > { %v606_v25 = vmul.f32 0.3275911, %v600_v21  ;;  %v608_v26 = vmul.f32 0.3275911, %v602_v23  ;;  %v610_v27 = vmul.f32 0.3275911, %v604_v24 }
 0x13c   : > { %950 = vrcp.f32 %v611_v18  ;;  %v687_v32 = vsub.f32 0.0, %v603_v10  ;;  %v685_v33 = vsub.f32 0.0, %v601_v11  ;;  %v684_v34 = vsub.f32 0.0, %v600_v21 }
 0x13d   : > { %952 = vrcp.f32 %v615_v19  ;;  %v612_v28 = vadd.f32 1.0, %v606_v25  ;;  %v614_v29 = vadd.f32 1.0, %v608_v26  ;;  %v616_v30 = vadd.f32 1.0, %v610_v27 }
 0x13e   : > { %954 = vrcp.f32 %v613_v22  ;;  %v689_v35 = vmul.f32 %v683_v31, %v599_v9  ;;  %v693_v36 = vmul.f32 %v687_v32, %v603_v10  ;;  %v686_v37 = vsub.f32 0.0, %v602_v23 }
 0x13f   : > { %956 = vrcp.f32 %v612_v28  ;;  %v691_v38 = vmul.f32 %v685_v33, %v601_v11  ;;  %v688_v40 = vsub.f32 0.0, %v604_v24  ;;  %v690_v41 = vmul.f32 %v684_v34, %v600_v21 }
 0x140   : > { %958 = vrcp.f32 %v614_v29  ;;  %v695_v44 = vmul.f32 1.442695, %v689_v35  ;;  %v703_v46 = vmul.f32 1.442695, %v693_v36  ;;  %v692_v47 = vmul.f32 %v686_v37, %v602_v23 }
 0x141   : > { %960 = vrcp.f32 %v616_v30  ;;  %v699_v49 = vmul.f32 1.442695, %v691_v38  ;;  %v694_v52 = vmul.f32 %v688_v40, %v604_v24  ;;  %v697_v53 = vmul.f32 1.442695, %v690_v41 }
 0x142   : > { %962 = vpow2.f32 %v695_v44  ;;  %v701_v58 = vmul.f32 1.442695, %v692_v47  ;;  %vm719_vm1 = vcmp.ge.f32.partialorder %v1185_v4, 0.0  ;;  %vm723_vm2 = vcmp.ge.f32.partialorder %v1188_v5, 0.0 }
 0x143   : > { %964 = vpow2.f32 %v703_v46  ;;  %v705_v10 = vmul.f32 1.442695, %v694_v52  ;;  %vm721_vm3 = vcmp.ge.f32.partialorder %v1191_v6, 0.0  ;;  %vm720_vm4 = vcmp.ge.f32.partialorder %v1203_v13, 0.0 }
 0x144   : > { %966 = vpow2.f32 %v699_v49  ;;  %vm722_vm5 = vcmp.ge.f32.partialorder %v1206_v17, 0.0  ;;  %vm724_vm6 = vcmp.ge.f32.partialorder %v1209_v20, 0.0 }
 0x145   : > { %968 = vpow2.f32 %v697_v53 }
 0x146   : > { %970 = vpow2.f32 %v701_v58 }
 0x147   : > { %972 = vpow2.f32 %v705_v10 }
 0x149   : > { %v951_v39 = vpop.eup %950 }
 0x14a   : > { %v953_v42 = vpop.eup %952  ;;  %v629_v43 = vmul.f32 1.0614054, %v951_v39 }
 0x14b   : > { %v633_v45 = vmul.f32 1.0614054, %v953_v42  ;;  %v1214_v50 = vpop.eup %954 }
 0x14c   : > { %v635_v48 = vadd.f32 -1.4531521, %v629_v43  ;;  %v631_v55 = vmul.f32 1.0614054, %v1214_v50  ;;  %v1217_v56 = vpop.eup %956 }
 0x14d   : > { %v639_v51 = vadd.f32 -1.4531521, %v633_v45  ;;  %v1219_v59 = vpop.eup %958  ;;  %v630_v1 = vmul.f32 1.0614054, %v1217_v56 }
 0x14e   : > { %v641_v54 = vmul.f32 %v951_v39, %v635_v48  ;;  %v637_v61 = vadd.f32 -1.4531521, %v631_v55  ;;  %v1222_v2 = vpop.eup %960  ;;  %v632_v9 = vmul.f32 1.0614054, %v1219_v59 }
 0x14f   : > { %v645_v57 = vmul.f32 %v953_v42, %v639_v51  ;;  %v634_v15 = vmul.f32 1.0614054, %v1222_v2  ;;  %v636_v16 = vadd.f32 -1.4531521, %v630_v1  ;;  %v963_v45 = vpop.eup %962 }
 0x150   : > { %v647_v60 = vadd.f32 1.4214138, %v641_v54  ;;  %v643_v14 = vmul.f32 %v1214_v50, %v637_v61  ;;  %v638_v19 = vadd.f32 -1.4531521, %v632_v9  ;;  %v965_v48 = vpop.eup %964 }
 0x151   : > { %v651_v3 = vadd.f32 1.4214138, %v645_v57  ;;  %v640_v23 = vadd.f32 -1.4531521, %v634_v15  ;;  %v642_v24 = vmul.f32 %v1217_v56, %v636_v16  ;;  %v967_v54 = vpop.eup %966 }
 0x152   : > { %v653_v11 = vmul.f32 %v951_v39, %v647_v60  ;;  %v649_v22 = vadd.f32 1.4214138, %v643_v14  ;;  %v644_v26 = vmul.f32 %v1219_v59, %v638_v19 }
 0x153   : > { %v657_v18 = vmul.f32 %v953_v42, %v651_v3  ;;  %v646_v29 = vmul.f32 %v1222_v2, %v640_v23  ;;  %v648_v30 = vadd.f32 1.4214138, %v642_v24  ;;  %v737_v3 = vmul.f32 0.5, %v1178_v62 }
 0x154   : > { %v659_v21 = vadd.f32 -0.28449672, %v653_v11  ;;  %v655_v28 = vmul.f32 %v1214_v50, %v649_v22  ;;  %v650_v32 = vadd.f32 1.4214138, %v644_v26 }
 0x155   : > { %v663_v25 = vadd.f32 -0.28449672, %v657_v18  ;;  %v652_v35 = vadd.f32 1.4214138, %v646_v29  ;;  %v654_v36 = vmul.f32 %v1217_v56, %v648_v30 }
 0x156   : > { %v665_v27 = vmul.f32 %v951_v39, %v659_v21  ;;  %v661_v34 = vadd.f32 -0.28449672, %v655_v28  ;;  %v656_v38 = vmul.f32 %v1219_v59, %v650_v32  ;;  %v739_v32 = vmul.f32 0.5, %v1182_v0 }
 0x157   : > { %v669_v31 = vmul.f32 %v953_v42, %v663_v25  ;;  %v658_v43 = vmul.f32 %v1222_v2, %v652_v35  ;;  %v660_v44 = vadd.f32 -0.28449672, %v654_v36  ;;  %v741_v25 = vmul.f32 0.5, %v1180_v63 }
 0x158   : > { %v671_v33 = vadd.f32 0.2548296, %v665_v27  ;;  %v667_v41 = vmul.f32 %v1214_v50, %v661_v34  ;;  %v662_v47 = vadd.f32 -0.28449672, %v656_v38  ;;  %v738_v38 = vmul.f32 0.5, %v1193_v7 }
 0x159   : > { %v675_v37 = vadd.f32 0.2548296, %v669_v31  ;;  %v664_v52 = vadd.f32 -0.28449672, %v658_v43  ;;  %v666_v53 = vmul.f32 %v1217_v56, %v660_v44  ;;  %v742_v43 = vmul.f32 0.5, %v1200_v12 }
 0x15a   : > { %v677_v40 = vmul.f32 %v951_v39, %v671_v33  ;;  %v673_v51 = vadd.f32 0.2548296, %v667_v41  ;;  %v668_v57 = vmul.f32 %v1219_v59, %v662_v47  ;;  %v969_v39 = vpop.eup %968  ;;  %v740_v41 = vmul.f32 0.5, %v1195_v8 }
 0x15b   : > { %v681_v46 = vmul.f32 %v953_v42, %v675_v37  ;;  %v670_v61 = vmul.f32 %v1222_v2, %v664_v52  ;;  %v672_v1 = vadd.f32 0.2548296, %v666_v53  ;;  %v971_v10 = vpop.eup %970 }
 0x15c   : > { %v707_v49 = vmul.f32 %v963_v45, %v677_v40  ;;  %v679_v60 = vmul.f32 %v1214_v50, %v673_v51  ;;  %v674_v9 = vadd.f32 0.2548296, %v668_v57  ;;  %v973_v19 = vpop.eup %972 }
 0x15d   : > { %v711_v55 = vmul.f32 %v965_v48, %v681_v46  ;;  %v676_v15 = vadd.f32 0.2548296, %v670_v61  ;;  %v678_v16 = vmul.f32 %v1217_v56, %v672_v1 }
 0x15e   : > { %v713_v58 = vsub.f32 1.0, %v707_v49  ;;  %v709_v14 = vmul.f32 %v967_v54, %v679_v60  ;;  %v680_v50 = vmul.f32 %v1219_v59, %v674_v9 }
 0x15f   : > { %v717_v42 = vsub.f32 1.0, %v711_v55  ;;  %v682_v62 = vmul.f32 %v1222_v2, %v676_v15  ;;  %v708_v23 = vmul.f32 %v969_v39, %v678_v16 }
 0x160   : > { %v725_v11 = vsub.f32 0.0, %v713_v58  ;;  %v715_v22 = vsub.f32 1.0, %v709_v14  ;;  %v710_v27 = vmul.f32 %v971_v10, %v680_v50 }
 0x161   : > { %v729_v18 = vsub.f32 0.0, %v717_v42  ;;  %v712_v56 = vmul.f32 %v973_v19, %v682_v62  ;;  %v714_v59 = vsub.f32 1.0, %v708_v23 }
 0x162   : > { %v731_v21 = vsel %vm719_vm1, %v713_v58, %v725_v11  ;;  %v727_v5 = vsub.f32 0.0, %v715_v22  ;;  %v716_v2 = vsub.f32 1.0, %v710_v27 }
 0x163   : > { %v735_v24 = vsel %vm723_vm2, %v717_v42, %v729_v18  ;;  %v743_v26 = vadd.f32 1.0, %v731_v21  ;;  %v718_v63 = vsub.f32 1.0, %v712_v56  ;;  %v726_v31 = vsub.f32 0.0, %v714_v59 }
 0x164   : > { %v747_v4 = vadd.f32 1.0, %v735_v24  ;;  %v733_v30 = vsel %vm721_vm3, %v715_v22, %v727_v5  ;;  %v728_v34 = vsub.f32 0.0, %v716_v2 }
 0x165   : > { %v749_v28 = vmul.f32 %v743_v26, %v737_v3  ;;  %v745_v33 = vadd.f32 1.0, %v733_v30  ;;  %v730_v6 = vsub.f32 0.0, %v718_v63  ;;  %v732_v35 = vsel %vm720_vm4, %v714_v59, %v726_v31 }
 0x166   : > { %v753_v29 = vmul.f32 %v747_v4, %v741_v25  ;;  %v734_v37 = vsel %vm722_vm5, %v716_v2, %v728_v34  ;;  %v744_v0 = vadd.f32 1.0, %v732_v35 }
 0x167   : > { %755 = vst [vmem:[%s1250_s18] sm:$0xff] %v749_v28  ;;  %v751_v36 = vmul.f32 %v745_v33, %v739_v32  ;;  %v736_v40 = vsel %vm724_vm6, %v718_v63, %v730_v6  ;;  %v746_v13 = vadd.f32 1.0, %v734_v37 }
 0x168   : > { %759 = vst [vmem:[%s1250_s18 + $0x20] sm:$0xff] %v753_v29  ;;  %v748_v17 = vadd.f32 1.0, %v736_v40  ;;  %v750_v44 = vmul.f32 %v744_v0, %v738_v38 }
 0x169   : > { %757 = vst [vmem:[%s1250_s18 + $0x10] sm:$0xff] %v751_v36  ;;  %v752_v20 = vmul.f32 %v746_v13, %v740_v41 }
 0x16a   : > { %v754_v45 = vmul.f32 %v748_v17, %v742_v43  ;;  %756 = vst [vmem:[%s1250_s18 + $0x8] sm:$0xff] %v750_v44 }
 0x16b   : > { %758 = vst [vmem:[%s1250_s18 + $0x18] sm:$0xff] %v752_v20 }
 0x16c   : > { %760 = vst [vmem:[%s1250_s18 + $0x28] sm:$0xff] %v754_v45 }
 0x16d PF: > { %s17_s23 = sadd.s32 1, %s1026_s23   ;;  %s1284_s21 = smov %s1022_s22 }
 0x16e   : > { %p14_p2 = scmp.ge.s32.totalorder %s17_s23, 4   ;;  %s1285_s22 = smov %s1287_s25 }
 0x170   :  { %16 = sbr.rel (!%p14_p2) target bundleno = 2 (0x2), region = 82 }
 0x175   :  { %791 = vsyncpa [#allocation3], 1 }
 0x176   :  { %793 = vsyncpa [#allocation3 + $0x1], 1 }

// kernel: decoder_forward.15
= control target key start
LH: loop header
LB: loop body
LE: loop exit
PB: predicated region body
PF: predicated region fallthrough
CT: control target
= control target key end

     0   :  { %s958_s21 = smov 0   ;;  %s960_s22 = smov 0   ;;  %s1102_s0 = inlined_call_operand.vmem [shape: f32[2,24,1024], index: 0, kind: input, shape index: {}]   ;;  %s1103_s1 = inlined_call_operand.vmem [shape: f32[2,24,1024], index: 1, kind: input, shape index: {}]   ;;  %s1104_s2 = inlined_call_operand.vmem [shape: f32[12,24], index: 2, kind: input, shape index: {}]   ;;  %s1105_s3 = inlined_call_operand.vmem [shape: f32[12,1], index: 3, kind: input, shape index: {}]   ;;  %s1106_s4 = inlined_call_operand.vmem [shape: f32[12,1], index: 4, kind: input, shape index: {}]   ;;  %s1107_s5 = inlined_call_operand.vmem [shape: f32[12,1], index: 5, kind: input, shape index: {}]   ;;  %s1108_s6 = inlined_call_operand.vmem [shape: f32[2,12,1024], index: 6, kind: output, shape index: {}]  }
   0x1   :  { %s962_s23 = smov 0  }
   0x2 LB: > { %s28_s4 = sadd.s32 1, %s915_s22  ;;  %p853_p0 = scmp.ge.s32.totalorder %s919_s23, 1  ;;  %s919_s23 = sphi %s962_s23, %s16_s23   ;;  %s915_s22 = sphi %s960_s22, %s1110_s22   ;;  %s911_s21 = sphi %s958_s21, %s1109_s21  }
   0x3   : > { %p30_p1 = scmp.ge.s32.totalorder %s28_s4, 2  ;;  %p250_p2 = scmp.lt.s32.totalorder %s919_s23, 3 }
   0x5   : > { %s1112_s4 = smov (%p30_p1, %s28_s4), 0  ;;  %p251_p3 = pnand %p853_p0, %p250_p2 }
   0x6   : > { %p298_p4 = scmp.lt.s32.totalorder (!%p251_p3), %s911_s21, 1 }
   0x7   : > { %254 = sbr.rel (%p251_p3) target bundleno = 240 (0xf0), region = 44 }
   0xc   : > { %v921_v0 = vmov 0.0   ;;  %v401_v1 = vld [vmem:[%s1105_s3] sm:$0xff]  ;;  %s1114_s21 = smov (!%p298_p4, %s911_s21), 1  ;;  %v922_v2 = vmov 0   ;;  %v402_v3 = vld [vmem:[%s1105_s3 + $0x8] sm:$0xf] }
   0xd   : > { %484 = vmatprep.mubr.f32.mxu0 %v921_v0  ;;  %561 = vmatprep.mubr.f32.mxu1 %v921_v0  ;;  %s869_s25 = smul.u32 192, %s1114_s21  ;;  %v1021_v34 = vld [vmem:[%s1104_s2] sm:$0xff]  ;;  %vm413_vm0 = vcmask 195584   ;;  %v400_v57 = vld [vmem:[%s1104_s2 + $0x8] sm:$0xf]  ;;  %s868_s14 = sshll.u32 %s1114_s21, 7 }
   0xe   : > { %896 = vset.pattern.permute.xlu0 %v922_v2  ;;  %s1075_s17 = scalar_lea.vmem %s1108_s6, %s868_s14 }
   0xf   : > { %405 = vperm.xlu0 %896, %v401_v1   ;;  %s990_s30 = scalar_lea.vmem %s1102_s0, %s869_s25  ;;  %s995_s9 = scalar_lea.vmem %s1103_s1, %s869_s25 }
  0x10   : > { %v344_v4 = vld [vmem:[%s990_s30 + $0x88] sm:$0xff]  ;;  %v346_v6 = vld [vmem:[%s990_s30 + $0x98] sm:$0xff]  ;;  %v343_v9 = vld [vmem:[%s990_s30 + $0x80] sm:$0xff] }
  0x11   : > { %v368_v5 = vld [vmem:[%s995_s9 + $0x88] sm:$0xff]  ;;  %v370_v8 = vld [vmem:[%s995_s9 + $0x98] sm:$0xff]  ;;  %v367_v10 = vld [vmem:[%s995_s9 + $0x80] sm:$0xff] }
  0x12   : > { %v392_v7 = vmul.f32 %v368_v5, %v344_v4  ;;  %v394_v11 = vmul.f32 %v370_v8, %v346_v6  ;;  %v391_v12 = vmul.f32 %v367_v10, %v343_v9  ;;  %v345_v13 = vld [vmem:[%s990_s30 + $0x90] sm:$0xff]  ;;  %v336_v15 = vld [vmem:[%s990_s30 + $0x48] sm:$0xff]  ;;  %v338_v18 = vld [vmem:[%s990_s30 + $0x58] sm:$0xff] }
  0x13   : > { %410 = vperm.xlu0 %896, %v402_v3   ;;  %v369_v14 = vld [vmem:[%s995_s9 + $0x90] sm:$0xff]  ;;  %v360_v17 = vld [vmem:[%s995_s9 + $0x48] sm:$0xff]  ;;  %v362_v19 = vld [vmem:[%s995_s9 + $0x58] sm:$0xff] }
  0x14   : > { %446 = vmatprep.subr.mxu0 %v392_v7  ;;  %v393_v16 = vmul.f32 %v369_v14, %v345_v13  ;;  %523 = vmatprep.subr.mxu1 %v394_v11  ;;  %v384_v20 = vmul.f32 %v360_v17, %v336_v15  ;;  %v386_v21 = vmul.f32 %v362_v19, %v338_v18  ;;  %v335_v22 = vld [vmem:[%s990_s30 + $0x40] sm:$0xff]  ;;  %v337_v24 = vld [vmem:[%s990_s30 + $0x50] sm:$0xff]  ;;  %v328_v27 = vld [vmem:[%s990_s30 + $0x8] sm:$0xff] }
  0x15   : > { %447 = vmatpush1.msra.mxu0 %v391_v12  ;;  %v359_v23 = vld [vmem:[%s995_s9 + $0x40] sm:$0xff]  ;;  %v361_v26 = vld [vmem:[%s995_s9 + $0x50] sm:$0xff]  ;;  %v352_v28 = vld [vmem:[%s995_s9 + $0x8] sm:$0xff] }
  0x16   : > { %524 = vmatpush1.msra.mxu1 %v393_v16  ;;  %v383_v25 = vmul.f32 %v359_v23, %v335_v22  ;;  %448 = vmatprep.subr.mxu0 %v384_v20  ;;  %v385_v29 = vmul.f32 %v361_v26, %v337_v24  ;;  %v376_v30 = vmul.f32 %v352_v28, %v328_v27  ;;  %v330_v31 = vld [vmem:[%s990_s30 + $0x18] sm:$0xff]  ;;  %v327_v33 = vld [vmem:[%s990_s30] sm:$0xff]  ;;  %v329_v37 = vld [vmem:[%s990_s30 + $0x10] sm:$0xff] }
  0x17   : > { %525 = vmatprep.subr.mxu1 %v386_v21  ;;  %v354_v32 = vld [vmem:[%s995_s9 + $0x18] sm:$0xff]  ;;  %v351_v36 = vld [vmem:[%s995_s9] sm:$0xff]  ;;  %v353_v38 = vld [vmem:[%s995_s9 + $0x10] sm:$0xff] }
  0x18   : > { %449 = vmatpush1.msra.mxu0 %v383_v25  ;;  %v378_v35 = vmul.f32 %v354_v32, %v330_v31  ;;  %526 = vmatpush1.msra.mxu1 %v385_v29  ;;  %v375_v39 = vmul.f32 %v351_v36, %v327_v33  ;;  %v377_v40 = vmul.f32 %v353_v38, %v329_v37  ;;  %v348_v41 = vld [vmem:[%s990_s30 + $0xa8] sm:$0xff]  ;;  %v350_v43 = vld [vmem:[%s990_s30 + $0xb8] sm:$0xff]  ;;  %v347_v46 = vld [vmem:[%s990_s30 + $0xa0] sm:$0xff] }
  0x19   : > { %450 = vmatprep.subr.mxu0 %v376_v30  ;;  %v372_v42 = vld [vmem:[%s995_s9 + $0xa8] sm:$0xff]  ;;  %v374_v45 = vld [vmem:[%s995_s9 + $0xb8] sm:$0xff]  ;;  %v371_v47 = vld [vmem:[%s995_s9 + $0xa0] sm:$0xff] }
  0x1a   : > { %527 = vmatprep.subr.mxu1 %v378_v35  ;;  %v396_v44 = vmul.f32 %v372_v42, %v348_v41  ;;  %451 = vmatpush1.msra.mxu0 %v375_v39  ;;  %v398_v48 = vmul.f32 %v374_v45, %v350_v43  ;;  %v395_v49 = vmul.f32 %v371_v47, %v347_v46  ;;  %v349_v50 = vld [vmem:[%s990_s30 + $0xb0] sm:$0xff]  ;;  %v340_v52 = vld [vmem:[%s990_s30 + $0x68] sm:$0xff]  ;;  %v342_v55 = vld [vmem:[%s990_s30 + $0x78] sm:$0xff] }
  0x1b   : > { %528 = vmatpush1.msra.mxu1 %v377_v40  ;;  %v373_v51 = vld [vmem:[%s995_s9 + $0xb0] sm:$0xff]  ;;  %858 = vmatmul.mubr.msk.f32.vlgmr.msra.gmra.mxu0 %vm413_vm0, %v1021_v34  ;;  %v364_v54 = vld [vmem:[%s995_s9 + $0x68] sm:$0xff]  ;;  %v366_v56 = vld [vmem:[%s995_s9 + $0x78] sm:$0xff] }
  0x1c   : > { %860 = vmatmul.mubr.msk.f32.vlgmr.msra.gmra.mxu1 %vm413_vm0, %v1021_v34  ;;  %v397_v53 = vmul.f32 %v373_v51, %v349_v50  ;;  %600 = vmatprep.subr.mxu0 %v396_v44  ;;  %v388_v58 = vmul.f32 %v364_v54, %v340_v52  ;;  %v390_v59 = vmul.f32 %v366_v56, %v342_v55  ;;  %v339_v60 = vld [vmem:[%s990_s30 + $0x60] sm:$0xff]  ;;  %v341_v62 = vld [vmem:[%s990_s30 + $0x70] sm:$0xff]  ;;  %v332_v2 = vld [vmem:[%s990_s30 + $0x28] sm:$0xff] }
  0x1d   : > { %677 = vmatprep.subr.mxu1 %v398_v48  ;;  %v363_v61 = vld [vmem:[%s995_s9 + $0x60] sm:$0xff]  ;;  %601 = vmatpush1.msra.mxu0 %v395_v49  ;;  %v365_v1 = vld [vmem:[%s995_s9 + $0x70] sm:$0xff]  ;;  %v356_v3 = vld [vmem:[%s995_s9 + $0x28] sm:$0xff] }
  0x1e   : > { %678 = vmatpush1.msra.mxu1 %v397_v53  ;;  %v387_v63 = vmul.f32 %v363_v61, %v339_v60  ;;  %490 = vmatprep.mubr.f32.mxu0 %v921_v0  ;;  %v389_v4 = vmul.f32 %v365_v1, %v341_v62  ;;  %v380_v5 = vmul.f32 %v356_v3, %v332_v2  ;;  %v334_v6 = vld [vmem:[%s990_s30 + $0x38] sm:$0xff]  ;;  %v331_v8 = vld [vmem:[%s990_s30 + $0x20] sm:$0xff]  ;;  %v333_v11 = vld [vmem:[%s990_s30 + $0x30] sm:$0xff] }
  0x1f   : > { %567 = vmatprep.mubr.f32.mxu1 %v921_v0  ;;  %v358_v7 = vld [vmem:[%s995_s9 + $0x38] sm:$0xff]  ;;  %602 = vmatprep.subr.mxu0 %v388_v58  ;;  %v355_v10 = vld [vmem:[%s995_s9 + $0x20] sm:$0xff]  ;;  %v357_v12 = vld [vmem:[%s995_s9 + $0x30] sm:$0xff] }
  0x20   : > { %679 = vmatprep.subr.mxu1 %v390_v59  ;;  %v382_v9 = vmul.f32 %v358_v7, %v334_v6  ;;  %859 = vmatmul.mubr.msk.f32.gmra.mxu0 %vm413_vm0, %v400_v57  ;;  %v379_v13 = vmul.f32 %v355_v10, %v331_v8  ;;  %v381_v14 = vmul.f32 %v357_v12, %v333_v11 }
  0x21   : > { %861 = vmatmul.mubr.msk.f32.gmra.mxu1 %vm413_vm0, %v400_v57  ;;  %603 = vmatpush1.msra.mxu0 %v387_v63 }
  0x22   : > { %680 = vmatpush1.msra.mxu1 %v389_v4  ;;  %604 = vmatprep.subr.mxu0 %v380_v5 }
  0x23   : > { %681 = vmatprep.subr.mxu1 %v382_v9  ;;  %605 = vmatpush1.msra.mxu0 %v379_v13 }
  0x24   : > { %638 = vmatprep.mubr.f32.mxu0 %v921_v0  ;;  %682 = vmatpush1.msra.mxu1 %v381_v14 }
  0x25   : > { %715 = vmatprep.mubr.f32.mxu1 %v921_v0  ;;  %862 = vmatmul.mubr.msk.f32.vlgmr.msra.gmra.mxu0 %vm413_vm0, %v1021_v34 }
  0x26   : > { %864 = vmatmul.mubr.msk.f32.vlgmr.msra.gmra.mxu1 %vm413_vm0, %v1021_v34  ;;  %644 = vmatprep.mubr.f32.mxu0 %v921_v0 }
  0x27   : > { %721 = vmatprep.mubr.f32.mxu1 %v921_v0 }
  0x29   : > { %863 = vmatmul.mubr.msk.f32.gmra.mxu0 %vm413_vm0, %v400_v57 }
  0x2a   : > { %865 = vmatmul.mubr.msk.f32.gmra.mxu1 %vm413_vm0, %v400_v57 }
  0x8a   : > { %v406_v15 = vpop.permute.xlu0 %405 }
  0x8e   : > { %v411_v23 = vpop.permute.xlu0 %410 }
  0xdb   : > { %v486_v16 = vpop.f32.mrf.mxu0 }
  0xdc   : > { %v563_v17 = vpop.f32.mrf.mxu1  ;;  %v487_v18 = vadd.f32 %v486_v16, %v406_v15 }
  0xdd   : > { %v564_v19 = vadd.f32 %v563_v17, %v406_v15  ;;  %v488_v0 = vpop.f32.mrf.mxu0 }
  0xde   : > { %v565_v20 = vpop.f32.mrf.mxu1  ;;  %728 = vst [vmem:[%s1075_s17] sm:$0xff] %v487_v18  ;;  %v489_v21 = vadd.f32 %v488_v0, %v406_v15 }
  0xdf   : > { %730 = vst [vmem:[%s1075_s17 + $0x10] sm:$0xff] %v564_v19  ;;  %v566_v22 = vadd.f32 %v565_v20, %v406_v15 }
  0xe0   : > { %729 = vst [vmem:[%s1075_s17 + $0x8] sm:$0xff] %v489_v21  ;;  %v492_v24 = vpop.f32.mrf.mxu0 }
  0xe1   : > { %731 = vst [vmem:[%s1075_s17 + $0x18] sm:$0xff] %v566_v22  ;;  %v569_v25 = vpop.f32.mrf.mxu1  ;;  %v493_v26 = vadd.f32 %v492_v24, %v411_v23 }
  0xe2   : > { %v570_v27 = vadd.f32 %v569_v25, %v411_v23  ;;  %v494_v28 = vpop.f32.mrf.mxu0 }
  0xe3   : > { %v571_v29 = vpop.f32.mrf.mxu1  ;;  %736 = vst [vmem:[%s1075_s17 + $0x40] sm:$0xf] %v493_v26  ;;  %v495_v30 = vadd.f32 %v494_v28, %v411_v23 }
  0xe4   : > { %738 = vst [vmem:[%s1075_s17 + $0x50] sm:$0xf] %v570_v27  ;;  %v572_v31 = vadd.f32 %v571_v29, %v411_v23 }
  0xe5   : > { %737 = vst [vmem:[%s1075_s17 + $0x48] sm:$0xf] %v495_v30  ;;  %v640_v32 = vpop.f32.mrf.mxu0 }
  0xe6   : > { %739 = vst [vmem:[%s1075_s17 + $0x58] sm:$0xf] %v572_v31  ;;  %v717_v33 = vpop.f32.mrf.mxu1  ;;  %v641_v34 = vadd.f32 %v640_v32, %v406_v15 }
  0xe7   : > { %v718_v35 = vadd.f32 %v717_v33, %v406_v15  ;;  %v642_v36 = vpop.f32.mrf.mxu0 }
  0xe8   : > { %v719_v37 = vpop.f32.mrf.mxu1  ;;  %732 = vst [vmem:[%s1075_s17 + $0x20] sm:$0xff] %v641_v34  ;;  %v643_v38 = vadd.f32 %v642_v36, %v406_v15 }
  0xe9   : > { %734 = vst [vmem:[%s1075_s17 + $0x30] sm:$0xff] %v718_v35  ;;  %v720_v39 = vadd.f32 %v719_v37, %v406_v15  ;;  %v646_v40 = vpop.f32.mrf.mxu0 }
  0xea   : > { %v723_v41 = vpop.f32.mrf.mxu1  ;;  %733 = vst [vmem:[%s1075_s17 + $0x28] sm:$0xff] %v643_v38  ;;  %v647_v42 = vadd.f32 %v646_v40, %v411_v23 }
  0xeb   : > { %735 = vst [vmem:[%s1075_s17 + $0x38] sm:$0xff] %v720_v39  ;;  %v724_v43 = vadd.f32 %v723_v41, %v411_v23  ;;  %v648_v44 = vpop.f32.mrf.mxu0 }
  0xec   : > { %v725_v45 = vpop.f32.mrf.mxu1  ;;  %740 = vst [vmem:[%s1075_s17 + $0x60] sm:$0xf] %v647_v42  ;;  %v649_v46 = vadd.f32 %v648_v44, %v411_v23 }
  0xed   : > { %742 = vst [vmem:[%s1075_s17 + $0x70] sm:$0xf] %v724_v43  ;;  %v726_v47 = vadd.f32 %v725_v45, %v411_v23 }
  0xee   : > { %741 = vst [vmem:[%s1075_s17 + $0x68] sm:$0xf] %v649_v46 }
  0xef   : > { %743 = vst [vmem:[%s1075_s17 + $0x78] sm:$0xf] %v726_v47 }
  0xf0 PF: > { %s16_s23 = sadd.s32 1, %s919_s23   ;;  %s1109_s21 = smov %s915_s22 }
  0xf1   : > { %p13_p5 = scmp.ge.s32.totalorder %s16_s23, 4   ;;  %s1110_s22 = smov %s1112_s4 }
  0xf3   :  { %15 = sbr.rel (!%p13_p5) target bundleno = 2 (0x2), region = 77 }

</bundles_post_ra>
